<compile_context>
chip_gen: v7x
topology: tpu7x:2x2x1
jax: 0.10.0
libtpu: 0.0.40
codegen_flags: <defaults>
</compile_context>

<pallas_src>
import functools
import math

import jax
import jax.numpy as jnp
from jax.experimental import pallas as pl
from jax.experimental.pallas import tpu as pltpu


# ----------------------------------------------------------------------------
# Fused Pallas kernel
# ----------------------------------------------------------------------------
def _ln(x, g, b, eps=1e-5):
    mu = jnp.mean(x, axis=-1, keepdims=True)
    var = jnp.mean((x - mu) ** 2, axis=-1, keepdims=True)
    return (x - mu) * jax.lax.rsqrt(var + eps) * g + b


def _planning_head_kernel(
    pq_ref, mem_ref,
    fw_ref, fb_ref, fg_ref, fbb_ref,
    pos_ref, mmat_ref,
    sa_wv_ref, sa_bv_ref, sa_wo_ref, sa_bo_ref, ln1_g_ref, ln1_b_ref,
    ca_wq_ref, ca_bq_ref, ca_wk_ref, ca_wv_ref, ca_bv_ref,
    ca_wo_ref, ca_bo_ref, ln2_g_ref, ln2_b_ref,
    ff_w1_ref, ff_b1_ref, ff_w2_ref, ff_b2_ref, ln3_g_ref, ln3_b_ref,
    rg_w1_ref, rg_b1_ref, rg_w2_ref, rg_b2_ref, cum_ref,
    o_ref, *, num_layers, scale):
    f32 = jnp.float32
    mmat = mmat_ref[...]                              # (H, C) head-membership 0/1

    # --- mlp_fuser (Linear + LayerNorm + ReLU) + max over P modes + pos_embed
    h = jnp.dot(pq_ref[...], fw_ref[...], preferred_element_type=f32) + fb_ref[...]
    h = _ln(h, fg_ref[...], fbb_ref[...])
    h = jnp.maximum(h, 0.0)
    x = jnp.max(h, axis=0, keepdims=True) + pos_ref[...]          # (1, C)

    mem = mem_ref[...]                                # (HW, C) bev_embed + bev_pos

    for l in range(num_layers):
        # -- self-attention block: query length 1 => softmax over the single key
        #    is identically 1, so the block reduces exactly to out_proj(v_proj(x)).
        sa = jnp.dot(x, sa_wv_ref[l], preferred_element_type=f32) + sa_bv_ref[l]
        sa = jnp.dot(sa, sa_wo_ref[l], preferred_element_type=f32) + sa_bo_ref[l]
        x = _ln(x + sa, ln1_g_ref[l], ln1_b_ref[l])

        # -- cross-attention over the BEV memory (single-pass softmax).
        #    K projection folded into the query: s = mem @ (Wk^T @ qmat).
        #    The key bias adds a per-head constant to every score and is
        #    dropped exactly (softmax shift-invariance).
        q = jnp.dot(x, ca_wq_ref[l], preferred_element_type=f32) + ca_bq_ref[l]     # (1,C)
        qmat_t = mmat * (q * scale)                                                 # (H,C)
        wsq = jax.lax.dot_general(ca_wk_ref[l], qmat_t, (((1,), (1,)), ((), ())),
                                  preferred_element_type=f32)                       # (C,H)
        s = jnp.dot(mem, wsq, preferred_element_type=f32)                           # (HW,H)
        v = jnp.dot(mem, ca_wv_ref[l], preferred_element_type=f32) + ca_bv_ref[l]   # (HW,C)
        m = jnp.max(s, axis=0, keepdims=True)                                       # (1,H)
        p = jnp.exp(s - m)                                                          # (HW,H)
        lsum = jnp.sum(p, axis=0, keepdims=True)                                    # (1,H)
        pv = jax.lax.dot_general(p, v, (((0,), (0,)), ((), ())),
                                 preferred_element_type=f32)                        # (H,C)
        inv_l = pl.reciprocal(jnp.dot(lsum, mmat, preferred_element_type=f32),
                              approx=True)                                          # (1,C)
        attn = jnp.sum(mmat * pv, axis=0, keepdims=True) * inv_l                    # (1,C)
        ca = jnp.dot(attn, ca_wo_ref[l], preferred_element_type=f32) + ca_bo_ref[l]
        x = _ln(x + ca, ln2_g_ref[l], ln2_b_ref[l])

        # -- feed-forward block
        hf = jnp.maximum(
            jnp.dot(x, ff_w1_ref[l], preferred_element_type=f32) + ff_b1_ref[l], 0.0)
        ff = jnp.dot(hf, ff_w2_ref[l], preferred_element_type=f32) + ff_b2_ref[l]
        x = _ln(x + ff, ln3_g_ref[l], ln3_b_ref[l])

    # --- reg_branch (Linear -> ReLU -> Linear) + cumsum via constant matmul
    hr = jnp.maximum(
        jnp.dot(x, rg_w1_ref[...], preferred_element_type=f32) + rg_b1_ref[...], 0.0)
    traj = jnp.dot(hr, rg_w2_ref[...], preferred_element_type=f32) + rg_b2_ref[...]
    o_ref[...] = jnp.dot(traj, cum_ref[...], preferred_element_type=f32)


_IDX0 = {2: (lambda i: (0, 0)), 3: (lambda i: (0, 0, 0))}


def _full_spec(shape):
    return pl.BlockSpec(shape, _IDX0[len(shape)])


def planning_head_pallas(params, plan_query, mem, num_heads, planning_steps):
    """plan_query: (P, 3C); mem: (HW, C) = bev_embed + bev_pos. Returns (1, 2S)."""
    HW, C = mem.shape
    H = num_heads
    d = C // H
    L = len(params['decoder_layers'])
    scale = 1.0 / math.sqrt(d)
    S2 = 2 * planning_steps

    # head-membership indicator: mmat[h, c] = 1 iff channel c belongs to head h
    mmat = jnp.repeat(jnp.eye(H, dtype=jnp.float32), d, axis=1)          # (H, C)
    # cumsum-over-steps as a constant matrix: out[2s+c] = sum_{s'<=s} in[2s'+c]
    idx = jnp.arange(S2)
    cum = ((idx[:, None] % 2 == idx[None, :] % 2)
           & (idx[:, None] // 2 <= idx[None, :] // 2)).astype(jnp.float32)

    layers = params['decoder_layers']

    def stk(f):
        return jnp.stack([f(lp) for lp in layers])

    args = [
        plan_query, mem,
        params['fuser_w'].T, params['fuser_b'][None],
        params['fuser_ln_g'][None], params['fuser_ln_b'][None],
        params['pos_embed'], mmat,
        # self-attention: only V + out_proj are needed for query length 1
        stk(lambda lp: lp['sa_in_w'][2 * C:].T), stk(lambda lp: lp['sa_in_b'][2 * C:][None]),
        stk(lambda lp: lp['sa_out_w'].T), stk(lambda lp: lp['sa_out_b'][None]),
        stk(lambda lp: lp['ln1_g'][None]), stk(lambda lp: lp['ln1_b'][None]),
        # cross-attention (key bias dropped exactly; see kernel comment)
        stk(lambda lp: lp['ca_in_w'][:C].T), stk(lambda lp: lp['ca_in_b'][:C][None]),
        stk(lambda lp: lp['ca_in_w'][C:2 * C].T),
        stk(lambda lp: lp['ca_in_w'][2 * C:].T), stk(lambda lp: lp['ca_in_b'][2 * C:][None]),
        stk(lambda lp: lp['ca_out_w'].T), stk(lambda lp: lp['ca_out_b'][None]),
        stk(lambda lp: lp['ln2_g'][None]), stk(lambda lp: lp['ln2_b'][None]),
        # feed-forward
        stk(lambda lp: lp['l1_w'].T), stk(lambda lp: lp['l1_b'][None]),
        stk(lambda lp: lp['l2_w'].T), stk(lambda lp: lp['l2_b'][None]),
        stk(lambda lp: lp['ln3_g'][None]), stk(lambda lp: lp['ln3_b'][None]),
        # reg branch + cumsum matrix
        params['reg_w1'].T, params['reg_b1'][None],
        params['reg_w2'].T, params['reg_b2'][None], cum,
    ]

    # VMEM-resident fused decoder; production BEV sizes need the streaming variant.
    assert HW * C * 4 <= 8 * 1024 * 1024, "BEV memory too large for resident kernel"

    return pl.pallas_call(
        functools.partial(_planning_head_kernel, num_layers=L, scale=scale),
        out_shape=jax.ShapeDtypeStruct((1, S2), jnp.float32),
        grid_spec=pltpu.PrefetchScalarGridSpec(
            num_scalar_prefetch=0, grid=(1,),
            in_specs=[_full_spec(a.shape) for a in args],
            out_specs=_full_spec((1, S2))),
        compiler_params=pltpu.CompilerParams(dimension_semantics=("arbitrary",)),
    )(*args)


# ----------------------------------------------------------------------------
# Pure-JAX reference (for validation)
# ----------------------------------------------------------------------------
def layer_norm(x, g, b, eps=1e-5):
    mean = jnp.mean(x, axis=-1, keepdims=True)
    var = jnp.mean((x - mean) ** 2, axis=-1, keepdims=True)
    return (x - mean) * jax.lax.rsqrt(var + eps) * g + b


def mlp_fuser_max_ref(x, w1, b1, ln_g, ln_b):
    h = x @ w1.T + b1
    h = layer_norm(h, ln_g, ln_b)
    h = jnp.maximum(h, 0.0)
    return jnp.max(h, axis=0, keepdims=True)


def multi_head_attention(q, k, v, in_w, in_b, out_w, out_b, num_heads):
    """Reference nn.MultiheadAttention (no dropout). q:(Tq,C) k,v:(Tk,C)."""
    C = q.shape[-1]
    wq, wk, wv = in_w[:C], in_w[C:2 * C], in_w[2 * C:]
    bq, bk, bv = in_b[:C], in_b[C:2 * C], in_b[2 * C:]
    d = C // num_heads
    qp = (q @ wq.T + bq).reshape(-1, num_heads, d)
    kp = (k @ wk.T + bk).reshape(-1, num_heads, d)
    vp = (v @ wv.T + bv).reshape(-1, num_heads, d)
    s = jnp.einsum('qhd,khd->hqk', qp, kp) / jnp.sqrt(jnp.float32(d))
    p = jax.nn.softmax(s, axis=-1)
    o = jnp.einsum('hqk,khd->qhd', p, vp).reshape(-1, C)
    return o @ out_w.T + out_b


def decoder_layer_ref(x, mem, lp, num_heads):
    sa = multi_head_attention(x, x, x, lp['sa_in_w'], lp['sa_in_b'],
                              lp['sa_out_w'], lp['sa_out_b'], num_heads)
    x = layer_norm(x + sa, lp['ln1_g'], lp['ln1_b'])
    ca = multi_head_attention(x, mem, mem, lp['ca_in_w'], lp['ca_in_b'],
                              lp['ca_out_w'], lp['ca_out_b'], num_heads)
    x = layer_norm(x + ca, lp['ln2_g'], lp['ln2_b'])
    h = jnp.maximum(x @ lp['l1_w'].T + lp['l1_b'], 0.0)
    ff = h @ lp['l2_w'].T + lp['l2_b']
    x = layer_norm(x + ff, lp['ln3_g'], lp['ln3_b'])
    return x


# ----------------------------------------------------------------------------
# Forward pass (mirrors PlanningHeadSingleMode.forward, inference)
# ----------------------------------------------------------------------------
def planning_head_forward(params, bev_embed, bev_pos, sdc_traj_query,
                          sdc_track_query, command, num_heads=8,
                          planning_steps=6, use_pallas=True):
    """bev_embed: (HW, B=1, C); bev_pos: (B=1, C, H, W) NCHW;
    sdc_traj_query: (L, B, P, C); sdc_track_query: (B, C); command: (1,) int."""
    C = bev_embed.shape[-1]
    traj_q = sdc_traj_query[-1]                                 # (B, P, C)
    B, P, _ = traj_q.shape
    track_q = jnp.broadcast_to(sdc_track_query[:, None, :], (B, P, C))
    navi = params['navi_embed'][command]                        # (1, C)
    navi = jnp.broadcast_to(navi[None], (B, P, C))
    plan_query = jnp.concatenate([traj_q, track_q, navi], axis=-1)   # (B, P, 3C)

    # layer-invariant BEV memory computed ONCE: bev_embed + bev_pos, (HW, C)
    bev_pos_flat = bev_pos[0].reshape(C, -1).T
    mem = bev_embed[:, 0, :] + bev_pos_flat

    if use_pallas:
        traj = planning_head_pallas(params, plan_query[0], mem,
                                    num_heads, planning_steps)        # (1, 2S)
        traj = traj.reshape(-1, planning_steps, 2)                    # cumsum already applied
    else:
        fused = mlp_fuser_max_ref(plan_query[0], params['fuser_w'], params['fuser_b'],
                                  params['fuser_ln_g'], params['fuser_ln_b'])
        x = fused + params['pos_embed']
        for lp in params['decoder_layers']:
            x = decoder_layer_ref(x, mem, lp, num_heads)
        h = jnp.maximum(x @ params['reg_w1'].T + params['reg_b1'], 0.0)
        traj = h @ params['reg_w2'].T + params['reg_b2']
        traj = traj.reshape(-1, planning_steps, 2)
        traj = jnp.cumsum(traj, axis=1)

    # bivariate_gaussian_activation is an identity for 2-dim (x, y) outputs
    return dict(sdc_traj=traj, sdc_traj_all=traj)


# ----------------------------------------------------------------------------
# Deterministic parameter initialization (shapes from the module __init__)
# ----------------------------------------------------------------------------
def init_params(key, C=32, planning_steps=6, n_dec_layers=3, fuser_dim=3):
    keys = jax.random.split(key, 64)
    it = iter(keys)

    def nrm(shape, scale=0.02):
        return jax.random.normal(next(it), shape, jnp.float32) * scale

    dff = 2 * C
    params = dict(
        navi_embed=nrm((3, C)),
        fuser_w=nrm((C, fuser_dim * C)), fuser_b=nrm((C,)),
        fuser_ln_g=jnp.ones((C,), jnp.float32), fuser_ln_b=jnp.zeros((C,), jnp.float32),
        pos_embed=nrm((1, C)),
        reg_w1=nrm((C, C)), reg_b1=nrm((C,)),
        reg_w2=nrm((planning_steps * 2, C)), reg_b2=nrm((planning_steps * 2,)),
    )
    layers = []
    for _ in range(n_dec_layers):
        layers.append(dict(
            sa_in_w=nrm((3 * C, C)), sa_in_b=nrm((3 * C,)),
            sa_out_w=nrm((C, C)), sa_out_b=nrm((C,)),
            ca_in_w=nrm((3 * C, C)), ca_in_b=nrm((3 * C,)),
            ca_out_w=nrm((C, C)), ca_out_b=nrm((C,)),
            l1_w=nrm((dff, C)), l1_b=nrm((dff,)),
            l2_w=nrm((C, dff)), l2_b=nrm((C,)),
            ln1_g=jnp.ones((C,), jnp.float32), ln1_b=jnp.zeros((C,), jnp.float32),
            ln2_g=jnp.ones((C,), jnp.float32), ln2_b=jnp.zeros((C,), jnp.float32),
            ln3_g=jnp.ones((C,), jnp.float32), ln3_b=jnp.zeros((C,), jnp.float32),
        ))
    params['decoder_layers'] = layers
    return params


if __name__ == "__main__":
    # small shapes consistent with the module: embed_dims=32, nhead=8,
    # bev 16x16, P=6 trajectory-query modes, planning_steps=6, 3 motion layers
    C, NUM_HEADS, BEV_H, BEV_W, P, STEPS, L = 32, 8, 16, 16, 6, 6, 3
    HW = BEV_H * BEV_W

    key = jax.random.PRNGKey(0)
    kp, k1, k2, k3, k4 = jax.random.split(key, 5)
    params = init_params(kp, C=C, planning_steps=STEPS)

    bev_embed = jax.random.normal(k1, (HW, 1, C), jnp.float32)
    bev_pos = jax.random.normal(k2, (1, C, BEV_H, BEV_W), jnp.float32)   # NCHW
    sdc_traj_query = jax.random.normal(k3, (L, 1, P, C), jnp.float32)
    sdc_track_query = jax.random.normal(k4, (1, C), jnp.float32)
    command = jnp.array([1], jnp.int32)

    fwd_pallas = jax.jit(functools.partial(planning_head_forward,
                                           num_heads=NUM_HEADS,
                                           planning_steps=STEPS, use_pallas=True))
    fwd_ref = jax.jit(functools.partial(planning_head_forward,
                                        num_heads=NUM_HEADS,
                                        planning_steps=STEPS, use_pallas=False))

    out = fwd_pallas(params, bev_embed, bev_pos, sdc_traj_query,
                     sdc_track_query, command)
    traj = jax.block_until_ready(out['sdc_traj'])

    ref = jax.block_until_ready(
        fwd_ref(params, bev_embed, bev_pos, sdc_traj_query,
                sdc_track_query, command)['sdc_traj'])

    assert traj.shape == (1, STEPS, 2), traj.shape
    assert jnp.all(jnp.isfinite(traj))
    assert jnp.allclose(traj, ref, rtol=1e-2, atol=1e-2), (traj, ref)
    print("KERNEL_OK")
</pallas_src>

<mosaic_0001>
module attributes {stable_mosaic.version = 11 : i64} {
  func.func @_planning_head_kernel(%arg0: i32, %arg1: memref<6x96xf32, #tpu.memory_space<vmem>>, %arg2: memref<256x32xf32, #tpu.memory_space<vmem>>, %arg3: memref<96x32xf32, #tpu.memory_space<vmem>>, %arg4: memref<1x32xf32, #tpu.memory_space<vmem>>, %arg5: memref<1x32xf32, #tpu.memory_space<vmem>>, %arg6: memref<1x32xf32, #tpu.memory_space<vmem>>, %arg7: memref<1x32xf32, #tpu.memory_space<vmem>>, %arg8: memref<8x32xf32, #tpu.memory_space<vmem>>, %arg9: memref<3x32x32xf32, #tpu.memory_space<vmem>>, %arg10: memref<3x1x32xf32, #tpu.memory_space<vmem>>, %arg11: memref<3x32x32xf32, #tpu.memory_space<vmem>>, %arg12: memref<3x1x32xf32, #tpu.memory_space<vmem>>, %arg13: memref<3x1x32xf32, #tpu.memory_space<vmem>>, %arg14: memref<3x1x32xf32, #tpu.memory_space<vmem>>, %arg15: memref<3x32x32xf32, #tpu.memory_space<vmem>>, %arg16: memref<3x1x32xf32, #tpu.memory_space<vmem>>, %arg17: memref<3x32x32xf32, #tpu.memory_space<vmem>>, %arg18: memref<3x32x32xf32, #tpu.memory_space<vmem>>, %arg19: memref<3x1x32xf32, #tpu.memory_space<vmem>>, %arg20: memref<3x32x32xf32, #tpu.memory_space<vmem>>, %arg21: memref<3x1x32xf32, #tpu.memory_space<vmem>>, %arg22: memref<3x1x32xf32, #tpu.memory_space<vmem>>, %arg23: memref<3x1x32xf32, #tpu.memory_space<vmem>>, %arg24: memref<3x32x64xf32, #tpu.memory_space<vmem>>, %arg25: memref<3x1x64xf32, #tpu.memory_space<vmem>>, %arg26: memref<3x64x32xf32, #tpu.memory_space<vmem>>, %arg27: memref<3x1x32xf32, #tpu.memory_space<vmem>>, %arg28: memref<3x1x32xf32, #tpu.memory_space<vmem>>, %arg29: memref<3x1x32xf32, #tpu.memory_space<vmem>>, %arg30: memref<32x32xf32, #tpu.memory_space<vmem>>, %arg31: memref<1x32xf32, #tpu.memory_space<vmem>>, %arg32: memref<32x12xf32, #tpu.memory_space<vmem>>, %arg33: memref<1x12xf32, #tpu.memory_space<vmem>>, %arg34: memref<12x12xf32, #tpu.memory_space<vmem>>, %arg35: memref<1x12xf32, #tpu.memory_space<vmem>>) attributes {dimension_semantics = [#tpu.dimension_semantics<arbitrary>], iteration_bounds = array<i64: 1>, scalar_prefetch = 0 : i64, scratch_operands = 0 : i64, tpu.core_type = #tpu.core_type<tc>, window_params = [{pipeline_mode = #tpu.pipeline_mode<synchronous>, transform_indices = @transform_0, window_bounds = array<i64: 6, 96>}, {pipeline_mode = #tpu.pipeline_mode<synchronous>, transform_indices = @transform_1, window_bounds = array<i64: 256, 32>}, {pipeline_mode = #tpu.pipeline_mode<synchronous>, transform_indices = @transform_2, window_bounds = array<i64: 96, 32>}, {pipeline_mode = #tpu.pipeline_mode<synchronous>, transform_indices = @transform_3, window_bounds = array<i64: 1, 32>}, {pipeline_mode = #tpu.pipeline_mode<synchronous>, transform_indices = @transform_4, window_bounds = array<i64: 1, 32>}, {pipeline_mode = #tpu.pipeline_mode<synchronous>, transform_indices = @transform_5, window_bounds = array<i64: 1, 32>}, {pipeline_mode = #tpu.pipeline_mode<synchronous>, transform_indices = @transform_6, window_bounds = array<i64: 1, 32>}, {pipeline_mode = #tpu.pipeline_mode<synchronous>, transform_indices = @transform_7, window_bounds = array<i64: 8, 32>}, {pipeline_mode = #tpu.pipeline_mode<synchronous>, transform_indices = @transform_8, window_bounds = array<i64: 3, 32, 32>}, {pipeline_mode = #tpu.pipeline_mode<synchronous>, transform_indices = @transform_9, window_bounds = array<i64: 3, 1, 32>}, {pipeline_mode = #tpu.pipeline_mode<synchronous>, transform_indices = @transform_10, window_bounds = array<i64: 3, 32, 32>}, {pipeline_mode = #tpu.pipeline_mode<synchronous>, transform_indices = @transform_11, window_bounds = array<i64: 3, 1, 32>}, {pipeline_mode = #tpu.pipeline_mode<synchronous>, transform_indices = @transform_12, window_bounds = array<i64: 3, 1, 32>}, {pipeline_mode = #tpu.pipeline_mode<synchronous>, transform_indices = @transform_13, window_bounds = array<i64: 3, 1, 32>}, {pipeline_mode = #tpu.pipeline_mode<synchronous>, transform_indices = @transform_14, window_bounds = array<i64: 3, 32, 32>}, {pipeline_mode = #tpu.pipeline_mode<synchronous>, transform_indices = @transform_15, window_bounds = array<i64: 3, 1, 32>}, {pipeline_mode = #tpu.pipeline_mode<synchronous>, transform_indices = @transform_16, window_bounds = array<i64: 3, 32, 32>}, {pipeline_mode = #tpu.pipeline_mode<synchronous>, transform_indices = @transform_17, window_bounds = array<i64: 3, 32, 32>}, {pipeline_mode = #tpu.pipeline_mode<synchronous>, transform_indices = @transform_18, window_bounds = array<i64: 3, 1, 32>}, {pipeline_mode = #tpu.pipeline_mode<synchronous>, transform_indices = @transform_19, window_bounds = array<i64: 3, 32, 32>}, {pipeline_mode = #tpu.pipeline_mode<synchronous>, transform_indices = @transform_20, window_bounds = array<i64: 3, 1, 32>}, {pipeline_mode = #tpu.pipeline_mode<synchronous>, transform_indices = @transform_21, window_bounds = array<i64: 3, 1, 32>}, {pipeline_mode = #tpu.pipeline_mode<synchronous>, transform_indices = @transform_22, window_bounds = array<i64: 3, 1, 32>}, {pipeline_mode = #tpu.pipeline_mode<synchronous>, transform_indices = @transform_23, window_bounds = array<i64: 3, 32, 64>}, {pipeline_mode = #tpu.pipeline_mode<synchronous>, transform_indices = @transform_24, window_bounds = array<i64: 3, 1, 64>}, {pipeline_mode = #tpu.pipeline_mode<synchronous>, transform_indices = @transform_25, window_bounds = array<i64: 3, 64, 32>}, {pipeline_mode = #tpu.pipeline_mode<synchronous>, transform_indices = @transform_26, window_bounds = array<i64: 3, 1, 32>}, {pipeline_mode = #tpu.pipeline_mode<synchronous>, transform_indices = @transform_27, window_bounds = array<i64: 3, 1, 32>}, {pipeline_mode = #tpu.pipeline_mode<synchronous>, transform_indices = @transform_28, window_bounds = array<i64: 3, 1, 32>}, {pipeline_mode = #tpu.pipeline_mode<synchronous>, transform_indices = @transform_29, window_bounds = array<i64: 32, 32>}, {pipeline_mode = #tpu.pipeline_mode<synchronous>, transform_indices = @transform_30, window_bounds = array<i64: 1, 32>}, {pipeline_mode = #tpu.pipeline_mode<synchronous>, transform_indices = @transform_31, window_bounds = array<i64: 32, 12>}, {pipeline_mode = #tpu.pipeline_mode<synchronous>, transform_indices = @transform_32, window_bounds = array<i64: 1, 12>}, {pipeline_mode = #tpu.pipeline_mode<synchronous>, transform_indices = @transform_33, window_bounds = array<i64: 12, 12>}, {pipeline_mode = #tpu.pipeline_mode<synchronous>, transform_indices = @transform_34, window_bounds = array<i64: 1, 12>}]} {
    %c0 = arith.constant 0 : index
    %c0_0 = arith.constant 0 : index
    %0 = vector.load %arg8[%c0, %c0_0] : memref<8x32xf32, #tpu.memory_space<vmem>>, vector<8x32xf32>
    %c0_1 = arith.constant 0 : index
    %c0_2 = arith.constant 0 : index
    %1 = vector.load %arg1[%c0_1, %c0_2] : memref<6x96xf32, #tpu.memory_space<vmem>>, vector<6x96xf32>
    %c0_3 = arith.constant 0 : index
    %c0_4 = arith.constant 0 : index
    %2 = vector.load %arg3[%c0_3, %c0_4] : memref<96x32xf32, #tpu.memory_space<vmem>>, vector<96x32xf32>
    %cst = arith.constant dense<0.000000e+00> : vector<6x32xf32>
    %3 = tpu.matmul %1, %2, %cst {dimension_numbers = #tpu.dot_dimension_numbers<[1], [0], [0], [1], [0, 0, 1, 1], [], []>} : vector<6x96xf32>, vector<96x32xf32>, vector<6x32xf32> -> vector<6x32xf32>
    %c0_5 = arith.constant 0 : index
    %c0_6 = arith.constant 0 : index
    %4 = vector.load %arg4[%c0_5, %c0_6] : memref<1x32xf32, #tpu.memory_space<vmem>>, vector<1x32xf32>
    %5 = vector.broadcast %4 : vector<1x32xf32> to vector<6x32xf32>
    %6 = arith.addf %3, %5 : vector<6x32xf32>
    %c0_7 = arith.constant 0 : index
    %c0_8 = arith.constant 0 : index
    %7 = vector.load %arg5[%c0_7, %c0_8] : memref<1x32xf32, #tpu.memory_space<vmem>>, vector<1x32xf32>
    %c0_9 = arith.constant 0 : index
    %c0_10 = arith.constant 0 : index
    %8 = vector.load %arg6[%c0_9, %c0_10] : memref<1x32xf32, #tpu.memory_space<vmem>>, vector<1x32xf32>
    %cst_11 = arith.constant dense<0.000000e+00> : vector<6xf32>
    %9 = vector.multi_reduction <add>, %6, %cst_11 [1] : vector<6x32xf32> to vector<6xf32>
    %10 = vector.shape_cast %9 : vector<6xf32> to vector<6x1xf32>
    %cst_12 = arith.constant 3.200000e+01 : f32
    %11 = vector.broadcast %cst_12 : f32 to vector<6x1xf32>
    %12 = arith.divf %10, %11 : vector<6x1xf32>
    %13 = vector.broadcast %12 : vector<6x1xf32> to vector<6x32xf32>
    %14 = arith.subf %6, %13 : vector<6x32xf32>
    %15 = arith.mulf %14, %14 : vector<6x32xf32>
    %cst_13 = arith.constant dense<0.000000e+00> : vector<6xf32>
    %16 = vector.multi_reduction <add>, %15, %cst_13 [1] : vector<6x32xf32> to vector<6xf32>
    %17 = vector.shape_cast %16 : vector<6xf32> to vector<6x1xf32>
    %cst_14 = arith.constant 3.200000e+01 : f32
    %18 = vector.broadcast %cst_14 : f32 to vector<6x1xf32>
    %19 = arith.divf %17, %18 : vector<6x1xf32>
    %20 = vector.broadcast %12 : vector<6x1xf32> to vector<6x32xf32>
    %21 = arith.subf %6, %20 : vector<6x32xf32>
    %cst_15 = arith.constant 9.99999974E-6 : f32
    %22 = vector.broadcast %cst_15 : f32 to vector<6x1xf32>
    %23 = arith.addf %19, %22 : vector<6x1xf32>
    %24 = math.rsqrt %23 : vector<6x1xf32>
    %25 = vector.broadcast %24 : vector<6x1xf32> to vector<6x32xf32>
    %26 = arith.mulf %21, %25 : vector<6x32xf32>
    %27 = vector.broadcast %7 : vector<1x32xf32> to vector<6x32xf32>
    %28 = arith.mulf %26, %27 : vector<6x32xf32>
    %29 = vector.broadcast %8 : vector<1x32xf32> to vector<6x32xf32>
    %30 = arith.addf %28, %29 : vector<6x32xf32>
    %cst_16 = arith.constant 0.000000e+00 : f32
    %31 = vector.broadcast %cst_16 : f32 to vector<6x32xf32>
    %32 = arith.maximumf %30, %31 : vector<6x32xf32>
    %cst_17 = arith.constant dense<0xFF800000> : vector<32xf32>
    %33 = vector.multi_reduction <maximumf>, %32, %cst_17 [0] : vector<6x32xf32> to vector<32xf32>
    %34 = vector.shape_cast %33 : vector<32xf32> to vector<1x32xf32>
    %c0_18 = arith.constant 0 : index
    %c0_19 = arith.constant 0 : index
    %35 = vector.load %arg7[%c0_18, %c0_19] : memref<1x32xf32, #tpu.memory_space<vmem>>, vector<1x32xf32>
    %36 = arith.addf %34, %35 : vector<1x32xf32>
    %c0_20 = arith.constant 0 : index
    %c0_21 = arith.constant 0 : index
    %37 = vector.load %arg2[%c0_20, %c0_21] : memref<256x32xf32, #tpu.memory_space<vmem>>, vector<256x32xf32>
    %c0_22 = arith.constant 0 : index
    %c0_23 = arith.constant 0 : index
    %c0_24 = arith.constant 0 : index
    %38 = vector.load %arg9[%c0_22, %c0_23, %c0_24] : memref<3x32x32xf32, #tpu.memory_space<vmem>>, vector<1x32x32xf32>
    %39 = vector.shape_cast %38 : vector<1x32x32xf32> to vector<32x32xf32>
    %cst_25 = arith.constant dense<0.000000e+00> : vector<1x32xf32>
    %40 = tpu.matmul %36, %39, %cst_25 {dimension_numbers = #tpu.dot_dimension_numbers<[1], [0], [0], [1], [0, 0, 1, 1], [], []>} : vector<1x32xf32>, vector<32x32xf32>, vector<1x32xf32> -> vector<1x32xf32>
    %c0_26 = arith.constant 0 : index
    %c0_27 = arith.constant 0 : index
    %c0_28 = arith.constant 0 : index
    %41 = vector.load %arg10[%c0_26, %c0_27, %c0_28] : memref<3x1x32xf32, #tpu.memory_space<vmem>>, vector<1x1x32xf32>
    %42 = vector.shape_cast %41 : vector<1x1x32xf32> to vector<1x32xf32>
    %43 = arith.addf %40, %42 : vector<1x32xf32>
    %c0_29 = arith.constant 0 : index
    %c0_30 = arith.constant 0 : index
    %c0_31 = arith.constant 0 : index
    %44 = vector.load %arg11[%c0_29, %c0_30, %c0_31] : memref<3x32x32xf32, #tpu.memory_space<vmem>>, vector<1x32x32xf32>
    %45 = vector.shape_cast %44 : vector<1x32x32xf32> to vector<32x32xf32>
    %cst_32 = arith.constant dense<0.000000e+00> : vector<1x32xf32>
    %46 = tpu.matmul %43, %45, %cst_32 {dimension_numbers = #tpu.dot_dimension_numbers<[1], [0], [0], [1], [0, 0, 1, 1], [], []>} : vector<1x32xf32>, vector<32x32xf32>, vector<1x32xf32> -> vector<1x32xf32>
    %c0_33 = arith.constant 0 : index
    %c0_34 = arith.constant 0 : index
    %c0_35 = arith.constant 0 : index
    %47 = vector.load %arg12[%c0_33, %c0_34, %c0_35] : memref<3x1x32xf32, #tpu.memory_space<vmem>>, vector<1x1x32xf32>
    %48 = vector.shape_cast %47 : vector<1x1x32xf32> to vector<1x32xf32>
    %49 = arith.addf %46, %48 : vector<1x32xf32>
    %50 = arith.addf %36, %49 : vector<1x32xf32>
    %c0_36 = arith.constant 0 : index
    %c0_37 = arith.constant 0 : index
    %c0_38 = arith.constant 0 : index
    %51 = vector.load %arg13[%c0_36, %c0_37, %c0_38] : memref<3x1x32xf32, #tpu.memory_space<vmem>>, vector<1x1x32xf32>
    %52 = vector.shape_cast %51 : vector<1x1x32xf32> to vector<1x32xf32>
    %c0_39 = arith.constant 0 : index
    %c0_40 = arith.constant 0 : index
    %c0_41 = arith.constant 0 : index
    %53 = vector.load %arg14[%c0_39, %c0_40, %c0_41] : memref<3x1x32xf32, #tpu.memory_space<vmem>>, vector<1x1x32xf32>
    %54 = vector.shape_cast %53 : vector<1x1x32xf32> to vector<1x32xf32>
    %cst_42 = arith.constant dense<0.000000e+00> : vector<1xf32>
    %55 = vector.multi_reduction <add>, %50, %cst_42 [1] : vector<1x32xf32> to vector<1xf32>
    %56 = vector.shape_cast %55 : vector<1xf32> to vector<1x1xf32>
    %cst_43 = arith.constant 3.200000e+01 : f32
    %57 = vector.broadcast %cst_43 : f32 to vector<1x1xf32>
    %58 = arith.divf %56, %57 : vector<1x1xf32>
    %59 = vector.broadcast %58 : vector<1x1xf32> to vector<1x32xf32>
    %60 = arith.subf %50, %59 : vector<1x32xf32>
    %61 = arith.mulf %60, %60 : vector<1x32xf32>
    %cst_44 = arith.constant dense<0.000000e+00> : vector<1xf32>
    %62 = vector.multi_reduction <add>, %61, %cst_44 [1] : vector<1x32xf32> to vector<1xf32>
    %63 = vector.shape_cast %62 : vector<1xf32> to vector<1x1xf32>
    %cst_45 = arith.constant 3.200000e+01 : f32
    %64 = vector.broadcast %cst_45 : f32 to vector<1x1xf32>
    %65 = arith.divf %63, %64 : vector<1x1xf32>
    %66 = vector.broadcast %58 : vector<1x1xf32> to vector<1x32xf32>
    %67 = arith.subf %50, %66 : vector<1x32xf32>
    %cst_46 = arith.constant 9.99999974E-6 : f32
    %68 = vector.broadcast %cst_46 : f32 to vector<1x1xf32>
    %69 = arith.addf %65, %68 : vector<1x1xf32>
    %70 = math.rsqrt %69 : vector<1x1xf32>
    %71 = vector.broadcast %70 : vector<1x1xf32> to vector<1x32xf32>
    %72 = arith.mulf %67, %71 : vector<1x32xf32>
    %73 = arith.mulf %72, %52 : vector<1x32xf32>
    %74 = arith.addf %73, %54 : vector<1x32xf32>
    %c0_47 = arith.constant 0 : index
    %c0_48 = arith.constant 0 : index
    %c0_49 = arith.constant 0 : index
    %75 = vector.load %arg15[%c0_47, %c0_48, %c0_49] : memref<3x32x32xf32, #tpu.memory_space<vmem>>, vector<1x32x32xf32>
    %76 = vector.shape_cast %75 : vector<1x32x32xf32> to vector<32x32xf32>
    %cst_50 = arith.constant dense<0.000000e+00> : vector<1x32xf32>
    %77 = tpu.matmul %74, %76, %cst_50 {dimension_numbers = #tpu.dot_dimension_numbers<[1], [0], [0], [1], [0, 0, 1, 1], [], []>} : vector<1x32xf32>, vector<32x32xf32>, vector<1x32xf32> -> vector<1x32xf32>
    %c0_51 = arith.constant 0 : index
    %c0_52 = arith.constant 0 : index
    %c0_53 = arith.constant 0 : index
    %78 = vector.load %arg16[%c0_51, %c0_52, %c0_53] : memref<3x1x32xf32, #tpu.memory_space<vmem>>, vector<1x1x32xf32>
    %79 = vector.shape_cast %78 : vector<1x1x32xf32> to vector<1x32xf32>
    %80 = arith.addf %77, %79 : vector<1x32xf32>
    %cst_54 = arith.constant 5.000000e-01 : f32
    %81 = vector.broadcast %cst_54 : f32 to vector<1x32xf32>
    %82 = arith.mulf %80, %81 : vector<1x32xf32>
    %83 = vector.broadcast %82 : vector<1x32xf32> to vector<8x32xf32>
    %84 = arith.mulf %0, %83 : vector<8x32xf32>
    %c0_55 = arith.constant 0 : index
    %c0_56 = arith.constant 0 : index
    %c0_57 = arith.constant 0 : index
    %85 = vector.load %arg17[%c0_55, %c0_56, %c0_57] : memref<3x32x32xf32, #tpu.memory_space<vmem>>, vector<1x32x32xf32>
    %86 = vector.shape_cast %85 : vector<1x32x32xf32> to vector<32x32xf32>
    %cst_58 = arith.constant dense<0.000000e+00> : vector<32x8xf32>
    %87 = tpu.matmul %86, %84, %cst_58 {dimension_numbers = #tpu.dot_dimension_numbers<[1], [1], [0], [0], [0, 0, 1, 0], [], []>} : vector<32x32xf32>, vector<8x32xf32>, vector<32x8xf32> -> vector<32x8xf32>
    %cst_59 = arith.constant dense<0.000000e+00> : vector<256x8xf32>
    %88 = tpu.matmul %37, %87, %cst_59 {dimension_numbers = #tpu.dot_dimension_numbers<[1], [0], [0], [1], [0, 0, 1, 1], [], []>} : vector<256x32xf32>, vector<32x8xf32>, vector<256x8xf32> -> vector<256x8xf32>
    %c0_60 = arith.constant 0 : index
    %c0_61 = arith.constant 0 : index
    %c0_62 = arith.constant 0 : index
    %89 = vector.load %arg18[%c0_60, %c0_61, %c0_62] : memref<3x32x32xf32, #tpu.memory_space<vmem>>, vector<1x32x32xf32>
    %90 = vector.shape_cast %89 : vector<1x32x32xf32> to vector<32x32xf32>
    %cst_63 = arith.constant dense<0.000000e+00> : vector<256x32xf32>
    %91 = tpu.matmul %37, %90, %cst_63 {dimension_numbers = #tpu.dot_dimension_numbers<[1], [0], [0], [1], [0, 0, 1, 1], [], []>} : vector<256x32xf32>, vector<32x32xf32>, vector<256x32xf32> -> vector<256x32xf32>
    %c0_64 = arith.constant 0 : index
    %c0_65 = arith.constant 0 : index
    %c0_66 = arith.constant 0 : index
    %92 = vector.load %arg19[%c0_64, %c0_65, %c0_66] : memref<3x1x32xf32, #tpu.memory_space<vmem>>, vector<1x1x32xf32>
    %93 = vector.shape_cast %92 : vector<1x1x32xf32> to vector<1x32xf32>
    %94 = vector.broadcast %93 : vector<1x32xf32> to vector<256x32xf32>
    %95 = arith.addf %91, %94 : vector<256x32xf32>
    %cst_67 = arith.constant dense<0xFF800000> : vector<8xf32>
    %96 = vector.multi_reduction <maximumf>, %88, %cst_67 [0] : vector<256x8xf32> to vector<8xf32>
    %97 = vector.shape_cast %96 : vector<8xf32> to vector<1x8xf32>
    %98 = vector.broadcast %97 : vector<1x8xf32> to vector<256x8xf32>
    %99 = arith.subf %88, %98 : vector<256x8xf32>
    %100 = math.exp %99 : vector<256x8xf32>
    %cst_68 = arith.constant dense<0.000000e+00> : vector<8xf32>
    %101 = vector.multi_reduction <add>, %100, %cst_68 [0] : vector<256x8xf32> to vector<8xf32>
    %102 = vector.shape_cast %101 : vector<8xf32> to vector<1x8xf32>
    %cst_69 = arith.constant dense<0.000000e+00> : vector<8x32xf32>
    %103 = tpu.matmul %100, %95, %cst_69 {dimension_numbers = #tpu.dot_dimension_numbers<[0], [0], [1], [1], [0, 1, 1, 1], [], []>} : vector<256x8xf32>, vector<256x32xf32>, vector<8x32xf32> -> vector<8x32xf32>
    %cst_70 = arith.constant dense<0.000000e+00> : vector<1x32xf32>
    %104 = tpu.matmul %102, %0, %cst_70 {dimension_numbers = #tpu.dot_dimension_numbers<[1], [0], [0], [1], [0, 0, 1, 1], [], []>} : vector<1x8xf32>, vector<8x32xf32>, vector<1x32xf32> -> vector<1x32xf32>
    %105 = tpu.reciprocal %104 {approx = true} : vector<1x32xf32> -> vector<1x32xf32>
    %106 = arith.mulf %0, %103 : vector<8x32xf32>
    %cst_71 = arith.constant dense<0.000000e+00> : vector<32xf32>
    %107 = vector.multi_reduction <add>, %106, %cst_71 [0] : vector<8x32xf32> to vector<32xf32>
    %108 = vector.shape_cast %107 : vector<32xf32> to vector<1x32xf32>
    %109 = arith.mulf %108, %105 : vector<1x32xf32>
    %c0_72 = arith.constant 0 : index
    %c0_73 = arith.constant 0 : index
    %c0_74 = arith.constant 0 : index
    %110 = vector.load %arg20[%c0_72, %c0_73, %c0_74] : memref<3x32x32xf32, #tpu.memory_space<vmem>>, vector<1x32x32xf32>
    %111 = vector.shape_cast %110 : vector<1x32x32xf32> to vector<32x32xf32>
    %cst_75 = arith.constant dense<0.000000e+00> : vector<1x32xf32>
    %112 = tpu.matmul %109, %111, %cst_75 {dimension_numbers = #tpu.dot_dimension_numbers<[1], [0], [0], [1], [0, 0, 1, 1], [], []>} : vector<1x32xf32>, vector<32x32xf32>, vector<1x32xf32> -> vector<1x32xf32>
    %c0_76 = arith.constant 0 : index
    %c0_77 = arith.constant 0 : index
    %c0_78 = arith.constant 0 : index
    %113 = vector.load %arg21[%c0_76, %c0_77, %c0_78] : memref<3x1x32xf32, #tpu.memory_space<vmem>>, vector<1x1x32xf32>
    %114 = vector.shape_cast %113 : vector<1x1x32xf32> to vector<1x32xf32>
    %115 = arith.addf %112, %114 : vector<1x32xf32>
    %116 = arith.addf %74, %115 : vector<1x32xf32>
    %c0_79 = arith.constant 0 : index
    %c0_80 = arith.constant 0 : index
    %c0_81 = arith.constant 0 : index
    %117 = vector.load %arg22[%c0_79, %c0_80, %c0_81] : memref<3x1x32xf32, #tpu.memory_space<vmem>>, vector<1x1x32xf32>
    %118 = vector.shape_cast %117 : vector<1x1x32xf32> to vector<1x32xf32>
    %c0_82 = arith.constant 0 : index
    %c0_83 = arith.constant 0 : index
    %c0_84 = arith.constant 0 : index
    %119 = vector.load %arg23[%c0_82, %c0_83, %c0_84] : memref<3x1x32xf32, #tpu.memory_space<vmem>>, vector<1x1x32xf32>
    %120 = vector.shape_cast %119 : vector<1x1x32xf32> to vector<1x32xf32>
    %cst_85 = arith.constant dense<0.000000e+00> : vector<1xf32>
    %121 = vector.multi_reduction <add>, %116, %cst_85 [1] : vector<1x32xf32> to vector<1xf32>
    %122 = vector.shape_cast %121 : vector<1xf32> to vector<1x1xf32>
    %cst_86 = arith.constant 3.200000e+01 : f32
    %123 = vector.broadcast %cst_86 : f32 to vector<1x1xf32>
    %124 = arith.divf %122, %123 : vector<1x1xf32>
    %125 = vector.broadcast %124 : vector<1x1xf32> to vector<1x32xf32>
    %126 = arith.subf %116, %125 : vector<1x32xf32>
    %127 = arith.mulf %126, %126 : vector<1x32xf32>
    %cst_87 = arith.constant dense<0.000000e+00> : vector<1xf32>
    %128 = vector.multi_reduction <add>, %127, %cst_87 [1] : vector<1x32xf32> to vector<1xf32>
    %129 = vector.shape_cast %128 : vector<1xf32> to vector<1x1xf32>
    %cst_88 = arith.constant 3.200000e+01 : f32
    %130 = vector.broadcast %cst_88 : f32 to vector<1x1xf32>
    %131 = arith.divf %129, %130 : vector<1x1xf32>
    %132 = vector.broadcast %124 : vector<1x1xf32> to vector<1x32xf32>
    %133 = arith.subf %116, %132 : vector<1x32xf32>
    %cst_89 = arith.constant 9.99999974E-6 : f32
    %134 = vector.broadcast %cst_89 : f32 to vector<1x1xf32>
    %135 = arith.addf %131, %134 : vector<1x1xf32>
    %136 = math.rsqrt %135 : vector<1x1xf32>
    %137 = vector.broadcast %136 : vector<1x1xf32> to vector<1x32xf32>
    %138 = arith.mulf %133, %137 : vector<1x32xf32>
    %139 = arith.mulf %138, %118 : vector<1x32xf32>
    %140 = arith.addf %139, %120 : vector<1x32xf32>
    %c0_90 = arith.constant 0 : index
    %c0_91 = arith.constant 0 : index
    %c0_92 = arith.constant 0 : index
    %141 = vector.load %arg24[%c0_90, %c0_91, %c0_92] : memref<3x32x64xf32, #tpu.memory_space<vmem>>, vector<1x32x64xf32>
    %142 = vector.shape_cast %141 : vector<1x32x64xf32> to vector<32x64xf32>
    %cst_93 = arith.constant dense<0.000000e+00> : vector<1x64xf32>
    %143 = tpu.matmul %140, %142, %cst_93 {dimension_numbers = #tpu.dot_dimension_numbers<[1], [0], [0], [1], [0, 0, 1, 1], [], []>} : vector<1x32xf32>, vector<32x64xf32>, vector<1x64xf32> -> vector<1x64xf32>
    %c0_94 = arith.constant 0 : index
    %c0_95 = arith.constant 0 : index
    %c0_96 = arith.constant 0 : index
    %144 = vector.load %arg25[%c0_94, %c0_95, %c0_96] : memref<3x1x64xf32, #tpu.memory_space<vmem>>, vector<1x1x64xf32>
    %145 = vector.shape_cast %144 : vector<1x1x64xf32> to vector<1x64xf32>
    %146 = arith.addf %143, %145 : vector<1x64xf32>
    %cst_97 = arith.constant 0.000000e+00 : f32
    %147 = vector.broadcast %cst_97 : f32 to vector<1x64xf32>
    %148 = arith.maximumf %146, %147 : vector<1x64xf32>
    %c0_98 = arith.constant 0 : index
    %c0_99 = arith.constant 0 : index
    %c0_100 = arith.constant 0 : index
    %149 = vector.load %arg26[%c0_98, %c0_99, %c0_100] : memref<3x64x32xf32, #tpu.memory_space<vmem>>, vector<1x64x32xf32>
    %150 = vector.shape_cast %149 : vector<1x64x32xf32> to vector<64x32xf32>
    %cst_101 = arith.constant dense<0.000000e+00> : vector<1x32xf32>
    %151 = tpu.matmul %148, %150, %cst_101 {dimension_numbers = #tpu.dot_dimension_numbers<[1], [0], [0], [1], [0, 0, 1, 1], [], []>} : vector<1x64xf32>, vector<64x32xf32>, vector<1x32xf32> -> vector<1x32xf32>
    %c0_102 = arith.constant 0 : index
    %c0_103 = arith.constant 0 : index
    %c0_104 = arith.constant 0 : index
    %152 = vector.load %arg27[%c0_102, %c0_103, %c0_104] : memref<3x1x32xf32, #tpu.memory_space<vmem>>, vector<1x1x32xf32>
    %153 = vector.shape_cast %152 : vector<1x1x32xf32> to vector<1x32xf32>
    %154 = arith.addf %151, %153 : vector<1x32xf32>
    %155 = arith.addf %140, %154 : vector<1x32xf32>
    %c0_105 = arith.constant 0 : index
    %c0_106 = arith.constant 0 : index
    %c0_107 = arith.constant 0 : index
    %156 = vector.load %arg28[%c0_105, %c0_106, %c0_107] : memref<3x1x32xf32, #tpu.memory_space<vmem>>, vector<1x1x32xf32>
    %157 = vector.shape_cast %156 : vector<1x1x32xf32> to vector<1x32xf32>
    %c0_108 = arith.constant 0 : index
    %c0_109 = arith.constant 0 : index
    %c0_110 = arith.constant 0 : index
    %158 = vector.load %arg29[%c0_108, %c0_109, %c0_110] : memref<3x1x32xf32, #tpu.memory_space<vmem>>, vector<1x1x32xf32>
    %159 = vector.shape_cast %158 : vector<1x1x32xf32> to vector<1x32xf32>
    %cst_111 = arith.constant dense<0.000000e+00> : vector<1xf32>
    %160 = vector.multi_reduction <add>, %155, %cst_111 [1] : vector<1x32xf32> to vector<1xf32>
    %161 = vector.shape_cast %160 : vector<1xf32> to vector<1x1xf32>
    %cst_112 = arith.constant 3.200000e+01 : f32
    %162 = vector.broadcast %cst_112 : f32 to vector<1x1xf32>
    %163 = arith.divf %161, %162 : vector<1x1xf32>
    %164 = vector.broadcast %163 : vector<1x1xf32> to vector<1x32xf32>
    %165 = arith.subf %155, %164 : vector<1x32xf32>
    %166 = arith.mulf %165, %165 : vector<1x32xf32>
    %cst_113 = arith.constant dense<0.000000e+00> : vector<1xf32>
    %167 = vector.multi_reduction <add>, %166, %cst_113 [1] : vector<1x32xf32> to vector<1xf32>
    %168 = vector.shape_cast %167 : vector<1xf32> to vector<1x1xf32>
    %cst_114 = arith.constant 3.200000e+01 : f32
    %169 = vector.broadcast %cst_114 : f32 to vector<1x1xf32>
    %170 = arith.divf %168, %169 : vector<1x1xf32>
    %171 = vector.broadcast %163 : vector<1x1xf32> to vector<1x32xf32>
    %172 = arith.subf %155, %171 : vector<1x32xf32>
    %cst_115 = arith.constant 9.99999974E-6 : f32
    %173 = vector.broadcast %cst_115 : f32 to vector<1x1xf32>
    %174 = arith.addf %170, %173 : vector<1x1xf32>
    %175 = math.rsqrt %174 : vector<1x1xf32>
    %176 = vector.broadcast %175 : vector<1x1xf32> to vector<1x32xf32>
    %177 = arith.mulf %172, %176 : vector<1x32xf32>
    %178 = arith.mulf %177, %157 : vector<1x32xf32>
    %179 = arith.addf %178, %159 : vector<1x32xf32>
    %c1 = arith.constant 1 : index
    %c0_116 = arith.constant 0 : index
    %c0_117 = arith.constant 0 : index
    %180 = vector.load %arg9[%c1, %c0_116, %c0_117] : memref<3x32x32xf32, #tpu.memory_space<vmem>>, vector<1x32x32xf32>
    %181 = vector.shape_cast %180 : vector<1x32x32xf32> to vector<32x32xf32>
    %cst_118 = arith.constant dense<0.000000e+00> : vector<1x32xf32>
    %182 = tpu.matmul %179, %181, %cst_118 {dimension_numbers = #tpu.dot_dimension_numbers<[1], [0], [0], [1], [0, 0, 1, 1], [], []>} : vector<1x32xf32>, vector<32x32xf32>, vector<1x32xf32> -> vector<1x32xf32>
    %c1_119 = arith.constant 1 : index
    %c0_120 = arith.constant 0 : index
    %c0_121 = arith.constant 0 : index
    %183 = vector.load %arg10[%c1_119, %c0_120, %c0_121] : memref<3x1x32xf32, #tpu.memory_space<vmem>>, vector<1x1x32xf32>
    %184 = vector.shape_cast %183 : vector<1x1x32xf32> to vector<1x32xf32>
    %185 = arith.addf %182, %184 : vector<1x32xf32>
    %c1_122 = arith.constant 1 : index
    %c0_123 = arith.constant 0 : index
    %c0_124 = arith.constant 0 : index
    %186 = vector.load %arg11[%c1_122, %c0_123, %c0_124] : memref<3x32x32xf32, #tpu.memory_space<vmem>>, vector<1x32x32xf32>
    %187 = vector.shape_cast %186 : vector<1x32x32xf32> to vector<32x32xf32>
    %cst_125 = arith.constant dense<0.000000e+00> : vector<1x32xf32>
    %188 = tpu.matmul %185, %187, %cst_125 {dimension_numbers = #tpu.dot_dimension_numbers<[1], [0], [0], [1], [0, 0, 1, 1], [], []>} : vector<1x32xf32>, vector<32x32xf32>, vector<1x32xf32> -> vector<1x32xf32>
    %c1_126 = arith.constant 1 : index
    %c0_127 = arith.constant 0 : index
    %c0_128 = arith.constant 0 : index
    %189 = vector.load %arg12[%c1_126, %c0_127, %c0_128] : memref<3x1x32xf32, #tpu.memory_space<vmem>>, vector<1x1x32xf32>
    %190 = vector.shape_cast %189 : vector<1x1x32xf32> to vector<1x32xf32>
    %191 = arith.addf %188, %190 : vector<1x32xf32>
    %192 = arith.addf %179, %191 : vector<1x32xf32>
    %c1_129 = arith.constant 1 : index
    %c0_130 = arith.constant 0 : index
    %c0_131 = arith.constant 0 : index
    %193 = vector.load %arg13[%c1_129, %c0_130, %c0_131] : memref<3x1x32xf32, #tpu.memory_space<vmem>>, vector<1x1x32xf32>
    %194 = vector.shape_cast %193 : vector<1x1x32xf32> to vector<1x32xf32>
    %c1_132 = arith.constant 1 : index
    %c0_133 = arith.constant 0 : index
    %c0_134 = arith.constant 0 : index
    %195 = vector.load %arg14[%c1_132, %c0_133, %c0_134] : memref<3x1x32xf32, #tpu.memory_space<vmem>>, vector<1x1x32xf32>
    %196 = vector.shape_cast %195 : vector<1x1x32xf32> to vector<1x32xf32>
    %cst_135 = arith.constant dense<0.000000e+00> : vector<1xf32>
    %197 = vector.multi_reduction <add>, %192, %cst_135 [1] : vector<1x32xf32> to vector<1xf32>
    %198 = vector.shape_cast %197 : vector<1xf32> to vector<1x1xf32>
    %cst_136 = arith.constant 3.200000e+01 : f32
    %199 = vector.broadcast %cst_136 : f32 to vector<1x1xf32>
    %200 = arith.divf %198, %199 : vector<1x1xf32>
    %201 = vector.broadcast %200 : vector<1x1xf32> to vector<1x32xf32>
    %202 = arith.subf %192, %201 : vector<1x32xf32>
    %203 = arith.mulf %202, %202 : vector<1x32xf32>
    %cst_137 = arith.constant dense<0.000000e+00> : vector<1xf32>
    %204 = vector.multi_reduction <add>, %203, %cst_137 [1] : vector<1x32xf32> to vector<1xf32>
    %205 = vector.shape_cast %204 : vector<1xf32> to vector<1x1xf32>
    %cst_138 = arith.constant 3.200000e+01 : f32
    %206 = vector.broadcast %cst_138 : f32 to vector<1x1xf32>
    %207 = arith.divf %205, %206 : vector<1x1xf32>
    %208 = vector.broadcast %200 : vector<1x1xf32> to vector<1x32xf32>
    %209 = arith.subf %192, %208 : vector<1x32xf32>
    %cst_139 = arith.constant 9.99999974E-6 : f32
    %210 = vector.broadcast %cst_139 : f32 to vector<1x1xf32>
    %211 = arith.addf %207, %210 : vector<1x1xf32>
    %212 = math.rsqrt %211 : vector<1x1xf32>
    %213 = vector.broadcast %212 : vector<1x1xf32> to vector<1x32xf32>
    %214 = arith.mulf %209, %213 : vector<1x32xf32>
    %215 = arith.mulf %214, %194 : vector<1x32xf32>
    %216 = arith.addf %215, %196 : vector<1x32xf32>
    %c1_140 = arith.constant 1 : index
    %c0_141 = arith.constant 0 : index
    %c0_142 = arith.constant 0 : index
    %217 = vector.load %arg15[%c1_140, %c0_141, %c0_142] : memref<3x32x32xf32, #tpu.memory_space<vmem>>, vector<1x32x32xf32>
    %218 = vector.shape_cast %217 : vector<1x32x32xf32> to vector<32x32xf32>
    %cst_143 = arith.constant dense<0.000000e+00> : vector<1x32xf32>
    %219 = tpu.matmul %216, %218, %cst_143 {dimension_numbers = #tpu.dot_dimension_numbers<[1], [0], [0], [1], [0, 0, 1, 1], [], []>} : vector<1x32xf32>, vector<32x32xf32>, vector<1x32xf32> -> vector<1x32xf32>
    %c1_144 = arith.constant 1 : index
    %c0_145 = arith.constant 0 : index
    %c0_146 = arith.constant 0 : index
    %220 = vector.load %arg16[%c1_144, %c0_145, %c0_146] : memref<3x1x32xf32, #tpu.memory_space<vmem>>, vector<1x1x32xf32>
    %221 = vector.shape_cast %220 : vector<1x1x32xf32> to vector<1x32xf32>
    %222 = arith.addf %219, %221 : vector<1x32xf32>
    %cst_147 = arith.constant 5.000000e-01 : f32
    %223 = vector.broadcast %cst_147 : f32 to vector<1x32xf32>
    %224 = arith.mulf %222, %223 : vector<1x32xf32>
    %225 = vector.broadcast %224 : vector<1x32xf32> to vector<8x32xf32>
    %226 = arith.mulf %0, %225 : vector<8x32xf32>
    %c1_148 = arith.constant 1 : index
    %c0_149 = arith.constant 0 : index
    %c0_150 = arith.constant 0 : index
    %227 = vector.load %arg17[%c1_148, %c0_149, %c0_150] : memref<3x32x32xf32, #tpu.memory_space<vmem>>, vector<1x32x32xf32>
    %228 = vector.shape_cast %227 : vector<1x32x32xf32> to vector<32x32xf32>
    %cst_151 = arith.constant dense<0.000000e+00> : vector<32x8xf32>
    %229 = tpu.matmul %228, %226, %cst_151 {dimension_numbers = #tpu.dot_dimension_numbers<[1], [1], [0], [0], [0, 0, 1, 0], [], []>} : vector<32x32xf32>, vector<8x32xf32>, vector<32x8xf32> -> vector<32x8xf32>
    %cst_152 = arith.constant dense<0.000000e+00> : vector<256x8xf32>
    %230 = tpu.matmul %37, %229, %cst_152 {dimension_numbers = #tpu.dot_dimension_numbers<[1], [0], [0], [1], [0, 0, 1, 1], [], []>} : vector<256x32xf32>, vector<32x8xf32>, vector<256x8xf32> -> vector<256x8xf32>
    %c1_153 = arith.constant 1 : index
    %c0_154 = arith.constant 0 : index
    %c0_155 = arith.constant 0 : index
    %231 = vector.load %arg18[%c1_153, %c0_154, %c0_155] : memref<3x32x32xf32, #tpu.memory_space<vmem>>, vector<1x32x32xf32>
    %232 = vector.shape_cast %231 : vector<1x32x32xf32> to vector<32x32xf32>
    %cst_156 = arith.constant dense<0.000000e+00> : vector<256x32xf32>
    %233 = tpu.matmul %37, %232, %cst_156 {dimension_numbers = #tpu.dot_dimension_numbers<[1], [0], [0], [1], [0, 0, 1, 1], [], []>} : vector<256x32xf32>, vector<32x32xf32>, vector<256x32xf32> -> vector<256x32xf32>
    %c1_157 = arith.constant 1 : index
    %c0_158 = arith.constant 0 : index
    %c0_159 = arith.constant 0 : index
    %234 = vector.load %arg19[%c1_157, %c0_158, %c0_159] : memref<3x1x32xf32, #tpu.memory_space<vmem>>, vector<1x1x32xf32>
    %235 = vector.shape_cast %234 : vector<1x1x32xf32> to vector<1x32xf32>
    %236 = vector.broadcast %235 : vector<1x32xf32> to vector<256x32xf32>
    %237 = arith.addf %233, %236 : vector<256x32xf32>
    %cst_160 = arith.constant dense<0xFF800000> : vector<8xf32>
    %238 = vector.multi_reduction <maximumf>, %230, %cst_160 [0] : vector<256x8xf32> to vector<8xf32>
    %239 = vector.shape_cast %238 : vector<8xf32> to vector<1x8xf32>
    %240 = vector.broadcast %239 : vector<1x8xf32> to vector<256x8xf32>
    %241 = arith.subf %230, %240 : vector<256x8xf32>
    %242 = math.exp %241 : vector<256x8xf32>
    %cst_161 = arith.constant dense<0.000000e+00> : vector<8xf32>
    %243 = vector.multi_reduction <add>, %242, %cst_161 [0] : vector<256x8xf32> to vector<8xf32>
    %244 = vector.shape_cast %243 : vector<8xf32> to vector<1x8xf32>
    %cst_162 = arith.constant dense<0.000000e+00> : vector<8x32xf32>
    %245 = tpu.matmul %242, %237, %cst_162 {dimension_numbers = #tpu.dot_dimension_numbers<[0], [0], [1], [1], [0, 1, 1, 1], [], []>} : vector<256x8xf32>, vector<256x32xf32>, vector<8x32xf32> -> vector<8x32xf32>
    %cst_163 = arith.constant dense<0.000000e+00> : vector<1x32xf32>
    %246 = tpu.matmul %244, %0, %cst_163 {dimension_numbers = #tpu.dot_dimension_numbers<[1], [0], [0], [1], [0, 0, 1, 1], [], []>} : vector<1x8xf32>, vector<8x32xf32>, vector<1x32xf32> -> vector<1x32xf32>
    %247 = tpu.reciprocal %246 {approx = true} : vector<1x32xf32> -> vector<1x32xf32>
    %248 = arith.mulf %0, %245 : vector<8x32xf32>
    %cst_164 = arith.constant dense<0.000000e+00> : vector<32xf32>
    %249 = vector.multi_reduction <add>, %248, %cst_164 [0] : vector<8x32xf32> to vector<32xf32>
    %250 = vector.shape_cast %249 : vector<32xf32> to vector<1x32xf32>
    %251 = arith.mulf %250, %247 : vector<1x32xf32>
    %c1_165 = arith.constant 1 : index
    %c0_166 = arith.constant 0 : index
    %c0_167 = arith.constant 0 : index
    %252 = vector.load %arg20[%c1_165, %c0_166, %c0_167] : memref<3x32x32xf32, #tpu.memory_space<vmem>>, vector<1x32x32xf32>
    %253 = vector.shape_cast %252 : vector<1x32x32xf32> to vector<32x32xf32>
    %cst_168 = arith.constant dense<0.000000e+00> : vector<1x32xf32>
    %254 = tpu.matmul %251, %253, %cst_168 {dimension_numbers = #tpu.dot_dimension_numbers<[1], [0], [0], [1], [0, 0, 1, 1], [], []>} : vector<1x32xf32>, vector<32x32xf32>, vector<1x32xf32> -> vector<1x32xf32>
    %c1_169 = arith.constant 1 : index
    %c0_170 = arith.constant 0 : index
    %c0_171 = arith.constant 0 : index
    %255 = vector.load %arg21[%c1_169, %c0_170, %c0_171] : memref<3x1x32xf32, #tpu.memory_space<vmem>>, vector<1x1x32xf32>
    %256 = vector.shape_cast %255 : vector<1x1x32xf32> to vector<1x32xf32>
    %257 = arith.addf %254, %256 : vector<1x32xf32>
    %258 = arith.addf %216, %257 : vector<1x32xf32>
    %c1_172 = arith.constant 1 : index
    %c0_173 = arith.constant 0 : index
    %c0_174 = arith.constant 0 : index
    %259 = vector.load %arg22[%c1_172, %c0_173, %c0_174] : memref<3x1x32xf32, #tpu.memory_space<vmem>>, vector<1x1x32xf32>
    %260 = vector.shape_cast %259 : vector<1x1x32xf32> to vector<1x32xf32>
    %c1_175 = arith.constant 1 : index
    %c0_176 = arith.constant 0 : index
    %c0_177 = arith.constant 0 : index
    %261 = vector.load %arg23[%c1_175, %c0_176, %c0_177] : memref<3x1x32xf32, #tpu.memory_space<vmem>>, vector<1x1x32xf32>
    %262 = vector.shape_cast %261 : vector<1x1x32xf32> to vector<1x32xf32>
    %cst_178 = arith.constant dense<0.000000e+00> : vector<1xf32>
    %263 = vector.multi_reduction <add>, %258, %cst_178 [1] : vector<1x32xf32> to vector<1xf32>
    %264 = vector.shape_cast %263 : vector<1xf32> to vector<1x1xf32>
    %cst_179 = arith.constant 3.200000e+01 : f32
    %265 = vector.broadcast %cst_179 : f32 to vector<1x1xf32>
    %266 = arith.divf %264, %265 : vector<1x1xf32>
    %267 = vector.broadcast %266 : vector<1x1xf32> to vector<1x32xf32>
    %268 = arith.subf %258, %267 : vector<1x32xf32>
    %269 = arith.mulf %268, %268 : vector<1x32xf32>
    %cst_180 = arith.constant dense<0.000000e+00> : vector<1xf32>
    %270 = vector.multi_reduction <add>, %269, %cst_180 [1] : vector<1x32xf32> to vector<1xf32>
    %271 = vector.shape_cast %270 : vector<1xf32> to vector<1x1xf32>
    %cst_181 = arith.constant 3.200000e+01 : f32
    %272 = vector.broadcast %cst_181 : f32 to vector<1x1xf32>
    %273 = arith.divf %271, %272 : vector<1x1xf32>
    %274 = vector.broadcast %266 : vector<1x1xf32> to vector<1x32xf32>
    %275 = arith.subf %258, %274 : vector<1x32xf32>
    %cst_182 = arith.constant 9.99999974E-6 : f32
    %276 = vector.broadcast %cst_182 : f32 to vector<1x1xf32>
    %277 = arith.addf %273, %276 : vector<1x1xf32>
    %278 = math.rsqrt %277 : vector<1x1xf32>
    %279 = vector.broadcast %278 : vector<1x1xf32> to vector<1x32xf32>
    %280 = arith.mulf %275, %279 : vector<1x32xf32>
    %281 = arith.mulf %280, %260 : vector<1x32xf32>
    %282 = arith.addf %281, %262 : vector<1x32xf32>
    %c1_183 = arith.constant 1 : index
    %c0_184 = arith.constant 0 : index
    %c0_185 = arith.constant 0 : index
    %283 = vector.load %arg24[%c1_183, %c0_184, %c0_185] : memref<3x32x64xf32, #tpu.memory_space<vmem>>, vector<1x32x64xf32>
    %284 = vector.shape_cast %283 : vector<1x32x64xf32> to vector<32x64xf32>
    %cst_186 = arith.constant dense<0.000000e+00> : vector<1x64xf32>
    %285 = tpu.matmul %282, %284, %cst_186 {dimension_numbers = #tpu.dot_dimension_numbers<[1], [0], [0], [1], [0, 0, 1, 1], [], []>} : vector<1x32xf32>, vector<32x64xf32>, vector<1x64xf32> -> vector<1x64xf32>
    %c1_187 = arith.constant 1 : index
    %c0_188 = arith.constant 0 : index
    %c0_189 = arith.constant 0 : index
    %286 = vector.load %arg25[%c1_187, %c0_188, %c0_189] : memref<3x1x64xf32, #tpu.memory_space<vmem>>, vector<1x1x64xf32>
    %287 = vector.shape_cast %286 : vector<1x1x64xf32> to vector<1x64xf32>
    %288 = arith.addf %285, %287 : vector<1x64xf32>
    %cst_190 = arith.constant 0.000000e+00 : f32
    %289 = vector.broadcast %cst_190 : f32 to vector<1x64xf32>
    %290 = arith.maximumf %288, %289 : vector<1x64xf32>
    %c1_191 = arith.constant 1 : index
    %c0_192 = arith.constant 0 : index
    %c0_193 = arith.constant 0 : index
    %291 = vector.load %arg26[%c1_191, %c0_192, %c0_193] : memref<3x64x32xf32, #tpu.memory_space<vmem>>, vector<1x64x32xf32>
    %292 = vector.shape_cast %291 : vector<1x64x32xf32> to vector<64x32xf32>
    %cst_194 = arith.constant dense<0.000000e+00> : vector<1x32xf32>
    %293 = tpu.matmul %290, %292, %cst_194 {dimension_numbers = #tpu.dot_dimension_numbers<[1], [0], [0], [1], [0, 0, 1, 1], [], []>} : vector<1x64xf32>, vector<64x32xf32>, vector<1x32xf32> -> vector<1x32xf32>
    %c1_195 = arith.constant 1 : index
    %c0_196 = arith.constant 0 : index
    %c0_197 = arith.constant 0 : index
    %294 = vector.load %arg27[%c1_195, %c0_196, %c0_197] : memref<3x1x32xf32, #tpu.memory_space<vmem>>, vector<1x1x32xf32>
    %295 = vector.shape_cast %294 : vector<1x1x32xf32> to vector<1x32xf32>
    %296 = arith.addf %293, %295 : vector<1x32xf32>
    %297 = arith.addf %282, %296 : vector<1x32xf32>
    %c1_198 = arith.constant 1 : index
    %c0_199 = arith.constant 0 : index
    %c0_200 = arith.constant 0 : index
    %298 = vector.load %arg28[%c1_198, %c0_199, %c0_200] : memref<3x1x32xf32, #tpu.memory_space<vmem>>, vector<1x1x32xf32>
    %299 = vector.shape_cast %298 : vector<1x1x32xf32> to vector<1x32xf32>
    %c1_201 = arith.constant 1 : index
    %c0_202 = arith.constant 0 : index
    %c0_203 = arith.constant 0 : index
    %300 = vector.load %arg29[%c1_201, %c0_202, %c0_203] : memref<3x1x32xf32, #tpu.memory_space<vmem>>, vector<1x1x32xf32>
    %301 = vector.shape_cast %300 : vector<1x1x32xf32> to vector<1x32xf32>
    %cst_204 = arith.constant dense<0.000000e+00> : vector<1xf32>
    %302 = vector.multi_reduction <add>, %297, %cst_204 [1] : vector<1x32xf32> to vector<1xf32>
    %303 = vector.shape_cast %302 : vector<1xf32> to vector<1x1xf32>
    %cst_205 = arith.constant 3.200000e+01 : f32
    %304 = vector.broadcast %cst_205 : f32 to vector<1x1xf32>
    %305 = arith.divf %303, %304 : vector<1x1xf32>
    %306 = vector.broadcast %305 : vector<1x1xf32> to vector<1x32xf32>
    %307 = arith.subf %297, %306 : vector<1x32xf32>
    %308 = arith.mulf %307, %307 : vector<1x32xf32>
    %cst_206 = arith.constant dense<0.000000e+00> : vector<1xf32>
    %309 = vector.multi_reduction <add>, %308, %cst_206 [1] : vector<1x32xf32> to vector<1xf32>
    %310 = vector.shape_cast %309 : vector<1xf32> to vector<1x1xf32>
    %cst_207 = arith.constant 3.200000e+01 : f32
    %311 = vector.broadcast %cst_207 : f32 to vector<1x1xf32>
    %312 = arith.divf %310, %311 : vector<1x1xf32>
    %313 = vector.broadcast %305 : vector<1x1xf32> to vector<1x32xf32>
    %314 = arith.subf %297, %313 : vector<1x32xf32>
    %cst_208 = arith.constant 9.99999974E-6 : f32
    %315 = vector.broadcast %cst_208 : f32 to vector<1x1xf32>
    %316 = arith.addf %312, %315 : vector<1x1xf32>
    %317 = math.rsqrt %316 : vector<1x1xf32>
    %318 = vector.broadcast %317 : vector<1x1xf32> to vector<1x32xf32>
    %319 = arith.mulf %314, %318 : vector<1x32xf32>
    %320 = arith.mulf %319, %299 : vector<1x32xf32>
    %321 = arith.addf %320, %301 : vector<1x32xf32>
    %c2 = arith.constant 2 : index
    %c0_209 = arith.constant 0 : index
    %c0_210 = arith.constant 0 : index
    %322 = vector.load %arg9[%c2, %c0_209, %c0_210] : memref<3x32x32xf32, #tpu.memory_space<vmem>>, vector<1x32x32xf32>
    %323 = vector.shape_cast %322 : vector<1x32x32xf32> to vector<32x32xf32>
    %cst_211 = arith.constant dense<0.000000e+00> : vector<1x32xf32>
    %324 = tpu.matmul %321, %323, %cst_211 {dimension_numbers = #tpu.dot_dimension_numbers<[1], [0], [0], [1], [0, 0, 1, 1], [], []>} : vector<1x32xf32>, vector<32x32xf32>, vector<1x32xf32> -> vector<1x32xf32>
    %c2_212 = arith.constant 2 : index
    %c0_213 = arith.constant 0 : index
    %c0_214 = arith.constant 0 : index
    %325 = vector.load %arg10[%c2_212, %c0_213, %c0_214] : memref<3x1x32xf32, #tpu.memory_space<vmem>>, vector<1x1x32xf32>
    %326 = vector.shape_cast %325 : vector<1x1x32xf32> to vector<1x32xf32>
    %327 = arith.addf %324, %326 : vector<1x32xf32>
    %c2_215 = arith.constant 2 : index
    %c0_216 = arith.constant 0 : index
    %c0_217 = arith.constant 0 : index
    %328 = vector.load %arg11[%c2_215, %c0_216, %c0_217] : memref<3x32x32xf32, #tpu.memory_space<vmem>>, vector<1x32x32xf32>
    %329 = vector.shape_cast %328 : vector<1x32x32xf32> to vector<32x32xf32>
    %cst_218 = arith.constant dense<0.000000e+00> : vector<1x32xf32>
    %330 = tpu.matmul %327, %329, %cst_218 {dimension_numbers = #tpu.dot_dimension_numbers<[1], [0], [0], [1], [0, 0, 1, 1], [], []>} : vector<1x32xf32>, vector<32x32xf32>, vector<1x32xf32> -> vector<1x32xf32>
    %c2_219 = arith.constant 2 : index
    %c0_220 = arith.constant 0 : index
    %c0_221 = arith.constant 0 : index
    %331 = vector.load %arg12[%c2_219, %c0_220, %c0_221] : memref<3x1x32xf32, #tpu.memory_space<vmem>>, vector<1x1x32xf32>
    %332 = vector.shape_cast %331 : vector<1x1x32xf32> to vector<1x32xf32>
    %333 = arith.addf %330, %332 : vector<1x32xf32>
    %334 = arith.addf %321, %333 : vector<1x32xf32>
    %c2_222 = arith.constant 2 : index
    %c0_223 = arith.constant 0 : index
    %c0_224 = arith.constant 0 : index
    %335 = vector.load %arg13[%c2_222, %c0_223, %c0_224] : memref<3x1x32xf32, #tpu.memory_space<vmem>>, vector<1x1x32xf32>
    %336 = vector.shape_cast %335 : vector<1x1x32xf32> to vector<1x32xf32>
    %c2_225 = arith.constant 2 : index
    %c0_226 = arith.constant 0 : index
    %c0_227 = arith.constant 0 : index
    %337 = vector.load %arg14[%c2_225, %c0_226, %c0_227] : memref<3x1x32xf32, #tpu.memory_space<vmem>>, vector<1x1x32xf32>
    %338 = vector.shape_cast %337 : vector<1x1x32xf32> to vector<1x32xf32>
    %cst_228 = arith.constant dense<0.000000e+00> : vector<1xf32>
    %339 = vector.multi_reduction <add>, %334, %cst_228 [1] : vector<1x32xf32> to vector<1xf32>
    %340 = vector.shape_cast %339 : vector<1xf32> to vector<1x1xf32>
    %cst_229 = arith.constant 3.200000e+01 : f32
    %341 = vector.broadcast %cst_229 : f32 to vector<1x1xf32>
    %342 = arith.divf %340, %341 : vector<1x1xf32>
    %343 = vector.broadcast %342 : vector<1x1xf32> to vector<1x32xf32>
    %344 = arith.subf %334, %343 : vector<1x32xf32>
    %345 = arith.mulf %344, %344 : vector<1x32xf32>
    %cst_230 = arith.constant dense<0.000000e+00> : vector<1xf32>
    %346 = vector.multi_reduction <add>, %345, %cst_230 [1] : vector<1x32xf32> to vector<1xf32>
    %347 = vector.shape_cast %346 : vector<1xf32> to vector<1x1xf32>
    %cst_231 = arith.constant 3.200000e+01 : f32
    %348 = vector.broadcast %cst_231 : f32 to vector<1x1xf32>
    %349 = arith.divf %347, %348 : vector<1x1xf32>
    %350 = vector.broadcast %342 : vector<1x1xf32> to vector<1x32xf32>
    %351 = arith.subf %334, %350 : vector<1x32xf32>
    %cst_232 = arith.constant 9.99999974E-6 : f32
    %352 = vector.broadcast %cst_232 : f32 to vector<1x1xf32>
    %353 = arith.addf %349, %352 : vector<1x1xf32>
    %354 = math.rsqrt %353 : vector<1x1xf32>
    %355 = vector.broadcast %354 : vector<1x1xf32> to vector<1x32xf32>
    %356 = arith.mulf %351, %355 : vector<1x32xf32>
    %357 = arith.mulf %356, %336 : vector<1x32xf32>
    %358 = arith.addf %357, %338 : vector<1x32xf32>
    %c2_233 = arith.constant 2 : index
    %c0_234 = arith.constant 0 : index
    %c0_235 = arith.constant 0 : index
    %359 = vector.load %arg15[%c2_233, %c0_234, %c0_235] : memref<3x32x32xf32, #tpu.memory_space<vmem>>, vector<1x32x32xf32>
    %360 = vector.shape_cast %359 : vector<1x32x32xf32> to vector<32x32xf32>
    %cst_236 = arith.constant dense<0.000000e+00> : vector<1x32xf32>
    %361 = tpu.matmul %358, %360, %cst_236 {dimension_numbers = #tpu.dot_dimension_numbers<[1], [0], [0], [1], [0, 0, 1, 1], [], []>} : vector<1x32xf32>, vector<32x32xf32>, vector<1x32xf32> -> vector<1x32xf32>
    %c2_237 = arith.constant 2 : index
    %c0_238 = arith.constant 0 : index
    %c0_239 = arith.constant 0 : index
    %362 = vector.load %arg16[%c2_237, %c0_238, %c0_239] : memref<3x1x32xf32, #tpu.memory_space<vmem>>, vector<1x1x32xf32>
    %363 = vector.shape_cast %362 : vector<1x1x32xf32> to vector<1x32xf32>
    %364 = arith.addf %361, %363 : vector<1x32xf32>
    %cst_240 = arith.constant 5.000000e-01 : f32
    %365 = vector.broadcast %cst_240 : f32 to vector<1x32xf32>
    %366 = arith.mulf %364, %365 : vector<1x32xf32>
    %367 = vector.broadcast %366 : vector<1x32xf32> to vector<8x32xf32>
    %368 = arith.mulf %0, %367 : vector<8x32xf32>
    %c2_241 = arith.constant 2 : index
    %c0_242 = arith.constant 0 : index
    %c0_243 = arith.constant 0 : index
    %369 = vector.load %arg17[%c2_241, %c0_242, %c0_243] : memref<3x32x32xf32, #tpu.memory_space<vmem>>, vector<1x32x32xf32>
    %370 = vector.shape_cast %369 : vector<1x32x32xf32> to vector<32x32xf32>
    %cst_244 = arith.constant dense<0.000000e+00> : vector<32x8xf32>
    %371 = tpu.matmul %370, %368, %cst_244 {dimension_numbers = #tpu.dot_dimension_numbers<[1], [1], [0], [0], [0, 0, 1, 0], [], []>} : vector<32x32xf32>, vector<8x32xf32>, vector<32x8xf32> -> vector<32x8xf32>
    %cst_245 = arith.constant dense<0.000000e+00> : vector<256x8xf32>
    %372 = tpu.matmul %37, %371, %cst_245 {dimension_numbers = #tpu.dot_dimension_numbers<[1], [0], [0], [1], [0, 0, 1, 1], [], []>} : vector<256x32xf32>, vector<32x8xf32>, vector<256x8xf32> -> vector<256x8xf32>
    %c2_246 = arith.constant 2 : index
    %c0_247 = arith.constant 0 : index
    %c0_248 = arith.constant 0 : index
    %373 = vector.load %arg18[%c2_246, %c0_247, %c0_248] : memref<3x32x32xf32, #tpu.memory_space<vmem>>, vector<1x32x32xf32>
    %374 = vector.shape_cast %373 : vector<1x32x32xf32> to vector<32x32xf32>
    %cst_249 = arith.constant dense<0.000000e+00> : vector<256x32xf32>
    %375 = tpu.matmul %37, %374, %cst_249 {dimension_numbers = #tpu.dot_dimension_numbers<[1], [0], [0], [1], [0, 0, 1, 1], [], []>} : vector<256x32xf32>, vector<32x32xf32>, vector<256x32xf32> -> vector<256x32xf32>
    %c2_250 = arith.constant 2 : index
    %c0_251 = arith.constant 0 : index
    %c0_252 = arith.constant 0 : index
    %376 = vector.load %arg19[%c2_250, %c0_251, %c0_252] : memref<3x1x32xf32, #tpu.memory_space<vmem>>, vector<1x1x32xf32>
    %377 = vector.shape_cast %376 : vector<1x1x32xf32> to vector<1x32xf32>
    %378 = vector.broadcast %377 : vector<1x32xf32> to vector<256x32xf32>
    %379 = arith.addf %375, %378 : vector<256x32xf32>
    %cst_253 = arith.constant dense<0xFF800000> : vector<8xf32>
    %380 = vector.multi_reduction <maximumf>, %372, %cst_253 [0] : vector<256x8xf32> to vector<8xf32>
    %381 = vector.shape_cast %380 : vector<8xf32> to vector<1x8xf32>
    %382 = vector.broadcast %381 : vector<1x8xf32> to vector<256x8xf32>
    %383 = arith.subf %372, %382 : vector<256x8xf32>
    %384 = math.exp %383 : vector<256x8xf32>
    %cst_254 = arith.constant dense<0.000000e+00> : vector<8xf32>
    %385 = vector.multi_reduction <add>, %384, %cst_254 [0] : vector<256x8xf32> to vector<8xf32>
    %386 = vector.shape_cast %385 : vector<8xf32> to vector<1x8xf32>
    %cst_255 = arith.constant dense<0.000000e+00> : vector<8x32xf32>
    %387 = tpu.matmul %384, %379, %cst_255 {dimension_numbers = #tpu.dot_dimension_numbers<[0], [0], [1], [1], [0, 1, 1, 1], [], []>} : vector<256x8xf32>, vector<256x32xf32>, vector<8x32xf32> -> vector<8x32xf32>
    %cst_256 = arith.constant dense<0.000000e+00> : vector<1x32xf32>
    %388 = tpu.matmul %386, %0, %cst_256 {dimension_numbers = #tpu.dot_dimension_numbers<[1], [0], [0], [1], [0, 0, 1, 1], [], []>} : vector<1x8xf32>, vector<8x32xf32>, vector<1x32xf32> -> vector<1x32xf32>
    %389 = tpu.reciprocal %388 {approx = true} : vector<1x32xf32> -> vector<1x32xf32>
    %390 = arith.mulf %0, %387 : vector<8x32xf32>
    %cst_257 = arith.constant dense<0.000000e+00> : vector<32xf32>
    %391 = vector.multi_reduction <add>, %390, %cst_257 [0] : vector<8x32xf32> to vector<32xf32>
    %392 = vector.shape_cast %391 : vector<32xf32> to vector<1x32xf32>
    %393 = arith.mulf %392, %389 : vector<1x32xf32>
    %c2_258 = arith.constant 2 : index
    %c0_259 = arith.constant 0 : index
    %c0_260 = arith.constant 0 : index
    %394 = vector.load %arg20[%c2_258, %c0_259, %c0_260] : memref<3x32x32xf32, #tpu.memory_space<vmem>>, vector<1x32x32xf32>
    %395 = vector.shape_cast %394 : vector<1x32x32xf32> to vector<32x32xf32>
    %cst_261 = arith.constant dense<0.000000e+00> : vector<1x32xf32>
    %396 = tpu.matmul %393, %395, %cst_261 {dimension_numbers = #tpu.dot_dimension_numbers<[1], [0], [0], [1], [0, 0, 1, 1], [], []>} : vector<1x32xf32>, vector<32x32xf32>, vector<1x32xf32> -> vector<1x32xf32>
    %c2_262 = arith.constant 2 : index
    %c0_263 = arith.constant 0 : index
    %c0_264 = arith.constant 0 : index
    %397 = vector.load %arg21[%c2_262, %c0_263, %c0_264] : memref<3x1x32xf32, #tpu.memory_space<vmem>>, vector<1x1x32xf32>
    %398 = vector.shape_cast %397 : vector<1x1x32xf32> to vector<1x32xf32>
    %399 = arith.addf %396, %398 : vector<1x32xf32>
    %400 = arith.addf %358, %399 : vector<1x32xf32>
    %c2_265 = arith.constant 2 : index
    %c0_266 = arith.constant 0 : index
    %c0_267 = arith.constant 0 : index
    %401 = vector.load %arg22[%c2_265, %c0_266, %c0_267] : memref<3x1x32xf32, #tpu.memory_space<vmem>>, vector<1x1x32xf32>
    %402 = vector.shape_cast %401 : vector<1x1x32xf32> to vector<1x32xf32>
    %c2_268 = arith.constant 2 : index
    %c0_269 = arith.constant 0 : index
    %c0_270 = arith.constant 0 : index
    %403 = vector.load %arg23[%c2_268, %c0_269, %c0_270] : memref<3x1x32xf32, #tpu.memory_space<vmem>>, vector<1x1x32xf32>
    %404 = vector.shape_cast %403 : vector<1x1x32xf32> to vector<1x32xf32>
    %cst_271 = arith.constant dense<0.000000e+00> : vector<1xf32>
    %405 = vector.multi_reduction <add>, %400, %cst_271 [1] : vector<1x32xf32> to vector<1xf32>
    %406 = vector.shape_cast %405 : vector<1xf32> to vector<1x1xf32>
    %cst_272 = arith.constant 3.200000e+01 : f32
    %407 = vector.broadcast %cst_272 : f32 to vector<1x1xf32>
    %408 = arith.divf %406, %407 : vector<1x1xf32>
    %409 = vector.broadcast %408 : vector<1x1xf32> to vector<1x32xf32>
    %410 = arith.subf %400, %409 : vector<1x32xf32>
    %411 = arith.mulf %410, %410 : vector<1x32xf32>
    %cst_273 = arith.constant dense<0.000000e+00> : vector<1xf32>
    %412 = vector.multi_reduction <add>, %411, %cst_273 [1] : vector<1x32xf32> to vector<1xf32>
    %413 = vector.shape_cast %412 : vector<1xf32> to vector<1x1xf32>
    %cst_274 = arith.constant 3.200000e+01 : f32
    %414 = vector.broadcast %cst_274 : f32 to vector<1x1xf32>
    %415 = arith.divf %413, %414 : vector<1x1xf32>
    %416 = vector.broadcast %408 : vector<1x1xf32> to vector<1x32xf32>
    %417 = arith.subf %400, %416 : vector<1x32xf32>
    %cst_275 = arith.constant 9.99999974E-6 : f32
    %418 = vector.broadcast %cst_275 : f32 to vector<1x1xf32>
    %419 = arith.addf %415, %418 : vector<1x1xf32>
    %420 = math.rsqrt %419 : vector<1x1xf32>
    %421 = vector.broadcast %420 : vector<1x1xf32> to vector<1x32xf32>
    %422 = arith.mulf %417, %421 : vector<1x32xf32>
    %423 = arith.mulf %422, %402 : vector<1x32xf32>
    %424 = arith.addf %423, %404 : vector<1x32xf32>
    %c2_276 = arith.constant 2 : index
    %c0_277 = arith.constant 0 : index
    %c0_278 = arith.constant 0 : index
    %425 = vector.load %arg24[%c2_276, %c0_277, %c0_278] : memref<3x32x64xf32, #tpu.memory_space<vmem>>, vector<1x32x64xf32>
    %426 = vector.shape_cast %425 : vector<1x32x64xf32> to vector<32x64xf32>
    %cst_279 = arith.constant dense<0.000000e+00> : vector<1x64xf32>
    %427 = tpu.matmul %424, %426, %cst_279 {dimension_numbers = #tpu.dot_dimension_numbers<[1], [0], [0], [1], [0, 0, 1, 1], [], []>} : vector<1x32xf32>, vector<32x64xf32>, vector<1x64xf32> -> vector<1x64xf32>
    %c2_280 = arith.constant 2 : index
    %c0_281 = arith.constant 0 : index
    %c0_282 = arith.constant 0 : index
    %428 = vector.load %arg25[%c2_280, %c0_281, %c0_282] : memref<3x1x64xf32, #tpu.memory_space<vmem>>, vector<1x1x64xf32>
    %429 = vector.shape_cast %428 : vector<1x1x64xf32> to vector<1x64xf32>
    %430 = arith.addf %427, %429 : vector<1x64xf32>
    %cst_283 = arith.constant 0.000000e+00 : f32
    %431 = vector.broadcast %cst_283 : f32 to vector<1x64xf32>
    %432 = arith.maximumf %430, %431 : vector<1x64xf32>
    %c2_284 = arith.constant 2 : index
    %c0_285 = arith.constant 0 : index
    %c0_286 = arith.constant 0 : index
    %433 = vector.load %arg26[%c2_284, %c0_285, %c0_286] : memref<3x64x32xf32, #tpu.memory_space<vmem>>, vector<1x64x32xf32>
    %434 = vector.shape_cast %433 : vector<1x64x32xf32> to vector<64x32xf32>
    %cst_287 = arith.constant dense<0.000000e+00> : vector<1x32xf32>
    %435 = tpu.matmul %432, %434, %cst_287 {dimension_numbers = #tpu.dot_dimension_numbers<[1], [0], [0], [1], [0, 0, 1, 1], [], []>} : vector<1x64xf32>, vector<64x32xf32>, vector<1x32xf32> -> vector<1x32xf32>
    %c2_288 = arith.constant 2 : index
    %c0_289 = arith.constant 0 : index
    %c0_290 = arith.constant 0 : index
    %436 = vector.load %arg27[%c2_288, %c0_289, %c0_290] : memref<3x1x32xf32, #tpu.memory_space<vmem>>, vector<1x1x32xf32>
    %437 = vector.shape_cast %436 : vector<1x1x32xf32> to vector<1x32xf32>
    %438 = arith.addf %435, %437 : vector<1x32xf32>
    %439 = arith.addf %424, %438 : vector<1x32xf32>
    %c2_291 = arith.constant 2 : index
    %c0_292 = arith.constant 0 : index
    %c0_293 = arith.constant 0 : index
    %440 = vector.load %arg28[%c2_291, %c0_292, %c0_293] : memref<3x1x32xf32, #tpu.memory_space<vmem>>, vector<1x1x32xf32>
    %441 = vector.shape_cast %440 : vector<1x1x32xf32> to vector<1x32xf32>
    %c2_294 = arith.constant 2 : index
    %c0_295 = arith.constant 0 : index
    %c0_296 = arith.constant 0 : index
    %442 = vector.load %arg29[%c2_294, %c0_295, %c0_296] : memref<3x1x32xf32, #tpu.memory_space<vmem>>, vector<1x1x32xf32>
    %443 = vector.shape_cast %442 : vector<1x1x32xf32> to vector<1x32xf32>
    %cst_297 = arith.constant dense<0.000000e+00> : vector<1xf32>
    %444 = vector.multi_reduction <add>, %439, %cst_297 [1] : vector<1x32xf32> to vector<1xf32>
    %445 = vector.shape_cast %444 : vector<1xf32> to vector<1x1xf32>
    %cst_298 = arith.constant 3.200000e+01 : f32
    %446 = vector.broadcast %cst_298 : f32 to vector<1x1xf32>
    %447 = arith.divf %445, %446 : vector<1x1xf32>
    %448 = vector.broadcast %447 : vector<1x1xf32> to vector<1x32xf32>
    %449 = arith.subf %439, %448 : vector<1x32xf32>
    %450 = arith.mulf %449, %449 : vector<1x32xf32>
    %cst_299 = arith.constant dense<0.000000e+00> : vector<1xf32>
    %451 = vector.multi_reduction <add>, %450, %cst_299 [1] : vector<1x32xf32> to vector<1xf32>
    %452 = vector.shape_cast %451 : vector<1xf32> to vector<1x1xf32>
    %cst_300 = arith.constant 3.200000e+01 : f32
    %453 = vector.broadcast %cst_300 : f32 to vector<1x1xf32>
    %454 = arith.divf %452, %453 : vector<1x1xf32>
    %455 = vector.broadcast %447 : vector<1x1xf32> to vector<1x32xf32>
    %456 = arith.subf %439, %455 : vector<1x32xf32>
    %cst_301 = arith.constant 9.99999974E-6 : f32
    %457 = vector.broadcast %cst_301 : f32 to vector<1x1xf32>
    %458 = arith.addf %454, %457 : vector<1x1xf32>
    %459 = math.rsqrt %458 : vector<1x1xf32>
    %460 = vector.broadcast %459 : vector<1x1xf32> to vector<1x32xf32>
    %461 = arith.mulf %456, %460 : vector<1x32xf32>
    %462 = arith.mulf %461, %441 : vector<1x32xf32>
    %463 = arith.addf %462, %443 : vector<1x32xf32>
    %c0_302 = arith.constant 0 : index
    %c0_303 = arith.constant 0 : index
    %464 = vector.load %arg30[%c0_302, %c0_303] : memref<32x32xf32, #tpu.memory_space<vmem>>, vector<32x32xf32>
    %cst_304 = arith.constant dense<0.000000e+00> : vector<1x32xf32>
    %465 = tpu.matmul %463, %464, %cst_304 {dimension_numbers = #tpu.dot_dimension_numbers<[1], [0], [0], [1], [0, 0, 1, 1], [], []>} : vector<1x32xf32>, vector<32x32xf32>, vector<1x32xf32> -> vector<1x32xf32>
    %c0_305 = arith.constant 0 : index
    %c0_306 = arith.constant 0 : index
    %466 = vector.load %arg31[%c0_305, %c0_306] : memref<1x32xf32, #tpu.memory_space<vmem>>, vector<1x32xf32>
    %467 = arith.addf %465, %466 : vector<1x32xf32>
    %cst_307 = arith.constant 0.000000e+00 : f32
    %468 = vector.broadcast %cst_307 : f32 to vector<1x32xf32>
    %469 = arith.maximumf %467, %468 : vector<1x32xf32>
    %c0_308 = arith.constant 0 : index
    %c0_309 = arith.constant 0 : index
    %470 = vector.load %arg32[%c0_308, %c0_309] : memref<32x12xf32, #tpu.memory_space<vmem>>, vector<32x12xf32>
    %cst_310 = arith.constant dense<0.000000e+00> : vector<1x12xf32>
    %471 = tpu.matmul %469, %470, %cst_310 {dimension_numbers = #tpu.dot_dimension_numbers<[1], [0], [0], [1], [0, 0, 1, 1], [], []>} : vector<1x32xf32>, vector<32x12xf32>, vector<1x12xf32> -> vector<1x12xf32>
    %c0_311 = arith.constant 0 : index
    %c0_312 = arith.constant 0 : index
    %472 = vector.load %arg33[%c0_311, %c0_312] : memref<1x12xf32, #tpu.memory_space<vmem>>, vector<1x12xf32>
    %473 = arith.addf %471, %472 : vector<1x12xf32>
    %c0_313 = arith.constant 0 : index
    %c0_314 = arith.constant 0 : index
    %474 = vector.load %arg34[%c0_313, %c0_314] : memref<12x12xf32, #tpu.memory_space<vmem>>, vector<12x12xf32>
    %cst_315 = arith.constant dense<0.000000e+00> : vector<1x12xf32>
    %475 = tpu.matmul %473, %474, %cst_315 {dimension_numbers = #tpu.dot_dimension_numbers<[1], [0], [0], [1], [0, 0, 1, 1], [], []>} : vector<1x12xf32>, vector<12x12xf32>, vector<1x12xf32> -> vector<1x12xf32>
    %c0_316 = arith.constant 0 : index
    %c0_317 = arith.constant 0 : index
    %476 = vector.load %arg35[%c0_316, %c0_317] : memref<1x12xf32, #tpu.memory_space<vmem>>, vector<1x12xf32>
    tpu.vector_store %arg35[%c0_316, %c0_317], %475 {strides = array<i32>} : memref<1x12xf32, #tpu.memory_space<vmem>>, vector<1x12xf32>,
    return
  }
  func.func @transform_0(%arg0: i32) -> (i32, i32) {
    %c0_i32 = arith.constant 0 : i32
    %c0_i32_0 = arith.constant 0 : i32
    %c0_i32_1 = arith.constant 0 : i32
    return %c0_i32, %c0_i32_0 : i32, i32
  }
  func.func @transform_1(%arg0: i32) -> (i32, i32) {
    %c0_i32 = arith.constant 0 : i32
    %c0_i32_0 = arith.constant 0 : i32
    %c0_i32_1 = arith.constant 0 : i32
    return %c0_i32, %c0_i32_0 : i32, i32
  }
  func.func @transform_2(%arg0: i32) -> (i32, i32) {
    %c0_i32 = arith.constant 0 : i32
    %c0_i32_0 = arith.constant 0 : i32
    %c0_i32_1 = arith.constant 0 : i32
    return %c0_i32, %c0_i32_0 : i32, i32
  }
  func.func @transform_3(%arg0: i32) -> (i32, i32) {
    %c0_i32 = arith.constant 0 : i32
    %c0_i32_0 = arith.constant 0 : i32
    %c0_i32_1 = arith.constant 0 : i32
    return %c0_i32, %c0_i32_0 : i32, i32
  }
  func.func @transform_4(%arg0: i32) -> (i32, i32) {
    %c0_i32 = arith.constant 0 : i32
    %c0_i32_0 = arith.constant 0 : i32
    %c0_i32_1 = arith.constant 0 : i32
    return %c0_i32, %c0_i32_0 : i32, i32
  }
  func.func @transform_5(%arg0: i32) -> (i32, i32) {
    %c0_i32 = arith.constant 0 : i32
    %c0_i32_0 = arith.constant 0 : i32
    %c0_i32_1 = arith.constant 0 : i32
    return %c0_i32, %c0_i32_0 : i32, i32
  }
  func.func @transform_6(%arg0: i32) -> (i32, i32) {
    %c0_i32 = arith.constant 0 : i32
    %c0_i32_0 = arith.constant 0 : i32
    %c0_i32_1 = arith.constant 0 : i32
    return %c0_i32, %c0_i32_0 : i32, i32
  }
  func.func @transform_7(%arg0: i32) -> (i32, i32) {
    %c0_i32 = arith.constant 0 : i32
    %c0_i32_0 = arith.constant 0 : i32
    %c0_i32_1 = arith.constant 0 : i32
    return %c0_i32, %c0_i32_0 : i32, i32
  }
  func.func @transform_8(%arg0: i32) -> (i32, i32, i32) {
    %c0_i32 = arith.constant 0 : i32
    %c0_i32_0 = arith.constant 0 : i32
    %c0_i32_1 = arith.constant 0 : i32
    %c0_i32_2 = arith.constant 0 : i32
    return %c0_i32, %c0_i32_0, %c0_i32_1 : i32, i32, i32
  }
  func.func @transform_9(%arg0: i32) -> (i32, i32, i32) {
    %c0_i32 = arith.constant 0 : i32
    %c0_i32_0 = arith.constant 0 : i32
    %c0_i32_1 = arith.constant 0 : i32
    %c0_i32_2 = arith.constant 0 : i32
    return %c0_i32, %c0_i32_0, %c0_i32_1 : i32, i32, i32
  }
  func.func @transform_10(%arg0: i32) -> (i32, i32, i32) {
    %c0_i32 = arith.constant 0 : i32
    %c0_i32_0 = arith.constant 0 : i32
    %c0_i32_1 = arith.constant 0 : i32
    %c0_i32_2 = arith.constant 0 : i32
    return %c0_i32, %c0_i32_0, %c0_i32_1 : i32, i32, i32
  }
  func.func @transform_11(%arg0: i32) -> (i32, i32, i32) {
    %c0_i32 = arith.constant 0 : i32
    %c0_i32_0 = arith.constant 0 : i32
    %c0_i32_1 = arith.constant 0 : i32
    %c0_i32_2 = arith.constant 0 : i32
    return %c0_i32, %c0_i32_0, %c0_i32_1 : i32, i32, i32
  }
  func.func @transform_12(%arg0: i32) -> (i32, i32, i32) {
    %c0_i32 = arith.constant 0 : i32
    %c0_i32_0 = arith.constant 0 : i32
    %c0_i32_1 = arith.constant 0 : i32
    %c0_i32_2 = arith.constant 0 : i32
    return %c0_i32, %c0_i32_0, %c0_i32_1 : i32, i32, i32
  }
  func.func @transform_13(%arg0: i32) -> (i32, i32, i32) {
    %c0_i32 = arith.constant 0 : i32
    %c0_i32_0 = arith.constant 0 : i32
    %c0_i32_1 = arith.constant 0 : i32
    %c0_i32_2 = arith.constant 0 : i32
    return %c0_i32, %c0_i32_0, %c0_i32_1 : i32, i32, i32
  }
  func.func @transform_14(%arg0: i32) -> (i32, i32, i32) {
    %c0_i32 = arith.constant 0 : i32
    %c0_i32_0 = arith.constant 0 : i32
    %c0_i32_1 = arith.constant 0 : i32
    %c0_i32_2 = arith.constant 0 : i32
    return %c0_i32, %c0_i32_0, %c0_i32_1 : i32, i32, i32
  }
  func.func @transform_15(%arg0: i32) -> (i32, i32, i32) {
    %c0_i32 = arith.constant 0 : i32
    %c0_i32_0 = arith.constant 0 : i32
    %c0_i32_1 = arith.constant 0 : i32
    %c0_i32_2 = arith.constant 0 : i32
    return %c0_i32, %c0_i32_0, %c0_i32_1 : i32, i32, i32
  }
  func.func @transform_16(%arg0: i32) -> (i32, i32, i32) {
    %c0_i32 = arith.constant 0 : i32
    %c0_i32_0 = arith.constant 0 : i32
    %c0_i32_1 = arith.constant 0 : i32
    %c0_i32_2 = arith.constant 0 : i32
    return %c0_i32, %c0_i32_0, %c0_i32_1 : i32, i32, i32
  }
  func.func @transform_17(%arg0: i32) -> (i32, i32, i32) {
    %c0_i32 = arith.constant 0 : i32
    %c0_i32_0 = arith.constant 0 : i32
    %c0_i32_1 = arith.constant 0 : i32
    %c0_i32_2 = arith.constant 0 : i32
    return %c0_i32, %c0_i32_0, %c0_i32_1 : i32, i32, i32
  }
  func.func @transform_18(%arg0: i32) -> (i32, i32, i32) {
    %c0_i32 = arith.constant 0 : i32
    %c0_i32_0 = arith.constant 0 : i32
    %c0_i32_1 = arith.constant 0 : i32
    %c0_i32_2 = arith.constant 0 : i32
    return %c0_i32, %c0_i32_0, %c0_i32_1 : i32, i32, i32
  }
  func.func @transform_19(%arg0: i32) -> (i32, i32, i32) {
    %c0_i32 = arith.constant 0 : i32
    %c0_i32_0 = arith.constant 0 : i32
    %c0_i32_1 = arith.constant 0 : i32
    %c0_i32_2 = arith.constant 0 : i32
    return %c0_i32, %c0_i32_0, %c0_i32_1 : i32, i32, i32
  }
  func.func @transform_20(%arg0: i32) -> (i32, i32, i32) {
    %c0_i32 = arith.constant 0 : i32
    %c0_i32_0 = arith.constant 0 : i32
    %c0_i32_1 = arith.constant 0 : i32
    %c0_i32_2 = arith.constant 0 : i32
    return %c0_i32, %c0_i32_0, %c0_i32_1 : i32, i32, i32
  }
  func.func @transform_21(%arg0: i32) -> (i32, i32, i32) {
    %c0_i32 = arith.constant 0 : i32
    %c0_i32_0 = arith.constant 0 : i32
    %c0_i32_1 = arith.constant 0 : i32
    %c0_i32_2 = arith.constant 0 : i32
    return %c0_i32, %c0_i32_0, %c0_i32_1 : i32, i32, i32
  }
  func.func @transform_22(%arg0: i32) -> (i32, i32, i32) {
    %c0_i32 = arith.constant 0 : i32
    %c0_i32_0 = arith.constant 0 : i32
    %c0_i32_1 = arith.constant 0 : i32
    %c0_i32_2 = arith.constant 0 : i32
    return %c0_i32, %c0_i32_0, %c0_i32_1 : i32, i32, i32
  }
  func.func @transform_23(%arg0: i32) -> (i32, i32, i32) {
    %c0_i32 = arith.constant 0 : i32
    %c0_i32_0 = arith.constant 0 : i32
    %c0_i32_1 = arith.constant 0 : i32
    %c0_i32_2 = arith.constant 0 : i32
    return %c0_i32, %c0_i32_0, %c0_i32_1 : i32, i32, i32
  }
  func.func @transform_24(%arg0: i32) -> (i32, i32, i32) {
    %c0_i32 = arith.constant 0 : i32
    %c0_i32_0 = arith.constant 0 : i32
    %c0_i32_1 = arith.constant 0 : i32
    %c0_i32_2 = arith.constant 0 : i32
    return %c0_i32, %c0_i32_0, %c0_i32_1 : i32, i32, i32
  }
  func.func @transform_25(%arg0: i32) -> (i32, i32, i32) {
    %c0_i32 = arith.constant 0 : i32
    %c0_i32_0 = arith.constant 0 : i32
    %c0_i32_1 = arith.constant 0 : i32
    %c0_i32_2 = arith.constant 0 : i32
    return %c0_i32, %c0_i32_0, %c0_i32_1 : i32, i32, i32
  }
  func.func @transform_26(%arg0: i32) -> (i32, i32, i32) {
    %c0_i32 = arith.constant 0 : i32
    %c0_i32_0 = arith.constant 0 : i32
    %c0_i32_1 = arith.constant 0 : i32
    %c0_i32_2 = arith.constant 0 : i32
    return %c0_i32, %c0_i32_0, %c0_i32_1 : i32, i32, i32
  }
  func.func @transform_27(%arg0: i32) -> (i32, i32, i32) {
    %c0_i32 = arith.constant 0 : i32
    %c0_i32_0 = arith.constant 0 : i32
    %c0_i32_1 = arith.constant 0 : i32
    %c0_i32_2 = arith.constant 0 : i32
    return %c0_i32, %c0_i32_0, %c0_i32_1 : i32, i32, i32
  }
  func.func @transform_28(%arg0: i32) -> (i32, i32, i32) {
    %c0_i32 = arith.constant 0 : i32
    %c0_i32_0 = arith.constant 0 : i32
    %c0_i32_1 = arith.constant 0 : i32
    %c0_i32_2 = arith.constant 0 : i32
    return %c0_i32, %c0_i32_0, %c0_i32_1 : i32, i32, i32
  }
  func.func @transform_29(%arg0: i32) -> (i32, i32) {
    %c0_i32 = arith.constant 0 : i32
    %c0_i32_0 = arith.constant 0 : i32
    %c0_i32_1 = arith.constant 0 : i32
    return %c0_i32, %c0_i32_0 : i32, i32
  }
  func.func @transform_30(%arg0: i32) -> (i32, i32) {
    %c0_i32 = arith.constant 0 : i32
    %c0_i32_0 = arith.constant 0 : i32
    %c0_i32_1 = arith.constant 0 : i32
    return %c0_i32, %c0_i32_0 : i32, i32
  }
  func.func @transform_31(%arg0: i32) -> (i32, i32) {
    %c0_i32 = arith.constant 0 : i32
    %c0_i32_0 = arith.constant 0 : i32
    %c0_i32_1 = arith.constant 0 : i32
    return %c0_i32, %c0_i32_0 : i32, i32
  }
  func.func @transform_32(%arg0: i32) -> (i32, i32) {
    %c0_i32 = arith.constant 0 : i32
    %c0_i32_0 = arith.constant 0 : i32
    %c0_i32_1 = arith.constant 0 : i32
    return %c0_i32, %c0_i32_0 : i32, i32
  }
  func.func @transform_33(%arg0: i32) -> (i32, i32) {
    %c0_i32 = arith.constant 0 : i32
    %c0_i32_0 = arith.constant 0 : i32
    %c0_i32_1 = arith.constant 0 : i32
    return %c0_i32, %c0_i32_0 : i32, i32
  }
  func.func @transform_34(%arg0: i32) -> (i32, i32) {
    %c0_i32 = arith.constant 0 : i32
    %c0_i32_0 = arith.constant 0 : i32
    %c0_i32_1 = arith.constant 0 : i32
    return %c0_i32, %c0_i32_0 : i32, i32
  }
}

</mosaic_0001>

<bundles_post_ra>
// kernel: planning_head_forward.1
= control target key start
LH: loop header
LB: loop body
LE: loop exit
PB: predicated region body
PF: predicated region fallthrough
CT: control target
= control target key end

     0   :  { %v9860_v0 = vmov 0.0|0.0   ;;  %s7575_s3 = smov 2   ;;  %vm7576_vm0 = vmmov 0   ;;  %v9858_v1 = vmov 0.0   ;;  %vm163_vm1 = vcmask 785408   ;;  %s7578_s10 = smov 3   ;;  %s9857_s0 = inlined_call_operand.smem [shape: u32[35], index: -1, kind: input, shape index: {}] }
   0x1   :  { %6836 = vmatprep.subr.bf16.mxu0 %v9860_v0  ;;  %s7621_s6 = sld [smem:[%s9857_s0 + %s7575_s3]]   ;;  %6207 = vmatprep.mubr.msk.f32.mxu0 %vm7576_vm0, %v9858_v1  ;;  %vm239_vm2 = vcmask 259072   ;;  %s7579_s14 = smov 8   ;;  %vm315_vm3 = vcmask 261120   ;;  %vm470_vm4 = vcmask 253952   ;;  %vm1231_vm5 = vcmask 64512  }
   0x2   :  { %6854 = vmatprep.subr.bf16.mxu1 %v9860_v0  ;;  %6218 = vmatprep.mubr.msk.f32.mxu1 %vm7576_vm0, %v9858_v1  ;;  %s1_s9 = sld [smem:[%s9857_s0]]   ;;  %s7580_s18 = smov 4   ;;  %vm1867_vm6 = vcmask 523264   ;;  %vm5262_vm7 = vcmask 1043456   ;;  %vm7609_vm8 = vmmov 1   ;;  %vm5258_vm10 = vcmask 97280  }
   0x3   :  { %s5344_s13 = sld [smem:[%s9857_s0 + %s7578_s10]]   ;;  %s7581_s22 = smov 5   ;;  %vm7138_vm9 = vmpackc.low %vm5262_vm7, %vm7609_vm8  ;;  %vm5336_vm11 = vcmask 90112  }
   0x4   :  { %s7656_s17 = sld [smem:[%s9857_s0 + %s7579_s14]]   ;;  %s7582_s26 = smov 10  }
   0x5   :  { %s5345_s21 = sld [smem:[%s9857_s0 + %s7580_s18]]   ;;  %s7583_s30 = smov 6  }
   0x6   :  { %s5346_s25 = sld [smem:[%s9857_s0 + %s7581_s22]]   ;;  %s7584_s4 = smov 9  }
   0x7   :  { %v144_v2 = vld [vmem:[%s7621_s6] sm:$0xff]  ;;  %v145_v3 = vld [vmem:[%s7621_s6 + $0x8] sm:$0xff]  ;;  %v146_v4 = vld [vmem:[%s7621_s6 + $0x10] sm:$0xff]  ;;  %s7674_s29 = sld [smem:[%s9857_s0 + %s7582_s26]]   ;;  %s7585_s8 = smov 11  }
   0x8   :  { %v6837_v5 = vpack.c.bf16 %v145_v3, %v144_v2  ;;  %v147_v6 = vld [vmem:[%s7621_s6 + $0x18] sm:$0xff]  ;;  %v148_v8 = vld [vmem:[%s7621_s6 + $0x20] sm:$0xff]  ;;  %v149_v9 = vld [vmem:[%s7621_s6 + $0x28] sm:$0xff]  ;;  %s5347_s3 = sld [smem:[%s9857_s0 + %s7583_s30]]   ;;  %s7586_s12 = smov 14  }
   0x9   :  { %v6840_v7 = vpack.c.bf16 %v147_v6, %v146_v4  ;;  %v6843_v10 = vpack.c.bf16 %v149_v9, %v148_v8  ;;  %v150_v11 = vld [vmem:[%s7621_s6 + $0x30] sm:$0xff]  ;;  %v151_v12 = vld [vmem:[%s7621_s6 + $0x38] sm:$0xff]  ;;  %v152_v14 = vld [vmem:[%s7621_s6 + $0x40] sm:$0xff]  ;;  %s7691_s7 = sld [smem:[%s9857_s0 + %s7584_s4]]   ;;  %s7587_s16 = smov 12  }
   0xa   :  { %6838 = vmatpush3.bf16.msra.mxu0 %v6837_v5  ;;  %v6846_v13 = vpack.c.bf16 %v151_v12, %v150_v11  ;;  %v153_v15 = vld [vmem:[%s7621_s6 + $0x48] sm:$0xff]  ;;  %v154_v17 = vld [vmem:[%s7621_s6 + $0x50] sm:$0xff]  ;;  %v155_v18 = vld [vmem:[%s7621_s6 + $0x58] sm:$0xff]  ;;  %s7700_s11 = sld [smem:[%s9857_s0 + %s7585_s8]]   ;;  %s7590_s30 = smov 15  }
   0xb   :  { %6839 = vmatprep.subr.bf16.mxu0 %v9860_v0  ;;  %v6849_v16 = vpack.c.bf16 %v153_v15, %v152_v14  ;;  %v6852_v19 = vpack.c.bf16 %v155_v18, %v154_v17  ;;  %v143_v20 = vld [vmem:[%s1_s9] sm:$0x3f]  ;;  %v311_v32 = vld [vmem:[%s7656_s17 + $0x8] sm:$0xff]  ;;  %v312_v33 = vld [vmem:[%s7656_s17 + $0x10] sm:$0xff]  ;;  %s7708_s15 = sld [smem:[%s9857_s0 + %s7586_s12]]   ;;  %s7591_s4 = smov 7  }
   0xc   :  { %v5376_v21 = vld [vmem:[%s5344_s13] ss:$0 sm:$0xff]  ;;  %v313_v35 = vld [vmem:[%s7656_s17 + $0x18] sm:$0xff]  ;;  %s7718_s20 = sld [smem:[%s9857_s0 + %s7587_s16]]   ;;  %s7592_s9 = smov 1  }
   0xd   :  { %v310_v31 = vld [vmem:[%s7656_s17] sm:$0xff]  ;;  %v6858_v36 = vpack.c.bf16 %v313_v35, %v312_v33  ;;  %v390_v54 = vld [vmem:[%s7674_s29 + $0x8] sm:$0xff]  ;;  %v391_v59 = vld [vmem:[%s7674_s29 + $0x10] sm:$0xff]  ;;  %s7746_s8 = sld [smem:[%s9857_s0 + %s7591_s4]]   ;;  %s7593_s14 = smov 17  }
   0xe   :  { %6841 = vmatpush3.bf16.msra.mxu0 %v6840_v7  ;;  %v6855_v34 = vpack.c.bf16 %v311_v32, %v310_v31  ;;  %v5378_v41 = vld [vmem:[%s5345_s21] ss:$0 sm:$0xff]  ;;  %v392_v60 = vld [vmem:[%s7674_s29 + $0x18] sm:$0xff]  ;;  %s7588_s21 = smov 13   ;;  %v565_v31 = vlaneseq  ;;  %s7764_s13 = sld [smem:[%s9857_s0 + %s7592_s9]]  }
   0xf   :  { %6842 = vmatprep.subr.bf16.mxu0 %v9860_v0  ;;  %v5379_v43 = vld [vmem:[%s5346_s25] ss:$0 sm:$0xff]  ;;  %v6864_v61 = vpack.c.bf16 %v392_v60, %v391_v59  ;;  %s7723_s24 = sld [smem:[%s9857_s0 + %s7588_s21]]   ;;  %s7589_s25 = smov 16  }
  0x10   :  { %6856 = vmatpush3.bf16.msra.mxu1 %v6855_v34  ;;  %v389_v53 = vld [vmem:[%s7674_s29] sm:$0xff]  ;;  %s7734_s28 = sld [smem:[%s9857_s0 + %s7589_s25]]   ;;  %v566_v32 = vshrl.u32 %v565_v31, 7  ;;  %s7594_s21 = smov 18  }
  0x11   :  { %6857 = vmatprep.subr.bf16.mxu1 %v9860_v0  ;;  %v276_v55 = vld [vmem:[%s5347_s3] sm:$0x1]  ;;  %v6861_v57 = vpack.c.bf16 %v390_v54, %v389_v53  ;;  %v488_v18 = vld [vmem:[%s7708_s15 + $0x10] sm:$0xff]  ;;  %s7741_s3 = sld [smem:[%s9857_s0 + %s7590_s30]]   ;;  %s7595_s26 = smov 19  }
  0x12   :  { %6844 = vmatpush3.bf16.msra.mxu0 %v6843_v10  ;;  %v314_v62 = vld [vmem:[%s7691_s7] sm:$0x1]  ;;  %s7772_s19 = sld [smem:[%s9857_s0 + %s7593_s14]]   ;;  %s7596_s2 = smov 20  }
  0x13   :  { %6845 = vmatprep.subr.bf16.mxu0 %v9860_v0  ;;  %v393_v4 = vld [vmem:[%s7700_s11] sm:$0x1]  ;;  %s8014_s25 = sld [smem:[%s9857_s0 + %s7594_s21]]   ;;  %s7597_s9 = smov 23  }
  0x14   :  { %6859 = vmatpush3.bf16.msra.mxu1 %v6858_v36  ;;  %v486_v15 = vld [vmem:[%s7708_s15] sm:$0xff]  ;;  %v7749_v36 = vsub.s32 0, %v566_v32  ;;  %v7783_v53 = vld [vmem:[%s7764_s13 + $0x10] sm:$0xff]  ;;  %v7791_v54 = vld [vmem:[%s7764_s13 + $0x18] sm:$0xff]  ;;  %s8370_s1 = sld [smem:[%s9857_s0 + %s7595_s26]]   ;;  %s7598_s16 = smov 25  }
  0x15   :  { %6860 = vmatprep.subr.bf16.mxu1 %v9860_v0  ;;  %v7814_v59 = vld [vmem:[%s7764_s13 + $0x40] sm:$0xff]  ;;  %v7821_v60 = vld [vmem:[%s7764_s13 + $0x48] sm:$0xff]  ;;  %s8389_s6 = sld [smem:[%s9857_s0 + %s7596_s2]]   ;;  %s7599_s23 = smov 21  }
  0x16   :  { %6847 = vmatpush3.bf16.msra.mxu0 %v6846_v13  ;;  %9894 = vst [vmem:[#allocation3_spill] sm:$0xff] %v7749_v36  ;;  %s8398_s14 = sld [smem:[%s9857_s0 + %s7597_s9]]   ;;  %s7600_s2 = smov 22  }
  0x17   :  { %6848 = vmatprep.subr.bf16.mxu0 %v9860_v0  ;;  %v490_v33 = vld [vmem:[%s7741_s3] sm:$0x1]  ;;  %s8406_s22 = sld [smem:[%s9857_s0 + %s7598_s16]]   ;;  %s7601_s10 = smov 24  }
  0x18   :  { %s8423_s30 = sld [smem:[%s9857_s0 + %s7599_s23]]   ;;  %s7602_s21 = smov 26  }
  0x19   :  { %s8428_s9 = sld [smem:[%s9857_s0 + %s7600_s2]]   ;;  %s7603_s2 = smov 27  }
  0x1a   :  { %6850 = vmatpush3.bf16.msra.mxu0 %v6849_v16  ;;  %v487_v16 = vld [vmem:[%s7708_s15 + $0x8] sm:$0xff]  ;;  %s8441_s18 = sld [smem:[%s9857_s0 + %s7601_s10]]   ;;  %s7604_s12 = smov 28  }
  0x1b   :  { %6851 = vmatprep.subr.bf16.mxu0 %v9860_v0  ;;  %v6867_v17 = vpack.c.bf16 %v487_v16, %v486_v15  ;;  %s8450_s27 = sld [smem:[%s9857_s0 + %s7602_s21]]   ;;  %s7611_s26 = smov 34  }
  0x1c   :  { %s8464_s10 = sld [smem:[%s9857_s0 + %s7603_s2]]  }
  0x1d   :  { %s8469_s23 = sld [smem:[%s9857_s0 + %s7604_s12]]  }
  0x1e   :  { %6853 = vmatpush3.bf16.msra.mxu0 %v6852_v19  ;;  %v489_v19 = vld [vmem:[%s7708_s15 + $0x18] sm:$0xff]  ;;  %s5375_s4 = sld [smem:[%s9857_s0 + %s7611_s26]]  }
  0x21   :  { %6208 = vmatmul.mubr.msk.f32.vlgmr.msra.gmra.mrb[0].mxu0 %vm163_vm1, %v143_v20  ;;  %v6870_v20 = vpack.c.bf16 %v489_v19, %v488_v18  ;;  %v302_v19 = vld [vmem:[%s7764_s13 + $0xc0] sm:$0xff] }
  0xf4   :  { %v233_v22 = vpop.f32.mrb[0].mxu0 }
  0xf5   :  { %v234_v23 = vadd.f32 %v5376_v21, %v233_v22  ;;  %v6209_v24 = vpop.f32.mrb[1].mxu0 }
  0xf7   :  { %v240_v25 = vsel %vm239_vm2, %v234_v23, 0.0 }
  0xf8   :  { %241 = vadd.xlane.f32.xlu0 %v240_v25  ;;  %v468_v25 = vld [vmem:[%s7718_s20] sm:$0x1] }
 0x185   :  { %v242_v26 = vpop.xlane.xlu0 %241 }
 0x186   :  { %v244_v27 = vmul.f32 0.03125, %v242_v26 }
 0x188   :  { %v245_v28 = vsub.f32 %v234_v23, %v244_v27  ;;  %v469_v27 = vld [vmem:[%s7723_s24] sm:$0x1] }
 0x18a   :  { %v246_v29 = vmul.f32 %v245_v28, %v245_v28 }
 0x18c   :  { %v247_v30 = vsel %vm239_vm2, %v246_v29, 0.0 }
 0x18d   :  { %248 = vadd.xlane.f32.xlu0 %v247_v30  ;;  %v570_v30 = vld [vmem:[%s7734_s28] sm:$0xff] }
 0x18e   :  { %6245 = vmatprep.mubr.msk.f32.mxu0 %vm315_vm3, %v570_v30 }
 0x21a   :  { %v249_v37 = vpop.xlane.xlu0 %248 }
 0x21b   :  { %v250_v38 = vmul.f32 0.03125, %v249_v37 }
 0x21d   :  { %v251_v39 = vadd.f32 1e-05, %v250_v38 }
 0x21f   :  { %7289 = vrsqrt.f32 %v251_v39  ;;  %v142_v39 = vld [vmem:[%s7746_s8] sm:$0xff] }
 0x229   :  { %v7290_v40 = vpop.eup %7289 }
 0x22a   :  { %v253_v42 = vmul.f32 %v7290_v40, %v245_v28 }
 0x22c   :  { %v260_v44 = vmul.f32 %v5378_v41, %v253_v42  ;;  %v571_v42 = vld [vmem:[%s7734_s28 + $0x8] sm:$0xff] }
 0x22e   :  { %v267_v45 = vadd.f32 %v5379_v43, %v260_v44  ;;  %v572_v43 = vld [vmem:[%s7734_s28 + $0x10] sm:$0xff]  ;;  %v573_v44 = vld [vmem:[%s7734_s28 + $0x18] sm:$0xff] }
 0x230   :  { %v268_v46 = vmax.f32 %v267_v45, 0.0  ;;  %v278_v45 = vld [vmem:[%s7764_s13] sm:$0xff] }
 0x232   :  { %v269_v47 = vsel %vm239_vm2, %v268_v46, -inf  ;;  %v995_v46 = vld [vmem:[%s7772_s19] sm:$0xff] }
 0x233   :  { %v270_v48 = vrot.slane %v269_v47, 4 }
 0x235   :  { %v271_v49 = vmax.f32 %v269_v47, %v270_v48  ;;  %v996_v47 = vld [vmem:[%s7772_s19 + $0x8] sm:$0xff]  ;;  %v997_v48 = vld [vmem:[%s7772_s19 + $0x10] sm:$0xff] }
 0x237   :  { %v272_v50 = vrot.slane %v271_v49, 2 }
 0x239   :  { %v273_v51 = vmax.f32 %v271_v49, %v272_v50  ;;  %v6880_v49 = vpack.c.bf16 %v996_v47, %v995_v46  ;;  %v998_v50 = vld [vmem:[%s7772_s19 + $0x18] sm:$0xff] }
 0x23b   :  { %v274_v52 = vrot.slane %v273_v51, 1 }
 0x23d   :  { %v275_v56 = vmax.f32 %v273_v51, %v274_v52  ;;  %v6884_v51 = vpack.c.bf16 %v998_v50, %v997_v48  ;;  %v7780_v52 = vld [vmem:[%s7764_s13 + $0x8] sm:$0xff] }
 0x23f   :  { %v277_v58 = vadd.f32 %v276_v55, %v275_v56  ;;  %v7794_v55 = vld [vmem:[%s7764_s13 + $0x20] sm:$0xff]  ;;  %v7801_v56 = vld [vmem:[%s7764_s13 + $0x28] sm:$0xff] }
 0x241   :  { %6219 = vmatmul.mubr.msk.f32.vlgmr.msra.gmra.mrb[0].mxu1 %vm315_vm3, %v277_v58 }
 0x242   :  { %6862 = vmatpush3.bf16.msra.mxu1 %v6861_v57  ;;  %6229 = vmatprep.mubr.msk.f32.mxu1 %vm7576_vm0, %v9858_v1  ;;  %v7804_v57 = vld [vmem:[%s7764_s13 + $0x30] sm:$0xff] }
 0x243   :  { %6863 = vmatprep.subr.bf16.mxu1 %v9860_v0 }
 0x246   :  { %6865 = vmatpush3.bf16.msra.mxu1 %v6864_v61  ;;  %v7824_v61 = vld [vmem:[%s7764_s13 + $0x50] sm:$0xff] }
 0x247   :  { %6866 = vmatprep.subr.bf16.mxu1 %v9860_v0 }
 0x314   :  { %v385_v63 = vpop.f32.mrb[0].mxu1 }
 0x315   :  { %v386_v2 = vadd.f32 %v385_v63, %v314_v62  ;;  %v6220_v3 = vpop.f32.mrb[1].mxu1  ;;  %v7831_v62 = vld [vmem:[%s7764_s13 + $0x58] sm:$0xff]  ;;  %v7834_v63 = vld [vmem:[%s7764_s13 + $0x60] sm:$0xff] }
 0x316   :  { %v292_v3 = vld [vmem:[%s7764_s13 + $0x70] sm:$0xff] }
 0x317   :  { %6230 = vmatmul.mubr.msk.f32.vlgmr.msra.gmra.mrb[2].mxu1 %vm315_vm3, %v386_v2  ;;  %v291_v2 = vld [vmem:[%s7764_s13 + $0x68] sm:$0xff] }
 0x318   :  { %6240 = vmatprep.mubr.msk.f32.mxu1 %vm7576_vm0, %v9858_v1  ;;  %6868 = vmatpush3.bf16.msra.mxu1 %v6867_v17  ;;  %v301_v17 = vld [vmem:[%s7764_s13 + $0xb8] sm:$0xff] }
 0x319   :  { %6869 = vmatprep.subr.bf16.mxu1 %v9860_v0 }
 0x31c   :  { %6871 = vmatpush3.bf16.msra.mxu1 %v6870_v20  ;;  %v303_v20 = vld [vmem:[%s7764_s13 + $0xc8] sm:$0xff] }
 0x3ea   :  { %v463_v5 = vpop.f32.mrb[2].mxu1 }
 0x3eb   :  { %v464_v6 = vadd.f32 %v463_v5, %v393_v4  ;;  %v6231_v7 = vpop.f32.mrb[3].mxu1  ;;  %v293_v4 = vld [vmem:[%s7764_s13 + $0x78] sm:$0xff]  ;;  %v294_v5 = vld [vmem:[%s7764_s13 + $0x80] sm:$0xff] }
 0x3ec   :  { %v296_v7 = vld [vmem:[%s7764_s13 + $0x90] sm:$0xff] }
 0x3ed   :  { %v467_v8 = vadd.f32 %v464_v6, %v277_v58  ;;  %v7811_v58 = vld [vmem:[%s7764_s13 + $0x38] sm:$0xff]  ;;  %v295_v6 = vld [vmem:[%s7764_s13 + $0x88] sm:$0xff] }
 0x3ef   :  { %v471_v9 = vsel %vm470_vm4, %v467_v8, 0.0 }
 0x3f0   :  { %472 = vadd.xlane.f32.xlu1 %v471_v9  ;;  %v298_v9 = vld [vmem:[%s7764_s13 + $0xa0] sm:$0xff] }
 0x47d   :  { %v473_v10 = vpop.xlane.xlu1 %472 }
 0x47e   :  { %v474_v11 = vmul.f32 0.03125, %v473_v10 }
 0x480   :  { %v475_v12 = vsub.f32 %v467_v8, %v474_v11  ;;  %v297_v8 = vld [vmem:[%s7764_s13 + $0x98] sm:$0xff] }
 0x482   :  { %v476_v13 = vmul.f32 %v475_v12, %v475_v12 }
 0x484   :  { %v477_v14 = vsel %vm470_vm4, %v476_v13, 0.0 }
 0x485   :  { %478 = vadd.xlane.f32.xlu1 %v477_v14  ;;  %v300_v14 = vld [vmem:[%s7764_s13 + $0xb0] sm:$0xff] }
 0x512   :  { %v479_v21 = vpop.xlane.xlu1 %478 }
 0x513   :  { %v480_v22 = vmul.f32 0.03125, %v479_v21  ;;  %v304_v21 = vld [vmem:[%s7764_s13 + $0xd0] sm:$0xff] }
 0x515   :  { %v481_v23 = vadd.f32 1e-05, %v480_v22  ;;  %v305_v22 = vld [vmem:[%s7764_s13 + $0xd8] sm:$0xff] }
 0x517   :  { %7291 = vrsqrt.f32 %v481_v23  ;;  %v306_v23 = vld [vmem:[%s7764_s13 + $0xe0] sm:$0xff] }
 0x521   :  { %v7292_v24 = vpop.eup %7291 }
 0x522   :  { %v483_v26 = vmul.f32 %v7292_v24, %v475_v12  ;;  %v299_v12 = vld [vmem:[%s7764_s13 + $0xa8] sm:$0xff] }
 0x523   :  { %v307_v24 = vld [vmem:[%s7764_s13 + $0xe8] sm:$0xff] }
 0x524   :  { %v484_v28 = vmul.f32 %v483_v26, %v468_v25  ;;  %v308_v25 = vld [vmem:[%s7764_s13 + $0xf0] sm:$0xff]  ;;  %v309_v26 = vld [vmem:[%s7764_s13 + $0xf8] sm:$0xff] }
 0x526   :  { %v7727_v29 = vadd.f32 %v484_v28, %v469_v27 }
 0x528   :  { %9893 = vst [vmem:[#allocation2_spill] sm:$0xff] %v7727_v29  ;;  %6241 = vmatmul.mubr.msk.f32.vlgmr.msra.gmra.mrb[4].mxu1 %vm315_vm3, %v7727_v29 }
 0x529   :  { %6259 = vmatprep.mubr.msk.f32.mxu1 %vm315_vm3, %v278_v45 }
 0x5fb   :  { %v560_v34 = vpop.f32.mrb[4].mxu1 }
 0x5fc   :  { %v561_v35 = vadd.f32 %v560_v34, %v490_v33  ;;  %v6242_v37 = vpop.f32.mrb[5].mxu1 }
 0x5fe   :  { %v564_v38 = vmul.f32 0.5, %v561_v35 }
 0x600   :  { %v568_v40 = vrot.slane %v564_v38, %v7749_v36 }
 0x602   :  { %v569_v41 = vmul.f32 %v568_v40, %v142_v39 }
 0x604   :  { %6243 = vmatprep.subr.msk.mxu0 %vm315_vm3, %v569_v41 }
 0x605   :  { %6244 = vmatpush3.xpose.msk.msra.mxu0 %vm315_vm3, %v569_v41 }
 0x606   :  { %6881 = vmatprep.subr.bf16.mxu0 %v6880_v49 }
 0x608   :  { %6246 = vmatmul.mubr.msk.f32.vlgmr.msra.gmra.mrb[2].mxu0 %vm315_vm3, %v571_v42 }
 0x609   :  { %6248 = vmatprep.mubr.msk.f32.mxu0 %vm315_vm3, %v572_v43  ;;  %6883 = vmatpush3.bf16.msra.mxu0 %v6880_v49 }
 0x60a   :  { %6885 = vmatprep.subr.bf16.mxu0 %v6884_v51 }
 0x60c   :  { %6249 = vmatmul.mubr.msk.f32.gmra.mrb[4].mxu0 %vm315_vm3, %v573_v44 }
 0x60d   :  { %6315 = vmatprep.mubr.msk.f32.mxu0 %vm315_vm3, %v278_v45  ;;  %6887 = vmatpush3.bf16.msra.mxu0 %v6884_v51 }
 0x60e   :  { %6363 = vmatprep.subr.mxu0 %v9858_v1 }
 0x610   :  { %6316 = vmatmul.mubr.msk.f32.vlgmr.msra.gmra.mrb[6].mxu0 %vm315_vm3, %v7780_v52 }
 0x611   :  { %6318 = vmatprep.mubr.msk.f32.mxu0 %vm315_vm3, %v7783_v53  ;;  %6364 = vmatpush3.msra.mxu0 %v142_v39 }
 0x612   :  { %6926 = vmatprep.subr.bf16.mxu0 %v9860_v0 }
 0x614   :  { %6319 = vmatmul.mubr.msk.f32.gmra.mrb[8].mxu0 %vm315_vm3, %v7791_v54 }
 0x615   :  { %6321 = vmatprep.mubr.msk.f32.mxu0 %vm315_vm3, %v7794_v55 }
 0x618   :  { %6322 = vmatmul.mubr.msk.f32.gmra.mrb[10].mxu0 %vm315_vm3, %v7801_v56 }
 0x619   :  { %6324 = vmatprep.mubr.msk.f32.mxu0 %vm315_vm3, %v7804_v57 }
 0x61c   :  { %6325 = vmatmul.mubr.msk.f32.gmra.mrb[12].mxu0 %vm315_vm3, %v7811_v58 }
 0x61d   :  { %6327 = vmatprep.mubr.msk.f32.mxu0 %vm315_vm3, %v7814_v59 }
 0x620   :  { %6328 = vmatmul.mubr.msk.f32.gmra.mrb[14].mxu0 %vm315_vm3, %v7821_v60 }
 0x621   :  { %6330 = vmatprep.mubr.msk.f32.mxu0 %vm315_vm3, %v7824_v61 }
 0x624   :  { %6331 = vmatmul.mubr.msk.f32.gmra.mrb[16].mxu0 %vm315_vm3, %v7831_v62 }
 0x625   :  { %6333 = vmatprep.mubr.msk.f32.mxu0 %vm315_vm3, %v7834_v63 }
 0x628   :  { %6334 = vmatmul.mubr.msk.f32.gmra.mrb[18].mxu0 %vm315_vm3, %v291_v2 }
 0x629   :  { %6336 = vmatprep.mubr.msk.f32.mxu0 %vm315_vm3, %v292_v3 }
 0x62c   :  { %6337 = vmatmul.mubr.msk.f32.gmra.mrb[20].mxu0 %vm315_vm3, %v293_v4 }
 0x62d   :  { %6339 = vmatprep.mubr.msk.f32.mxu0 %vm315_vm3, %v294_v5 }
 0x630   :  { %6340 = vmatmul.mubr.msk.f32.gmra.mrb[22].mxu0 %vm315_vm3, %v295_v6 }
 0x631   :  { %6342 = vmatprep.mubr.msk.f32.mxu0 %vm315_vm3, %v296_v7 }
 0x634   :  { %6343 = vmatmul.mubr.msk.f32.gmra.mrb[24].mxu0 %vm315_vm3, %v297_v8 }
 0x635   :  { %6345 = vmatprep.mubr.msk.f32.mxu0 %vm315_vm3, %v298_v9 }
 0x638   :  { %6346 = vmatmul.mubr.msk.f32.gmra.mrb[26].mxu0 %vm315_vm3, %v299_v12 }
 0x639   :  { %6348 = vmatprep.mubr.msk.f32.mxu0 %vm315_vm3, %v300_v14 }
 0x63c   :  { %6349 = vmatmul.mubr.msk.f32.gmra.mrb[28].mxu0 %vm315_vm3, %v301_v17 }
 0x63d   :  { %6351 = vmatprep.mubr.msk.f32.mxu0 %vm315_vm3, %v302_v19 }
 0x640   :  { %6352 = vmatmul.mubr.msk.f32.gmra.mrb[30].mxu0 %vm315_vm3, %v303_v20 }
 0x641   :  { %6354 = vmatprep.mubr.msk.f32.mxu0 %vm315_vm3, %v304_v21 }
 0x644   :  { %6355 = vmatmul.mubr.msk.f32.gmra.mrb[32].mxu0 %vm315_vm3, %v305_v22 }
 0x645   :  { %6357 = vmatprep.mubr.msk.f32.mxu0 %vm315_vm3, %v306_v23 }
 0x648   :  { %6358 = vmatmul.mubr.msk.f32.gmra.mrb[34].mxu0 %vm315_vm3, %v307_v24 }
 0x649   :  { %6360 = vmatprep.mubr.msk.f32.mxu0 %vm315_vm3, %v308_v25 }
 0x64c   :  { %6361 = vmatmul.mubr.msk.f32.gmra.mrb[36].mxu0 %vm315_vm3, %v309_v26 }
 0x64d   :  { %6365 = vmatprep.mubr.msk.f32.mxu0 %vm7576_vm0, %v9858_v1 }
 0x6db   :  { %v6247_v10 = vpop.f32.mrb[2].mxu0 }
 0x6dc   :  { %v655_v11 = vpop.f32.mrb[3].mxu0 }
 0x6dd   :  { %v6872_v13 = vpack.c.bf16 %v6247_v10, %v655_v11 }
 0x6df   :  { %v6250_v15 = vpop.f32.mrb[4].mxu0  ;;  %6873 = vmatprep.subr.bf16.mxu1 %v6872_v13 }
 0x6e0   :  { %v665_v16 = vpop.f32.mrb[5].mxu0  ;;  %6875 = vmatpush3.bf16.msra.mxu1 %v6872_v13 }
 0x6e1   :  { %v6876_v18 = vpack.c.bf16 %v6250_v15, %v665_v16 }
 0x6e3   :  { %6877 = vmatprep.subr.bf16.mxu1 %v6876_v18 }
 0x6e4   :  { %6879 = vmatpush3.bf16.msra.mxu1 %v6876_v18 }
 0x6e7   :  { %6260 = vmatmul.mubr.msk.f32.vlgmr.msra.gmra.mrb[6].mxu1 %vm315_vm3, %v7780_v52 }
 0x6e8   :  { %6262 = vmatprep.mubr.msk.f32.mxu1 %vm315_vm3, %v7783_v53 }
 0x6eb   :  { %6263 = vmatmul.mubr.msk.f32.gmra.mrb[8].mxu1 %vm315_vm3, %v7791_v54 }
 0x6ec   :  { %6265 = vmatprep.mubr.msk.f32.mxu1 %vm315_vm3, %v7794_v55 }
 0x6ef   :  { %6266 = vmatmul.mubr.msk.f32.gmra.mrb[10].mxu1 %vm315_vm3, %v7801_v56 }
 0x6f0   :  { %6268 = vmatprep.mubr.msk.f32.mxu1 %vm315_vm3, %v7804_v57 }
 0x6f3   :  { %6269 = vmatmul.mubr.msk.f32.gmra.mrb[12].mxu1 %vm315_vm3, %v7811_v58 }
 0x6f4   :  { %6271 = vmatprep.mubr.msk.f32.mxu1 %vm315_vm3, %v7814_v59 }
 0x6f7   :  { %6272 = vmatmul.mubr.msk.f32.gmra.mrb[14].mxu1 %vm315_vm3, %v7821_v60 }
 0x6f8   :  { %6274 = vmatprep.mubr.msk.f32.mxu1 %vm315_vm3, %v7824_v61 }
 0x6fb   :  { %6275 = vmatmul.mubr.msk.f32.gmra.mrb[16].mxu1 %vm315_vm3, %v7831_v62 }
 0x6fc   :  { %6277 = vmatprep.mubr.msk.f32.mxu1 %vm315_vm3, %v7834_v63 }
 0x6ff   :  { %6278 = vmatmul.mubr.msk.f32.gmra.mrb[18].mxu1 %vm315_vm3, %v291_v2 }
 0x700   :  { %6280 = vmatprep.mubr.msk.f32.mxu1 %vm315_vm3, %v292_v3 }
 0x703   :  { %6281 = vmatmul.mubr.msk.f32.gmra.mrb[20].mxu1 %vm315_vm3, %v293_v4 }
 0x704   :  { %6283 = vmatprep.mubr.msk.f32.mxu1 %vm315_vm3, %v294_v5 }
 0x707   :  { %6284 = vmatmul.mubr.msk.f32.gmra.mrb[22].mxu1 %vm315_vm3, %v295_v6 }
 0x708   :  { %6286 = vmatprep.mubr.msk.f32.mxu1 %vm315_vm3, %v296_v7 }
 0x70b   :  { %6287 = vmatmul.mubr.msk.f32.gmra.mrb[24].mxu1 %vm315_vm3, %v297_v8 }
 0x70c   :  { %6289 = vmatprep.mubr.msk.f32.mxu1 %vm315_vm3, %v298_v9 }
 0x70f   :  { %6290 = vmatmul.mubr.msk.f32.gmra.mrb[26].mxu1 %vm315_vm3, %v299_v12 }
 0x710   :  { %6292 = vmatprep.mubr.msk.f32.mxu1 %vm315_vm3, %v300_v14 }
 0x713   :  { %6293 = vmatmul.mubr.msk.f32.gmra.mrb[28].mxu1 %vm315_vm3, %v301_v17 }
 0x714   :  { %6295 = vmatprep.mubr.msk.f32.mxu1 %vm315_vm3, %v302_v19 }
 0x717   :  { %6296 = vmatmul.mubr.msk.f32.gmra.mrb[30].mxu1 %vm315_vm3, %v303_v20 }
 0x718   :  { %6298 = vmatprep.mubr.msk.f32.mxu1 %vm315_vm3, %v304_v21 }
 0x71b   :  { %6299 = vmatmul.mubr.msk.f32.gmra.mrb[32].mxu1 %vm315_vm3, %v305_v22 }
 0x71c   :  { %6301 = vmatprep.mubr.msk.f32.mxu1 %vm315_vm3, %v306_v23 }
 0x71f   :  { %6302 = vmatmul.mubr.msk.f32.gmra.mrb[34].mxu1 %vm315_vm3, %v307_v24 }
 0x720   :  { %6304 = vmatprep.mubr.msk.f32.mxu1 %vm315_vm3, %v308_v25 }
 0x723   :  { %6305 = vmatmul.mubr.msk.f32.gmra.mrb[36].mxu1 %vm315_vm3, %v309_v26 }
 0x7ba   :  { %v7923_v27 = vpop.f32.mrb[6].mxu1 }
 0x7bb   :  { %v7925_v28 = vpop.f32.mrb[7].mxu1  ;;  %v1233_v33 = vsel %vm1231_vm5, %v7923_v27, -inf }
 0x7bc   :  { %v1232_v37 = vsel %vm1231_vm5, %v7925_v28, -inf }
 0x7be   :  { %v7927_v30 = vpop.f32.mrb[8].mxu1 }
 0x7bf   :  { %v7929_v31 = vpop.f32.mrb[9].mxu1  ;;  %v1235_v42 = vsel %vm1231_vm5, %v7927_v30, -inf }
 0x7c0   :  { %v1234_v45 = vsel %vm1231_vm5, %v7929_v31, -inf }
 0x7c2   :  { %v7931_v32 = vpop.f32.mrb[10].mxu1 }
 0x7c3   :  { %v1238_v34 = vsel %vm1231_vm5, %v7931_v32, -inf  ;;  %v7937_v35 = vpop.f32.mrb[11].mxu1 }
 0x7c4   :  { %v1239_v38 = vmax.f32 %v1233_v33, %v1238_v34  ;;  %v1236_v39 = vsel %vm1231_vm5, %v7937_v35, -inf  ;;  %v6317_v34 = vpop.f32.mrb[6].mxu0 }
 0x7c5   :  { %v1237_v40 = vmax.f32 %v1232_v37, %v1236_v39 }
 0x7c6   :  { %v7943_v41 = vpop.f32.mrb[12].mxu1 }
 0x7c7   :  { %v1242_v43 = vsel %vm1231_vm5, %v7943_v41, -inf  ;;  %v7949_v44 = vpop.f32.mrb[13].mxu1 }
 0x7c8   :  { %v1243_v46 = vmax.f32 %v1235_v42, %v1242_v43  ;;  %v1240_v47 = vsel %vm1231_vm5, %v7949_v44, -inf }
 0x7c9   :  { %v1241_v48 = vmax.f32 %v1234_v45, %v1240_v47 }
 0x7ca   :  { %v7955_v49 = vpop.f32.mrb[14].mxu1 }
 0x7cb   :  { %v1246_v50 = vsel %vm1231_vm5, %v7955_v49, -inf  ;;  %v7959_v51 = vpop.f32.mrb[15].mxu1 }
 0x7cc   :  { %v1247_v52 = vmax.f32 %v1239_v38, %v1246_v50  ;;  %v1244_v53 = vsel %vm1231_vm5, %v7959_v51, -inf  ;;  %v1072_v38 = vpop.f32.mrb[7].mxu0 }
 0x7cd   :  { %v1245_v54 = vmax.f32 %v1237_v40, %v1244_v53  ;;  %v6320_v40 = vpop.f32.mrb[8].mxu0 }
 0x7ce   :  { %v7963_v55 = vpop.f32.mrb[16].mxu1  ;;  %v1082_v45 = vpop.f32.mrb[9].mxu0 }
 0x7cf   :  { %v1250_v56 = vsel %vm1231_vm5, %v7963_v55, -inf  ;;  %v7967_v57 = vpop.f32.mrb[17].mxu1 }
 0x7d0   :  { %v1251_v58 = vmax.f32 %v1243_v46, %v1250_v56  ;;  %v1248_v59 = vsel %vm1231_vm5, %v7967_v57, -inf }
 0x7d1   :  { %v1249_v60 = vmax.f32 %v1241_v48, %v1248_v59  ;;  %v6323_v48 = vpop.f32.mrb[10].mxu0  ;;  %v8031_v59 = vld [vmem:[%s8014_s25] ss:$0 sm:$0xff] }
 0x7d2   :  { %v7971_v61 = vpop.f32.mrb[18].mxu1 }
 0x7d3   :  { %v1254_v62 = vsel %vm1231_vm5, %v7971_v61, -inf  ;;  %v7975_v63 = vpop.f32.mrb[19].mxu1 }
 0x7d4   :  { %v1255_v2 = vmax.f32 %v1247_v52, %v1254_v62  ;;  %v1252_v3 = vsel %vm1231_vm5, %v7975_v63, -inf  ;;  %v1092_v52 = vpop.f32.mrb[11].mxu0 }
 0x7d5   :  { %v1253_v4 = vmax.f32 %v1245_v54, %v1252_v3  ;;  %v6326_v54 = vpop.f32.mrb[12].mxu0  ;;  %v8036_v3 = vadd.f32 %v6317_v34, %v8031_v59 }
 0x7d6   :  { %v7979_v5 = vpop.f32.mrb[20].mxu1 }
 0x7d7   :  { %v1258_v6 = vsel %vm1231_vm5, %v7979_v5, -inf  ;;  %v7983_v7 = vpop.f32.mrb[21].mxu1 }
 0x7d8   :  { %v1259_v8 = vmax.f32 %v1251_v58, %v1258_v6  ;;  %v1256_v9 = vsel %vm1231_vm5, %v7983_v7, -inf }
 0x7d9   :  { %v1257_v10 = vmax.f32 %v1249_v60, %v1256_v9  ;;  %v1102_v60 = vpop.f32.mrb[13].mxu0  ;;  %v8042_v9 = vadd.f32 %v6320_v40, %v8031_v59 }
 0x7da   :  { %v7987_v11 = vpop.f32.mrb[22].mxu1  ;;  %v6329_v6 = vpop.f32.mrb[14].mxu0 }
 0x7db   :  { %v1262_v12 = vsel %vm1231_vm5, %v7987_v11, -inf  ;;  %v7991_v13 = vpop.f32.mrb[23].mxu1  ;;  %v8070_v34 = vadd.f32 %v6329_v6, %v8031_v59 }
 0x7dc   :  { %v1263_v14 = vmax.f32 %v1255_v2, %v1262_v12  ;;  %v1260_v15 = vsel %vm1231_vm5, %v7991_v13, -inf  ;;  %v8048_v12 = vadd.f32 %v6323_v48, %v8031_v59 }
 0x7dd   :  { %v1261_v16 = vmax.f32 %v1253_v4, %v1260_v15  ;;  %v8039_v4 = vadd.f32 %v8031_v59, %v1072_v38 }
 0x7de   :  { %v7995_v17 = vpop.f32.mrb[24].mxu1 }
 0x7df   :  { %v1266_v18 = vsel %vm1231_vm5, %v7995_v17, -inf  ;;  %v7999_v19 = vpop.f32.mrb[25].mxu1 }
 0x7e0   :  { %v1267_v20 = vmax.f32 %v1259_v8, %v1266_v18  ;;  %v1264_v21 = vsel %vm1231_vm5, %v7999_v19, -inf  ;;  %v8055_v18 = vadd.f32 %v8031_v59, %v1092_v52 }
 0x7e1   :  { %v1265_v22 = vmax.f32 %v1257_v10, %v1264_v21  ;;  %v8045_v10 = vadd.f32 %v8031_v59, %v1082_v45  ;;  %v8061_v21 = vadd.f32 %v8031_v59, %v1102_v60 }
 0x7e2   :  { %v8003_v23 = vpop.f32.mrb[26].mxu1 }
 0x7e3   :  { %v1270_v24 = vsel %vm1231_vm5, %v8003_v23, -inf  ;;  %v8007_v25 = vpop.f32.mrb[27].mxu1 }
 0x7e4   :  { %v1271_v26 = vmax.f32 %v1263_v14, %v1270_v24  ;;  %v1268_v33 = vsel %vm1231_vm5, %v8007_v25, -inf  ;;  %v1112_v14 = vpop.f32.mrb[15].mxu0 }
 0x7e5   :  { %v1269_v37 = vmax.f32 %v1261_v16, %v1268_v33  ;;  %v6890_v16 = vpack.c.bf16 %v8036_v3, %v8039_v4 }
 0x7e6   :  { %v8016_v39 = vpop.f32.mrb[28].mxu1 }
 0x7e7   :  { %v1274_v42 = vsel %vm1231_vm5, %v8016_v39, -inf  ;;  %v8020_v43 = vpop.f32.mrb[29].mxu1 }
 0x7e8   :  { %v1275_v46 = vmax.f32 %v1267_v20, %v1274_v42  ;;  %v1272_v47 = vsel %vm1231_vm5, %v8020_v43, -inf  ;;  %v8058_v20 = vadd.f32 %v6326_v54, %v8031_v59 }
 0x7e9   :  { %v1273_v50 = vmax.f32 %v1265_v22, %v1272_v47  ;;  %v6332_v22 = vpop.f32.mrb[16].mxu0 }
 0x7ea   :  { %v8024_v53 = vpop.f32.mrb[30].mxu1  ;;  %v1122_v38 = vpop.f32.mrb[17].mxu0 }
 0x7eb   :  { %v1278_v56 = vsel %vm1231_vm5, %v8024_v53, -inf  ;;  %v8028_v58 = vpop.f32.mrb[31].mxu1  ;;  %v6335_v48 = vpop.f32.mrb[18].mxu0  ;;  %v8087_v60 = vadd.f32 %v8031_v59, %v1122_v38 }
 0x7ec   :  { %v1279_v62 = vmax.f32 %v1271_v26, %v1278_v56  ;;  %v1276_v2 = vsel %vm1231_vm5, %v8028_v58, -inf  ;;  %v8084_v56 = vadd.f32 %v6332_v22, %v8031_v59  ;;  %v8092_v3 = vadd.f32 %v6335_v48, %v8031_v59 }
 0x7ed   :  { %v1277_v8 = vmax.f32 %v1269_v37, %v1276_v2  ;;  %v8073_v37 = vadd.f32 %v8031_v59, %v1112_v14 }
 0x7ee   :  { %v8050_v15 = vpop.f32.mrb[32].mxu1  ;;  %9895 = vst [vmem:[#allocation4_spill] sm:$0xff] %v8092_v3 }
 0x7ef   :  { %v1282_v24 = vsel %vm1231_vm5, %v8050_v15, -inf  ;;  %v8065_v26 = vpop.f32.mrb[33].mxu1 }
 0x7f0   :  { %v1283_v40 = vmax.f32 %v1275_v46, %v1282_v24  ;;  %v1280_v42 = vsel %vm1231_vm5, %v8065_v26, -inf  ;;  %v1132_v46 = vpop.f32.mrb[19].mxu0 }
 0x7f1   :  { %v1281_v52 = vmax.f32 %v1273_v50, %v1280_v42  ;;  %v8095_v4 = vadd.f32 %v8031_v59, %v1132_v46  ;;  %v6338_v6 = vpop.f32.mrb[20].mxu0 }
 0x7f2   :  { %v8089_v2 = vpop.f32.mrb[34].mxu1  ;;  %v8104_v24 = vadd.f32 %v6338_v6, %v8031_v59  ;;  %v1142_v38 = vpop.f32.mrb[21].mxu0 }
 0x7f3   :  { %9896 = vst [vmem:[#allocation5_spill] sm:$0xff] %v8095_v4  ;;  %v1286_v50 = vsel %vm1231_vm5, %v8089_v2, -inf  ;;  %v8099_v14 = vpop.f32.mrb[35].mxu1  ;;  %v8111_v1 = vadd.f32 %v8031_v59, %v1142_v38  ;;  %v6341_v0 = vpop.f32.mrb[22].mxu0 }
 0x7f4   :  { %9897 = vst [vmem:[#allocation6_spill] sm:$0xff] %v8104_v24  ;;  %v1287_v42 = vmax.f32 %v1279_v62, %v1286_v50  ;;  %v1284_v48 = vsel %vm1231_vm5, %v8099_v14, -inf  ;;  %v1158_v47 = vadd.f32 %v6341_v0, %v8031_v59  ;;  %v1152_v45 = vpop.f32.mrb[23].mxu0 }
 0x7f5   :  { %9898 = vst [vmem:[#allocation7_spill] sm:$0xff] %v8111_v1  ;;  %v1285_v54 = vmax.f32 %v1277_v8, %v1284_v48  ;;  %v1153_v62 = vadd.f32 %v8031_v59, %v1152_v45  ;;  %v6344_v50 = vpop.f32.mrb[24].mxu0 }
 0x7f6   :  { %v8114_v22 = vpop.f32.mrb[36].mxu1  ;;  %v1168_v38 = vadd.f32 %v6344_v50, %v8031_v59  ;;  %v1162_v8 = vpop.f32.mrb[25].mxu0 }
 0x7f7   :  { %9899 = vst [vmem:[#allocation8_spill] sm:$0xff] %v8114_v22  ;;  %v1292_v33 = vmax.f32 %v1285_v54, %v1287_v42  ;;  %v1290_v46 = vsel %vm1231_vm5, %v8114_v22, -inf  ;;  %v8121_v36 = vpop.f32.mrb[37].mxu1  ;;  %v6888_v29 = vpack.c.bf16 %v1158_v47, %v1153_v62  ;;  %v1163_v4 = vadd.f32 %v8031_v59, %v1162_v8  ;;  %v6347_v6 = vpop.f32.mrb[26].mxu0 }
 0x7f8   :  { %v1291_v48 = vmax.f32 %v1283_v40, %v1290_v46  ;;  %v1288_v0 = vsel %vm1231_vm5, %v8121_v36, -inf  ;;  %v1178_v45 = vadd.f32 %v6347_v6, %v8031_v59  ;;  %v1172_v54 = vpop.f32.mrb[27].mxu0 }
 0x7f9   :  { %v1289_v1 = vmax.f32 %v1281_v52, %v1288_v0  ;;  %v6892_v42 = vpack.c.bf16 %v1168_v38, %v1163_v4  ;;  %6889 = vmatprep.subr.bf16.mxu1 %v6888_v29  ;;  %v1173_v24 = vadd.f32 %v8031_v59, %v1172_v54  ;;  %v6350_v3 = vpop.f32.mrb[28].mxu0 }
 0x7fa   :  { %6891 = vmatpush3.bf16.msra.mxu1 %v6890_v16  ;;  %v1188_v40 = vadd.f32 %v6350_v3, %v8031_v59  ;;  %v1182_v46 = vpop.f32.mrb[29].mxu0 }
 0x7fb   :  { %v1293_v22 = vmax.f32 %v1289_v1, %v1291_v48  ;;  %v6896_v50 = vpack.c.bf16 %v1178_v45, %v1173_v24  ;;  %6893 = vmatprep.subr.bf16.mxu1 %v6892_v42  ;;  %v1183_v47 = vadd.f32 %v8031_v59, %v1182_v46  ;;  %v6353_v62 = vpop.f32.mrb[30].mxu0  ;;  %v9900_v1 = vpack.c.bf16 %v8042_v9, %v8045_v10 }
 0x7fc   :  { %v1198_v52 = vadd.f32 %v6353_v62, %v8031_v59  ;;  %v1192_v6 = vpop.f32.mrb[31].mxu0  ;;  %v9901_v9 = vpack.c.bf16 %v8048_v12, %v8055_v18 }
 0x7fd   :  { %v1294_v8 = vmax.f32 %v1292_v33, %v1293_v22  ;;  %v6900_v0 = vpack.c.bf16 %v1188_v40, %v1183_v47  ;;  %v1193_v29 = vadd.f32 %v8031_v59, %v1192_v6  ;;  %v6356_v4 = vpop.f32.mrb[32].mxu0 }
 0x7fe   :  { %6895 = vmatpush3.bf16.msra.mxu1 %v9900_v1  ;;  %v1208_v16 = vadd.f32 %v6356_v4, %v8031_v59  ;;  %v1202_v3 = vpop.f32.mrb[33].mxu0  ;;  %v9902_v4 = vpack.c.bf16 %v8058_v20, %v8061_v21  ;;  %v9903_v1 = vpack.c.bf16 %v8070_v34, %v8073_v37 }
 0x7ff   :  { %v1295_v38 = vrot.slane %v1294_v8, 4  ;;  %6897 = vmatprep.subr.bf16.mxu1 %v6896_v50  ;;  %v6904_v24 = vpack.c.bf16 %v1198_v52, %v1193_v29  ;;  %v1203_v48 = vadd.f32 %v8031_v59, %v1202_v3  ;;  %v6359_v33 = vpop.f32.mrb[34].mxu0 }
 0x800   :  { %v1218_v45 = vadd.f32 %v6359_v33, %v8031_v59  ;;  %v1212_v54 = vpop.f32.mrb[35].mxu0 }
 0x801   :  { %v1296_v22 = vmax.f32 %v1294_v8, %v1295_v38  ;;  %v6908_v42 = vpack.c.bf16 %v1208_v16, %v1203_v48  ;;  %v1213_v40 = vadd.f32 %v8031_v59, %v1212_v54  ;;  %v6362_v46 = vpop.f32.mrb[36].mxu0  ;;  %v9905_v48 = vld [vmem:[#allocation8_spill] sm:$0xff] }
 0x802   :  { %6899 = vmatpush3.bf16.msra.mxu1 %v9901_v9  ;;  %v1228_v10 = vadd.f32 %v6362_v46, %v8031_v59  ;;  %v1222_v50 = vpop.f32.mrb[37].mxu0 }
 0x803   :  { %v1297_v47 = vrot.slane %v1296_v22, 2  ;;  %6901 = vmatprep.subr.bf16.mxu1 %v6900_v0  ;;  %v6912_v62 = vpack.c.bf16 %v1218_v45, %v1213_v40  ;;  %v1223_v52 = vadd.f32 %v8031_v59, %v1222_v50  ;;  %v9907_v40 = vld [vmem:[#allocation5_spill] sm:$0xff] }
 0x805   :  { %v1298_v8 = vmax.f32 %v1296_v22, %v1297_v47  ;;  %v6916_v6 = vpack.c.bf16 %v1228_v10, %v1223_v52  ;;  %v9910_v52 = vld [vmem:[#allocation7_spill] sm:$0xff] }
 0x806   :  { %6903 = vmatpush3.bf16.msra.mxu1 %v9902_v4  ;;  %v9912_v4 = vmov 0.0|0.0  }
 0x807   :  { %v1299_v29 = vrot.slane %v1298_v8, 1  ;;  %6905 = vmatprep.subr.bf16.mxu1 %v6904_v24 }
 0x809   :  { %v8148_v38 = vmax.f32 %v1298_v8, %v1299_v29 }
 0x80a   :  { %6907 = vmatpush3.bf16.msra.mxu1 %v9903_v1 }
 0x80b   :  { %v1301_v12 = vsub.f32 %v7925_v28, %v8148_v38  ;;  %v1302_v18 = vsub.f32 %v7923_v27, %v8148_v38  ;;  %v1303_v0 = vsub.f32 %v7929_v31, %v8148_v38  ;;  %v1304_v59 = vsub.f32 %v7927_v30, %v8148_v38  ;;  %6909 = vmatprep.subr.bf16.mxu1 %v6908_v42  ;;  %v9906_v42 = vld [vmem:[#allocation4_spill] sm:$0xff] }
 0x80c   :  { %v1305_v20 = vsub.f32 %v7937_v35, %v8148_v38  ;;  %v1306_v21 = vsub.f32 %v7931_v32, %v8148_v38  ;;  %v1307_v28 = vsub.f32 %v7949_v44, %v8148_v38  ;;  %v1308_v27 = vsub.f32 %v7943_v41, %v8148_v38 }
 0x80d   :  { %v1309_v30 = vsub.f32 %v7959_v51, %v8148_v38  ;;  %v1310_v31 = vsub.f32 %v7955_v49, %v8148_v38  ;;  %v1311_v34 = vsub.f32 %v7967_v57, %v8148_v38  ;;  %v1312_v35 = vsub.f32 %v7963_v55, %v8148_v38 }
 0x80e   :  { %v1313_v32 = vsub.f32 %v7975_v63, %v8148_v38  ;;  %v1314_v44 = vsub.f32 %v7971_v61, %v8148_v38  ;;  %v1315_v41 = vsub.f32 %v7983_v7, %v8148_v38  ;;  %v1316_v51 = vsub.f32 %v7979_v5, %v8148_v38 }
 0x80f   :  { %v1317_v49 = vsub.f32 %v7991_v13, %v8148_v38  ;;  %v1318_v57 = vsub.f32 %v7987_v11, %v8148_v38  ;;  %v1319_v55 = vsub.f32 %v7999_v19, %v8148_v38  ;;  %v1320_v63 = vsub.f32 %v7995_v17, %v8148_v38 }
 0x810   :  { %v9904_v61 = vpack.c.bf16 %v8084_v56, %v8087_v60  ;;  %v1321_v7 = vsub.f32 %v8007_v25, %v8148_v38  ;;  %v1322_v5 = vsub.f32 %v8003_v23, %v8148_v38  ;;  %v1323_v13 = vsub.f32 %v8020_v43, %v8148_v38 }
 0x811   :  { %v1324_v11 = vsub.f32 %v8016_v39, %v8148_v38  ;;  %v1325_v19 = vsub.f32 %v8028_v58, %v8148_v38  ;;  %v1326_v37 = vsub.f32 %v8024_v53, %v8148_v38  ;;  %v1327_v56 = vsub.f32 %v8065_v26, %v8148_v38 }
 0x812   :  { %6911 = vmatpush3.bf16.msra.mxu1 %v9904_v61  ;;  %v1328_v60 = vsub.f32 %v8050_v15, %v8148_v38  ;;  %v1329_v16 = vsub.f32 %v8099_v14, %v8148_v38  ;;  %v1330_v3 = vsub.f32 %v8089_v2, %v8148_v38  ;;  %v1331_v24 = vsub.f32 %v8121_v36, %v8148_v38 }
 0x813   :  { %6913 = vmatprep.subr.bf16.mxu1 %v6912_v62  ;;  %v1332_v33 = vsub.f32 %v9905_v48, %v8148_v38  ;;  %v1333_v22 = vmul.f32 1.442695, %v1301_v12  ;;  %v1335_v45 = vmul.f32 1.442695, %v1302_v18  ;;  %v1337_v54 = vmul.f32 1.442695, %v1303_v0 }
 0x814   :  { %v9908_v46 = vpack.c.bf16 %v9906_v42, %v9907_v40  ;;  %v1339_v47 = vmul.f32 1.442695, %v1304_v59  ;;  %v1341_v9 = vmul.f32 1.442695, %v1305_v20  ;;  %v1343_v10 = vmul.f32 1.442695, %v1306_v21 }
 0x815   :  { %7293 = vpow2.f32 %v1333_v22  ;;  %v1345_v50 = vmul.f32 1.442695, %v1307_v28  ;;  %v9909_v62 = vld [vmem:[#allocation6_spill] sm:$0xff]  ;;  %v1347_v29 = vmul.f32 1.442695, %v1308_v27 }
 0x816   :  { %6915 = vmatpush3.bf16.msra.mxu1 %v9908_v46  ;;  %7295 = vpow2.f32 %v1335_v45  ;;  %v9911_v8 = vpack.c.bf16 %v9909_v62, %v9910_v52  ;;  %v1349_v12 = vmul.f32 1.442695, %v1309_v30  ;;  %v1351_v18 = vmul.f32 1.442695, %v1310_v31 }
 0x817   :  { %6917 = vmatprep.subr.bf16.mxu1 %v6916_v6  ;;  %7297 = vpow2.f32 %v1337_v54  ;;  %v1353_v6 = vmul.f32 1.442695, %v1311_v34  ;;  %v1355_v0 = vmul.f32 1.442695, %v1312_v35  ;;  %v1357_v59 = vmul.f32 1.442695, %v1313_v32 }
 0x818   :  { %7299 = vpow2.f32 %v1339_v47  ;;  %v1359_v1 = vmul.f32 1.442695, %v1314_v44  ;;  %v1361_v21 = vmul.f32 1.442695, %v1315_v41  ;;  %v1363_v27 = vmul.f32 1.442695, %v1316_v51 }
 0x819   :  { %7301 = vpow2.f32 %v1341_v9  ;;  %v1365_v34 = vmul.f32 1.442695, %v1317_v49  ;;  %v1367_v44 = vmul.f32 1.442695, %v1318_v57  ;;  %v1369_v22 = vmul.f32 1.442695, %v1319_v55 }
 0x81a   :  { %6919 = vmatpush3.bf16.msra.mxu1 %v9911_v8  ;;  %7303 = vpow2.f32 %v1343_v10  ;;  %v1371_v49 = vmul.f32 1.442695, %v1320_v63  ;;  %v1373_v57 = vmul.f32 1.442695, %v1321_v7  ;;  %v1375_v46 = vmul.f32 1.442695, %v1322_v5 }
 0x81b   :  { %6920 = vmatprep.subr.bf16.mxu1 %v9912_v4  ;;  %7305 = vpow2.f32 %v1345_v50  ;;  %v1377_v47 = vmul.f32 1.442695, %v1323_v13  ;;  %v1379_v9 = vmul.f32 1.442695, %v1324_v11  ;;  %v1381_v10 = vmul.f32 1.442695, %v1325_v19 }
 0x81c   :  { %7307 = vpow2.f32 %v1347_v29  ;;  %v1383_v50 = vmul.f32 1.442695, %v1326_v37  ;;  %v1385_v62 = vmul.f32 1.442695, %v1327_v56  ;;  %v1387_v52 = vmul.f32 1.442695, %v1328_v60 }
 0x81d   :  { %7309 = vpow2.f32 %v1349_v12  ;;  %v1389_v8 = vmul.f32 1.442695, %v1329_v16  ;;  %v1391_v29 = vmul.f32 1.442695, %v1330_v3  ;;  %v1393_v12 = vmul.f32 1.442695, %v1331_v24 }
 0x81e   :  { %7311 = vpow2.f32 %v1351_v18  ;;  %v1395_v18 = vmul.f32 1.442695, %v1332_v33 }
 0x81f   :  { %v8227_v20 = vpop.eup %7293  ;;  %7313 = vpow2.f32 %v1353_v6 }
 0x820   :  { %v8229_v28 = vpop.eup %7295  ;;  %7315 = vpow2.f32 %v1355_v0  ;;  %v1397_v30 = vsel %vm1231_vm5, %v8227_v20, 0.0 }
 0x821   :  { %v8233_v31 = vpop.eup %7297  ;;  %7317 = vpow2.f32 %v1357_v59  ;;  %v1398_v35 = vsel %vm1231_vm5, %v8229_v28, 0.0 }
 0x822   :  { %v8237_v32 = vpop.eup %7299  ;;  %7319 = vpow2.f32 %v1359_v1  ;;  %v1399_v61 = vadd.f32 %v1398_v35, %v1397_v30  ;;  %v1400_v51 = vsel %vm1231_vm5, %v8233_v31, 0.0 }
 0x823   :  { %v8239_v41 = vpop.eup %7301  ;;  %7321 = vpow2.f32 %v1361_v21  ;;  %v1402_v55 = vsel %vm1231_vm5, %v8237_v32, 0.0 }
 0x824   :  { %v8243_v45 = vpop.eup %7303  ;;  %7323 = vpow2.f32 %v1363_v27  ;;  %v1401_v54 = vadd.f32 %v1400_v51, %v1399_v61  ;;  %v1404_v25 = vsel %vm1231_vm5, %v8239_v41, 0.0 }
 0x825   :  { %v8248_v42 = vpop.eup %7305  ;;  %7325 = vpow2.f32 %v1365_v34  ;;  %v1406_v43 = vsel %vm1231_vm5, %v8243_v45, 0.0 }
 0x826   :  { %v8255_v40 = vpop.eup %7307  ;;  %7327 = vpow2.f32 %v1367_v44  ;;  %v1403_v17 = vadd.f32 %v1402_v55, %v1401_v54  ;;  %v1408_v58 = vsel %vm1231_vm5, %v8248_v42, 0.0 }
 0x827   :  { %v8260_v63 = vpop.eup %7309  ;;  %7329 = vpow2.f32 %v1369_v22  ;;  %v1410_v26 = vsel %vm1231_vm5, %v8255_v40, 0.0 }
 0x828   :  { %v8267_v7 = vpop.eup %7311  ;;  %7331 = vpow2.f32 %v1371_v49  ;;  %v1405_v23 = vadd.f32 %v1404_v25, %v1403_v17  ;;  %v1412_v14 = vsel %vm1231_vm5, %v8260_v63, 0.0 }
 0x829   :  { %v8272_v5 = vpop.eup %7313  ;;  %7333 = vpow2.f32 %v1373_v57  ;;  %v1414_v0 = vsel %vm1231_vm5, %v8267_v7, 0.0 }
 0x82a   :  { %v8279_v13 = vpop.eup %7315  ;;  %7335 = vpow2.f32 %v1375_v46  ;;  %v1407_v39 = vadd.f32 %v1406_v43, %v1405_v23  ;;  %v1416_v38 = vsel %vm1231_vm5, %v8272_v5, 0.0 }
 0x82b   :  { %v8284_v11 = vpop.eup %7317  ;;  %7337 = vpow2.f32 %v1377_v47 }
 0x82c   :  { %v8291_v19 = vpop.eup %7319  ;;  %7339 = vpow2.f32 %v1379_v9  ;;  %v1409_v53 = vadd.f32 %v1408_v58, %v1407_v39 }
 0x82d   :  { %v8296_v37 = vpop.eup %7321  ;;  %7341 = vpow2.f32 %v1381_v10  ;;  %v1422_v57 = vsel %vm1231_vm5, %v8291_v19, 0.0 }
 0x82e   :  { %v8303_v56 = vpop.eup %7323  ;;  %7343 = vpow2.f32 %v1383_v50  ;;  %v1411_v15 = vadd.f32 %v1410_v26, %v1409_v53  ;;  %v1424_v47 = vsel %vm1231_vm5, %v8296_v37, 0.0 }
 0x82f   :  { %v7326_v60 = vpop.eup %7325  ;;  %7345 = vpow2.f32 %v1385_v62  ;;  %v1426_v10 = vsel %vm1231_vm5, %v8303_v56, 0.0 }
 0x830   :  { %v7328_v16 = vpop.eup %7327  ;;  %7347 = vpow2.f32 %v1387_v52  ;;  %v1413_v6 = vadd.f32 %v1412_v14, %v1411_v15  ;;  %v7178_v2 = vpack.i.bf16 %v8227_v20, %v7326_v60  ;;  %v1428_v39 = vsel %vm1231_vm5, %v7326_v60, 0.0 }
 0x831   :  { %v7330_v3 = vpop.eup %7329  ;;  %7349 = vpow2.f32 %v1389_v8  ;;  %v7180_v36 = vpack.i.bf16 %v8229_v28, %v7328_v16  ;;  %v1418_v28 = vsel %vm1231_vm5, %v8279_v13, 0.0  ;;  %v1430_v58 = vsel %vm1231_vm5, %v7328_v16, 0.0 }
 0x832   :  { %v7332_v24 = vpop.eup %7331  ;;  %7351 = vpow2.f32 %v1391_v29  ;;  %v1415_v59 = vadd.f32 %v1414_v0, %v1413_v6  ;;  %7179 = vxpose.xlu0.b32.start [1/16] (narrow) %v7178_v2, 8  ;;  %v7182_v1 = vpack.i.bf16 %v8233_v31, %v7330_v3 }
 0x833   :  { %v7334_v21 = vpop.eup %7333  ;;  %7353 = vpow2.f32 %v1393_v12  ;;  %v7184_v48 = vpack.i.bf16 %v8237_v32, %v7332_v24  ;;  %v1420_v32 = vsel %vm1231_vm5, %v8284_v11, 0.0  ;;  %v1434_v8 = vsel %vm1231_vm5, %v7332_v24, 0.0 }
 0x834   :  { %v7336_v33 = vpop.eup %7335  ;;  %7355 = vpow2.f32 %v1395_v18  ;;  %v1417_v20 = vadd.f32 %v1416_v38, %v1415_v59  ;;  %v7186_v27 = vpack.i.bf16 %v8239_v41, %v7334_v21  ;;  %v1436_v26 = vsel %vm1231_vm5, %v7334_v21, 0.0 }
 0x835   :  { %v7338_v30 = vpop.eup %7337  ;;  %v7188_v34 = vpack.i.bf16 %v8243_v45, %v7336_v33 }
 0x836   :  { %v7340_v35 = vpop.eup %7339  ;;  %v1419_v31 = vadd.f32 %v1418_v28, %v1417_v20  ;;  %7181 = vxpose.xlu0.b32.cont [2/16] (narrow) %v7180_v36, 8  ;;  %v7190_v44 = vpack.i.bf16 %v8248_v42, %v7338_v30 }
 0x837   :  { %v7342_v61 = vpop.eup %7341  ;;  %v7192_v22 = vpack.i.bf16 %v8255_v40, %v7340_v35  ;;  %v1442_v12 = vsel %vm1231_vm5, %v7340_v35, 0.0 }
 0x838   :  { %v7344_v51 = vpop.eup %7343  ;;  %v1421_v49 = vadd.f32 %v1420_v32, %v1419_v31  ;;  %v7194_v41 = vpack.i.bf16 %v8260_v63, %v7342_v61  ;;  %v1444_v16 = vsel %vm1231_vm5, %v7342_v61, 0.0  ;;  %v9913_v61 = vmov 0.0  }
 0x839   :  { %v7346_v54 = vpop.eup %7345  ;;  %v7196_v45 = vpack.i.bf16 %v8267_v7, %v7344_v51  ;;  %v1446_v6 = vsel %vm1231_vm5, %v7344_v51, 0.0 }
 0x83a   :  { %v7348_v55 = vpop.eup %7347  ;;  %v1423_v46 = vadd.f32 %v1422_v57, %v1421_v49  ;;  %7183 = vxpose.xlu0.b32.cont [3/16] (narrow) %v7182_v1, 8  ;;  %v7198_v42 = vpack.i.bf16 %v8272_v5, %v7346_v54  ;;  %v1683_v49 = vld [vmem:[%s8370_s1] sm:$0xff] }
 0x83b   :  { %v7350_v17 = vpop.eup %7349  ;;  %v7200_v40 = vpack.i.bf16 %v8279_v13, %v7348_v55  ;;  %v1450_v36 = vsel %vm1231_vm5, %v7348_v55, 0.0 }
 0x83c   :  { %v7352_v25 = vpop.eup %7351  ;;  %v1425_v9 = vadd.f32 %v1424_v47, %v1423_v46  ;;  %v7202_v63 = vpack.i.bf16 %v8284_v11, %v7350_v17  ;;  %v1432_v11 = vsel %vm1231_vm5, %v7330_v3, 0.0  ;;  %v1448_v3 = vsel %vm1231_vm5, %v7346_v54, 0.0  ;;  %v1685_v54 = vld [vmem:[%s8370_s1 + $0x10] sm:$0xff] }
 0x83d   :  { %v7354_v23 = vpop.eup %7353  ;;  %v7204_v7 = vpack.i.bf16 %v8291_v19, %v7352_v25  ;;  %v1452_v59 = vsel %vm1231_vm5, %v7350_v17, 0.0  ;;  %v1454_v21 = vsel %vm1231_vm5, %v7352_v25, 0.0  ;;  %v8379_v25 = vld [vmem:[%s7746_s8] sm:$0xff] }
 0x83e   :  { %v7356_v43 = vpop.eup %7355  ;;  %v1427_v50 = vadd.f32 %v1426_v10, %v1425_v9  ;;  %7185 = vxpose.xlu0.b32.cont [4/16] (narrow) %v7184_v48, 8  ;;  %v7206_v5 = vpack.i.bf16 %v8296_v37, %v7354_v23  ;;  %v1438_v37 = vsel %vm1231_vm5, %v7336_v33, 0.0  ;;  %v1456_v48 = vsel %vm1231_vm5, %v7354_v23, 0.0 }
 0x83f   :  { %v7208_v62 = vpack.i.bf16 %v8303_v56, %v7356_v43  ;;  %v1440_v56 = vsel %vm1231_vm5, %v7338_v30, 0.0  ;;  %v1458_v20 = vsel %vm1231_vm5, %v7356_v43, 0.0 }
 0x840   :  { %v1429_v13 = vadd.f32 %v1428_v39, %v1427_v50 }
 0x842   :  { %v1431_v52 = vadd.f32 %v1430_v58, %v1429_v13  ;;  %7187 = vxpose.xlu0.b32.cont [5/16] (narrow) %v7186_v27, 8  ;;  %v1687_v13 = vld [vmem:[%s8389_s6] sm:$0x1] }
 0x844   :  { %v1433_v53 = vadd.f32 %v1432_v11, %v1431_v52 }
 0x846   :  { %v1435_v19 = vadd.f32 %v1434_v8, %v1433_v53  ;;  %7189 = vxpose.xlu0.b32.cont [6/16] (narrow) %v7188_v34, 8  ;;  %v9914_v53 = vld [vmem:[#allocation2_spill] sm:$0xff] }
 0x848   :  { %v1437_v29 = vadd.f32 %v1436_v26, %v1435_v19 }
 0x84a   :  { %v1439_v15 = vadd.f32 %v1438_v37, %v1437_v29  ;;  %7191 = vxpose.xlu0.b32.cont [7/16] (narrow) %v7190_v44, 8 }
 0x84c   :  { %v1441_v60 = vadd.f32 %v1440_v56, %v1439_v15 }
 0x84e   :  { %v1443_v14 = vadd.f32 %v1442_v12, %v1441_v60  ;;  %7193 = vxpose.xlu0.b32.cont [8/16] (narrow) %v7192_v22, 8  ;;  %v1779_v60 = vld [vmem:[%s8398_s14] sm:$0xff]  ;;  %v1780_v12 = vld [vmem:[%s8398_s14 + $0x8] sm:$0xff] }
 0x850   :  { %v1445_v18 = vadd.f32 %v1444_v16, %v1443_v14  ;;  %v1781_v14 = vld [vmem:[%s8398_s14 + $0x10] sm:$0xff]  ;;  %v6927_v16 = vpack.c.bf16 %v1780_v12, %v1779_v60  ;;  %v5466_v12 = vld [vmem:[%s7674_s29 + $0x38] sm:$0xff] }
 0x851   :  { %v5465_v60 = vld [vmem:[%s7674_s29 + $0x30] sm:$0xff] }
 0x852   :  { %v1447_v2 = vadd.f32 %v1446_v6, %v1445_v18  ;;  %7195 = vxpose.xlu0.b32.cont [9/16] (narrow) %v7194_v41, 8  ;;  %v1684_v41 = vld [vmem:[%s8370_s1 + $0x8] sm:$0xff]  ;;  %v1782_v18 = vld [vmem:[%s8398_s14 + $0x18] sm:$0xff] }
 0x853   :  { %v6921_v57 = vpack.c.bf16 %v1684_v41, %v1683_v49  ;;  %v6930_v6 = vpack.c.bf16 %v1782_v18, %v1781_v14  ;;  %v6954_v14 = vpack.c.bf16 %v5466_v12, %v5465_v60  ;;  %v8571_v60 = vld [vmem:[%s7764_s13 + $0x58] sm:$0xff]  ;;  %v7520_v12 = vld [vmem:[%s7764_s13 + $0x60] sm:$0xff] }
 0x854   :  { %v1449_v0 = vadd.f32 %v1448_v3, %v1447_v2  ;;  %v1858_v2 = vld [vmem:[%s8406_s22] sm:$0xff]  ;;  %v1859_v3 = vld [vmem:[%s8406_s22 + $0x8] sm:$0xff] }
 0x856   :  { %v1451_v24 = vadd.f32 %v1450_v36, %v1449_v0  ;;  %7197 = vxpose.xlu0.b32.cont [10/16] (narrow) %v7196_v45, 8  ;;  %v1686_v45 = vld [vmem:[%s8370_s1 + $0x18] sm:$0xff]  ;;  %v1860_v0 = vld [vmem:[%s8406_s22 + $0x10] sm:$0xff]  ;;  %v6933_v36 = vpack.c.bf16 %v1859_v3, %v1858_v2  ;;  %v5467_v3 = vld [vmem:[%s7700_s11 + $0x1] sm:$0x1] }
 0x857   :  { %v6924_v55 = vpack.c.bf16 %v1686_v45, %v1685_v54  ;;  %v1866_v45 = vld [vmem:[%s8450_s27] sm:$0x1] }
 0x858   :  { %v1453_v1 = vadd.f32 %v1452_v59, %v1451_v24  ;;  %v1861_v24 = vld [vmem:[%s8406_s22 + $0x18] sm:$0xff] }
 0x859   :  { %v6936_v59 = vpack.c.bf16 %v1861_v24, %v1860_v0 }
 0x85a   :  { %v1455_v38 = vadd.f32 %v1454_v21, %v1453_v1  ;;  %7199 = vxpose.xlu0.b32.cont [11/16] (narrow) %v7198_v42, 8  ;;  %v1862_v1 = vld [vmem:[%s8406_s22 + $0x20] sm:$0xff]  ;;  %v1863_v21 = vld [vmem:[%s8406_s22 + $0x28] sm:$0xff] }
 0x85c   :  { %v1457_v33 = vadd.f32 %v1456_v48, %v1455_v38  ;;  %v6939_v38 = vpack.c.bf16 %v1863_v21, %v1862_v1 }
 0x85e   :  { %v1459_v27 = vadd.f32 %v1458_v20, %v1457_v33  ;;  %7201 = vxpose.xlu0.b32.cont [12/16] (narrow) %v7200_v40, 8 }
 0x860   :  { %v1460_v30 = vrot.slane %v1459_v27, 4 }
 0x862   :  { %v1461_v28 = vadd.f32 %v1460_v30, %v1459_v27  ;;  %7203 = vxpose.xlu0.b32.cont [13/16] (narrow) %v7202_v63, 8  ;;  %v1762_v30 = vld [vmem:[%s8423_s30] sm:$0x1] }
 0x864   :  { %v1462_v34 = vrot.slane %v1461_v28, 2 }
 0x866   :  { %7205 = vxpose.xlu0.b32.cont [14/16] (narrow) %v7204_v7, 8  ;;  %v1463_v35 = vadd.f32 %v1462_v34, %v1461_v28  ;;  %v1763_v34 = vld [vmem:[%s8428_s9] sm:$0x1] }
 0x868   :  { %v1464_v31 = vrot.slane %v1463_v35, 1 }
 0x86a   :  { %7207 = vxpose.xlu0.b32.cont [15/16] (narrow) %v7206_v5, 8  ;;  %v1465_v44 = vadd.f32 %v1464_v31, %v1463_v35 }
 0x86c   :  { %6366 = vmatmul.mubr.msk.f32.vlgmr.msra.gmra.mrb[38].mxu0 %vm1231_vm5, %v1465_v44  ;;  %v1864_v44 = vld [vmem:[%s8406_s22 + $0x30] sm:$0xff] }
 0x86d   :  { %6387 = vmatprep.mubr.msk.f32.mxu0 %vm7576_vm0, %v9913_v61  ;;  %6928 = vmatpush3.bf16.msra.mxu0 %v6927_v16  ;;  %v5461_v16 = vld [vmem:[%s7691_s7 + $0x1] sm:$0x1] }
 0x86e   :  { %7209 = vxpose.xlu0.b32.end [16/16] (narrow) %v7208_v62, 8  ;;  %6929 = vmatprep.subr.bf16.mxu0 %v9912_v4 }
 0x871   :  { %6931 = vmatpush3.bf16.msra.mxu0 %v6930_v6 }
 0x872   :  { %6944 = vmatprep.subr.bf16.mxu0 %v9912_v4 }
 0x8b2   :  { %v7210_v32 = vpop.trf.xlu0 }
 0x8b3   :  { %v7214_v22 = vunpack.i.h.bf16 %v7210_v32  ;;  %v7211_v51 = vunpack.i.l.bf16 %v7210_v32  ;;  %v1865_v32 = vld [vmem:[%s8406_s22 + $0x38] sm:$0xff] }
 0x8b5   :  { %1594 = vmatprep.mubr.f32.mxu1 %v7211_v51  ;;  %v1783_v51 = vld [vmem:[%s8441_s18] sm:$0x1] }
 0x8b6   :  { %1595 = vmatmul.mubr.f32.vlgmr.msra.gmra.mrb[38].mxu1 %v7214_v22  ;;  %v6942_v22 = vpack.c.bf16 %v1865_v32, %v1864_v44 }
 0x8b7   :  { %6376 = vmatprep.mubr.msk.f32.mxu1 %vm7576_vm0, %v9913_v61  ;;  %6922 = vmatpush3.bf16.msra.mxu1 %v6921_v57 }
 0x8b8   :  { %6923 = vmatprep.subr.bf16.mxu1 %v9912_v4 }
 0x8bb   :  { %6925 = vmatpush3.bf16.msra.mxu1 %v6924_v55 }
 0x8bc   :  { %6932 = vmatprep.subr.bf16.mxu1 %v9912_v4 }
 0x93f   :  { %v1669_v46 = vpop.f32.mrb[38].mxu0 }
 0x940   :  { %v6367_v42 = vpop.f32.mrb[39].mxu0  ;;  %7357 = vrcp.f32 %v1669_v46 }
 0x94a   :  { %v7358_v39 = vpop.eup %7357 }
 0x989   :  { %v5850_v17 = vpop.f32.mrb[38].mxu1 }
 0x98a   :  { %v5851_v47 = vpop.f32.mrb[39].mxu1 }
 0x98b   :  { %v5852_v40 = vadd.f32 %v5851_v47, %v5850_v17 }
 0x98d   :  { %v1674_v9 = vmul.f32 %v8379_v25, %v5852_v40 }
 0x98f   :  { %v1675_v63 = vsel %vm315_vm3, %v1674_v9, 0.0 }
 0x990   :  { %v1676_v23 = vrot.slane %v1675_v63, 4 }
 0x992   :  { %v1677_v10 = vadd.f32 %v1676_v23, %v1675_v63 }
 0x994   :  { %v1678_v7 = vrot.slane %v1677_v10, 2 }
 0x996   :  { %v1679_v43 = vadd.f32 %v1678_v7, %v1677_v10  ;;  %v5457_v7 = vld [vmem:[%s7656_s17 + $0x20] sm:$0xff] }
 0x998   :  { %v1680_v50 = vrot.slane %v1679_v43, 1 }
 0x99a   :  { %v1681_v5 = vadd.f32 %v1680_v50, %v1679_v43  ;;  %v5458_v43 = vld [vmem:[%s7656_s17 + $0x28] sm:$0xff]  ;;  %v5459_v50 = vld [vmem:[%s7656_s17 + $0x30] sm:$0xff] }
 0x99c   :  { %v1682_v62 = vmul.f32 %v7358_v39, %v1681_v5  ;;  %v6945_v5 = vpack.c.bf16 %v5458_v43, %v5457_v7  ;;  %v5460_v39 = vld [vmem:[%s7656_s17 + $0x38] sm:$0xff]  ;;  %v5478_v7 = vld [vmem:[%s7734_s28 + $0x28] sm:$0xff]  ;;  %v5479_v43 = vld [vmem:[%s7734_s28 + $0x30] sm:$0xff] }
 0x99e   :  { %6377 = vmatmul.mubr.msk.f32.vlgmr.msra.gmra.mrb[40].mxu1 %vm315_vm3, %v1682_v62  ;;  %v6948_v62 = vpack.c.bf16 %v5460_v39, %v5459_v50  ;;  %v5480_v50 = vld [vmem:[%s7734_s28 + $0x38] sm:$0xff]  ;;  %v5519_v39 = vld [vmem:[%s7772_s19 + $0x28] sm:$0xff] }
 0x99f   :  { %6406 = vmatprep.mubr.msk.f32.mxu1 %vm7576_vm0, %v9913_v61  ;;  %6934 = vmatpush3.bf16.msra.mxu1 %v6933_v36 }
 0x9a0   :  { %6935 = vmatprep.subr.bf16.mxu1 %v9912_v4 }
 0x9a3   :  { %6937 = vmatpush3.bf16.msra.mxu1 %v6936_v59 }
 0x9a4   :  { %6938 = vmatprep.subr.bf16.mxu1 %v9912_v4 }
 0x9a7   :  { %6940 = vmatpush3.bf16.msra.mxu1 %v6939_v38 }
 0x9a8   :  { %6941 = vmatprep.subr.bf16.mxu1 %v9912_v4 }
 0x9ab   :  { %6943 = vmatpush3.bf16.msra.mxu1 %v6942_v22 }
 0x9ac   :  { %6956 = vmatprep.subr.bf16.mxu1 %v9912_v4 }
 0xa71   :  { %v1757_v58 = vpop.f32.mrb[40].mxu1 }
 0xa72   :  { %v1758_v52 = vadd.f32 %v1757_v58, %v1687_v13  ;;  %v6378_v11 = vpop.f32.mrb[41].mxu1 }
 0xa74   :  { %v1761_v8 = vadd.f32 %v1758_v52, %v9914_v53  ;;  %v1942_v53 = vld [vmem:[%s8464_s10] sm:$0x1] }
 0xa76   :  { %v1764_v19 = vsel %vm470_vm4, %v1761_v8, 0.0 }
 0xa77   :  { %1765 = vadd.xlane.f32.xlu1 %v1764_v19  ;;  %v5463_v19 = vld [vmem:[%s7674_s29 + $0x20] sm:$0xff] }
 0xb04   :  { %v1766_v26 = vpop.xlane.xlu1 %1765 }
 0xb05   :  { %v1767_v29 = vmul.f32 0.03125, %v1766_v26  ;;  %v5464_v26 = vld [vmem:[%s7674_s29 + $0x28] sm:$0xff] }
 0xb07   :  { %v1768_v37 = vsub.f32 %v1761_v8, %v1767_v29  ;;  %v1943_v29 = vld [vmem:[%s8469_s23] sm:$0x1] }
 0xb09   :  { %v1769_v15 = vmul.f32 %v1768_v37, %v1768_v37 }
 0xb0b   :  { %v1770_v56 = vsel %vm470_vm4, %v1769_v15, 0.0  ;;  %v6951_v15 = vpack.c.bf16 %v5464_v26, %v5463_v19  ;;  %v8536_v19 = vld [vmem:[%s7764_s13 + $0x20] sm:$0xff]  ;;  %v8541_v26 = vld [vmem:[%s7764_s13 + $0x28] sm:$0xff] }
 0xb0c   :  { %1771 = vadd.xlane.f32.xlu1 %v1770_v56 }
 0xb99   :  { %v1772_v48 = vpop.xlane.xlu1 %1771 }
 0xb9a   :  { %v1773_v33 = vmul.f32 0.03125, %v1772_v48 }
 0xb9c   :  { %v1774_v20 = vadd.f32 1e-05, %v1773_v33 }
 0xb9e   :  { %7359 = vrsqrt.f32 %v1774_v20 }
 0xba8   :  { %v7360_v27 = vpop.eup %7359 }
 0xba9   :  { %v1776_v28 = vmul.f32 %v7360_v27, %v1768_v37  ;;  %v5471_v27 = vld [vmem:[%s7708_s15 + $0x20] sm:$0xff] }
 0xbab   :  { %v1777_v35 = vmul.f32 %v1776_v28, %v1762_v30  ;;  %v5472_v30 = vld [vmem:[%s7708_s15 + $0x28] sm:$0xff]  ;;  %v5473_v28 = vld [vmem:[%s7708_s15 + $0x30] sm:$0xff] }
 0xbad   :  { %v1778_v31 = vadd.f32 %v1777_v35, %v1763_v34  ;;  %v6957_v34 = vpack.c.bf16 %v5472_v30, %v5471_v27  ;;  %v5474_v35 = vld [vmem:[%s7708_s15 + $0x38] sm:$0xff]  ;;  %v7534_v30 = vld [vmem:[%s7764_s13 + $0xd0] sm:$0xff] }
 0xbaf   :  { %6388 = vmatmul.mubr.msk.f32.vlgmr.msra.gmra.mrb[40].mxu0 %vm315_vm3, %v1778_v31 }
 0xbb0   :  { %6417 = vmatprep.mubr.msk.f32.mxu0 %vm7576_vm0, %v9913_v61  ;;  %6946 = vmatpush3.bf16.msra.mxu0 %v6945_v5  ;;  %v5518_v5 = vld [vmem:[%s7772_s19 + $0x20] sm:$0xff] }
 0xbb1   :  { %6947 = vmatprep.subr.bf16.mxu0 %v9912_v4 }
 0xbb4   :  { %6949 = vmatpush3.bf16.msra.mxu0 %v6948_v62  ;;  %v5520_v62 = vld [vmem:[%s7772_s19 + $0x30] sm:$0xff] }
 0xbb5   :  { %6950 = vmatprep.subr.bf16.mxu0 %v9912_v4 }
 0xc82   :  { %v1853_v49 = vpop.f32.mrb[40].mxu0 }
 0xc83   :  { %v1854_v41 = vadd.f32 %v1853_v49, %v1783_v51  ;;  %v6389_v54 = vpop.f32.mrb[41].mxu0  ;;  %v5469_v49 = vld [vmem:[%s7718_s20 + $0x1] sm:$0x1] }
 0xc84   :  { %v5470_v54 = vld [vmem:[%s7723_s24 + $0x1] sm:$0x1] }
 0xc85   :  { %v1857_v57 = vmax.f32 %v1854_v41, 0.0 }
 0xc87   :  { %6407 = vmatmul.mubr.msk.f32.vlgmr.msra.gmra.mrb[42].mxu1 %vm1867_vm6, %v1857_v57 }
 0xc88   :  { %6439 = vmatprep.mubr.msk.f32.mxu1 %vm7576_vm0, %v9913_v61  ;;  %6958 = vmatpush3.bf16.msra.mxu1 %v6957_v34 }
 0xc89   :  { %6959 = vmatprep.subr.bf16.mxu1 %v9912_v4 }
 0xd5a   :  { %v1937_v55 = vpop.f32.mrb[42].mxu1 }
 0xd5b   :  { %v1938_v46 = vadd.f32 %v1937_v55, %v1866_v45  ;;  %v6408_v42 = vpop.f32.mrb[43].mxu1  ;;  %v7508_v55 = vld [vmem:[%s7764_s13] sm:$0xff] }
 0xd5c   :  { %v5475_v42 = vld [vmem:[%s7741_s3 + $0x1] sm:$0x1] }
 0xd5d   :  { %v1941_v17 = vadd.f32 %v1938_v46, %v1778_v31  ;;  %v6960_v31 = vpack.c.bf16 %v5474_v35, %v5473_v28  ;;  %v5477_v46 = vld [vmem:[%s7734_s28 + $0x20] sm:$0xff]  ;;  %v7535_v35 = vld [vmem:[%s7764_s13 + $0xd8] sm:$0xff] }
 0xd5f   :  { %v1944_v47 = vsel %vm470_vm4, %v1941_v17, 0.0  ;;  %6961 = vmatpush3.bf16.msra.mxu1 %v6960_v31  ;;  %v7536_v31 = vld [vmem:[%s7764_s13 + $0xe0] sm:$0xff] }
 0xd60   :  { %1945 = vadd.xlane.f32.xlu1 %v1944_v47 }
 0xded   :  { %v1946_v40 = vpop.xlane.xlu1 %1945 }
 0xdee   :  { %v1947_v9 = vmul.f32 0.03125, %v1946_v40 }
 0xdf0   :  { %v1948_v63 = vsub.f32 %v1941_v17, %v1947_v9 }
 0xdf2   :  { %v1949_v23 = vmul.f32 %v1948_v63, %v1948_v63 }
 0xdf4   :  { %v1950_v10 = vsel %vm470_vm4, %v1949_v23, 0.0 }
 0xdf5   :  { %1951 = vadd.xlane.f32.xlu1 %v1950_v10 }
 0xe82   :  { %v1952_v13 = vpop.xlane.xlu1 %1951 }
 0xe83   :  { %v1953_v58 = vmul.f32 0.03125, %v1952_v13  ;;  %v6970_v13 = vpack.c.bf16 %v5519_v39, %v5518_v5 }
 0xe85   :  { %v1954_v52 = vadd.f32 1e-05, %v1953_v58  ;;  %v5521_v58 = vld [vmem:[%s7772_s19 + $0x38] sm:$0xff]  ;;  %6971 = vmatprep.subr.bf16.mxu1 %v6970_v13 }
 0xe87   :  { %7361 = vrsqrt.f32 %v1954_v52  ;;  %v6974_v52 = vpack.c.bf16 %v5521_v58, %v5520_v62 }
 0xe91   :  { %v7362_v11 = vpop.eup %7361 }
 0xe92   :  { %v1956_v8 = vmul.f32 %v7362_v11, %v1948_v63  ;;  %v9916_v63 = vld [vmem:[#allocation3_spill] sm:$0xff] }
 0xe93   :  { %v8519_v11 = vld [vmem:[%s7764_s13 + $0x8] sm:$0xff] }
 0xe94   :  { %v1957_v37 = vmul.f32 %v1956_v8, %v1942_v53  ;;  %v8524_v53 = vld [vmem:[%s7764_s13 + $0x10] sm:$0xff]  ;;  %v8531_v8 = vld [vmem:[%s7764_s13 + $0x18] sm:$0xff] }
 0xe96   :  { %v1958_v56 = vadd.f32 %v1957_v37, %v1943_v29  ;;  %v8551_v29 = vld [vmem:[%s7764_s13 + $0x38] sm:$0xff]  ;;  %v8556_v37 = vld [vmem:[%s7764_s13 + $0x40] sm:$0xff] }
 0xe98   :  { %6418 = vmatmul.mubr.msk.f32.vlgmr.msra.gmra.mrb[42].mxu0 %vm315_vm3, %v1958_v56 }
 0xe99   :  { %6952 = vmatpush3.bf16.msra.mxu0 %v6951_v15  ;;  %6428 = vmatprep.mubr.msk.f32.mxu0 %vm7576_vm0, %v9913_v61  ;;  %v8561_v15 = vld [vmem:[%s7764_s13 + $0x48] sm:$0xff] }
 0xe9a   :  { %6953 = vmatprep.subr.bf16.mxu0 %v9912_v4 }
 0xe9d   :  { %6955 = vmatpush3.bf16.msra.mxu0 %v6954_v14  ;;  %v7521_v14 = vld [vmem:[%s7764_s13 + $0x68] sm:$0xff] }
 0xf6b   :  { %v2035_v18 = vpop.f32.mrb[42].mxu0 }
 0xf6c   :  { %v2036_v6 = vadd.f32 %v5461_v16, %v2035_v18  ;;  %v6419_v2 = vpop.f32.mrb[43].mxu0  ;;  %v7522_v16 = vld [vmem:[%s7764_s13 + $0x70] sm:$0xff]  ;;  %v7523_v18 = vld [vmem:[%s7764_s13 + $0x78] sm:$0xff] }
 0xf6d   :  { %v7525_v2 = vld [vmem:[%s7764_s13 + $0x88] sm:$0xff] }
 0xf6e   :  { %6429 = vmatmul.mubr.msk.f32.vlgmr.msra.gmra.mrb[44].mxu0 %vm315_vm3, %v2036_v6  ;;  %v7524_v6 = vld [vmem:[%s7764_s13 + $0x80] sm:$0xff] }
 0xf6f   :  { %6444 = vmatprep.mubr.msk.f32.mxu0 %vm315_vm3, %v5477_v46 }
0x1041   :  { %v2115_v0 = vpop.f32.mrb[44].mxu0 }
0x1042   :  { %v2116_v36 = vadd.f32 %v5467_v3, %v2115_v0  ;;  %v6430_v24 = vpop.f32.mrb[45].mxu0  ;;  %v7526_v3 = vld [vmem:[%s7764_s13 + $0x90] sm:$0xff]  ;;  %v7527_v0 = vld [vmem:[%s7764_s13 + $0x98] sm:$0xff] }
0x1043   :  { %v7529_v24 = vld [vmem:[%s7764_s13 + $0xa8] sm:$0xff] }
0x1044   :  { %v2119_v59 = vadd.f32 %v2116_v36, %v1958_v56  ;;  %v8566_v56 = vld [vmem:[%s7764_s13 + $0x50] sm:$0xff]  ;;  %v7528_v36 = vld [vmem:[%s7764_s13 + $0xa0] sm:$0xff] }
0x1046   :  { %v2124_v1 = vsel %vm470_vm4, %v2119_v59, 0.0 }
0x1047   :  { %2125 = vadd.xlane.f32.xlu1 %v2124_v1  ;;  %v7531_v1 = vld [vmem:[%s7764_s13 + $0xb8] sm:$0xff] }
0x10d4   :  { %v2126_v21 = vpop.xlane.xlu1 %2125 }
0x10d5   :  { %v2127_v38 = vmul.f32 0.03125, %v2126_v21 }
0x10d7   :  { %v2128_v48 = vsub.f32 %v2119_v59, %v2127_v38  ;;  %v7530_v59 = vld [vmem:[%s7764_s13 + $0xb0] sm:$0xff]  ;;  %v7532_v38 = vld [vmem:[%s7764_s13 + $0xc0] sm:$0xff] }
0x10d9   :  { %v2129_v33 = vmul.f32 %v2128_v48, %v2128_v48 }
0x10db   :  { %v2130_v20 = vsel %vm470_vm4, %v2129_v33, 0.0 }
0x10dc   :  { %2131 = vadd.xlane.f32.xlu1 %v2130_v20  ;;  %v7533_v20 = vld [vmem:[%s7764_s13 + $0xc8] sm:$0xff] }
0x1169   :  { %v2132_v44 = vpop.xlane.xlu1 %2131 }
0x116a   :  { %v2133_v32 = vmul.f32 0.03125, %v2132_v44  ;;  %v7537_v44 = vld [vmem:[%s7764_s13 + $0xe8] sm:$0xff] }
0x116c   :  { %v2134_v22 = vadd.f32 1e-05, %v2133_v32  ;;  %v7538_v32 = vld [vmem:[%s7764_s13 + $0xf0] sm:$0xff] }
0x116e   :  { %7363 = vrsqrt.f32 %v2134_v22  ;;  %v7539_v22 = vld [vmem:[%s7764_s13 + $0xf8] sm:$0xff] }
0x1178   :  { %v7364_v51 = vpop.eup %7363 }
0x1179   :  { %v2136_v41 = vmul.f32 %v7364_v51, %v2128_v48 }
0x117b   :  { %v2137_v57 = vmul.f32 %v5469_v49, %v2136_v41 }
0x117d   :  { %v8493_v45 = vadd.f32 %v5470_v54, %v2137_v57 }
0x117f   :  { %9915 = vst [vmem:[#allocation8_spill] sm:$0xff] %v8493_v45  ;;  %6440 = vmatmul.mubr.msk.f32.vlgmr.msra.gmra.mrb[44].mxu1 %vm315_vm3, %v8493_v45 }
0x1180   :  { %6514 = vmatprep.mubr.msk.f32.mxu1 %vm315_vm3, %v7508_v55  ;;  %6973 = vmatpush3.bf16.msra.mxu1 %v6970_v13 }
0x1181   :  { %6975 = vmatprep.subr.bf16.mxu1 %v6974_v52 }
0x1184   :  { %6977 = vmatpush3.bf16.msra.mxu1 %v6974_v52 }
0x1185   :  { %6562 = vmatprep.subr.mxu1 %v9913_v61 }
0x1187   :  { %6515 = vmatmul.mubr.msk.f32.vlgmr.msra.gmra.mrb[46].mxu1 %vm315_vm3, %v8519_v11 }
0x1188   :  { %6517 = vmatprep.mubr.msk.f32.mxu1 %vm315_vm3, %v8524_v53  ;;  %6563 = vmatpush3.msra.mxu1 %v8379_v25 }
0x1189   :  { %7016 = vmatprep.subr.bf16.mxu1 %v9912_v4 }
0x118b   :  { %6518 = vmatmul.mubr.msk.f32.gmra.mrb[48].mxu1 %vm315_vm3, %v8531_v8 }
0x118c   :  { %6520 = vmatprep.mubr.msk.f32.mxu1 %vm315_vm3, %v8536_v19 }
0x118f   :  { %6521 = vmatmul.mubr.msk.f32.gmra.mrb[50].mxu1 %vm315_vm3, %v8541_v26 }
0x1252   :  { %v2215_v17 = vpop.f32.mrb[44].mxu1 }
0x1253   :  { %v2216_v47 = vadd.f32 %v5475_v42, %v2215_v17  ;;  %v6441_v40 = vpop.f32.mrb[45].mxu1 }
0x1255   :  { %v2219_v9 = vmul.f32 0.5, %v2216_v47 }
0x1257   :  { %v2223_v23 = vrot.slane %v2219_v9, %v9916_v63 }
0x1259   :  { %v2224_v10 = vmul.f32 %v8379_v25, %v2223_v23  ;;  %v8546_v25 = vld [vmem:[%s7764_s13 + $0x30] sm:$0xff] }
0x125a   :  { %6523 = vmatprep.mubr.msk.f32.mxu1 %vm315_vm3, %v8546_v25 }
0x125b   :  { %6442 = vmatprep.subr.msk.mxu0 %vm315_vm3, %v2224_v10  ;;  %6524 = vmatmul.mubr.msk.f32.gmra.mrb[52].mxu1 %vm315_vm3, %v8551_v29 }
0x125c   :  { %6443 = vmatpush3.xpose.msk.msra.mxu0 %vm315_vm3, %v2224_v10  ;;  %6526 = vmatprep.mubr.msk.f32.mxu1 %vm315_vm3, %v8556_v37 }
0x125f   :  { %6445 = vmatmul.mubr.msk.f32.vlgmr.msra.gmra.mrb[46].mxu0 %vm315_vm3, %v5478_v7  ;;  %6527 = vmatmul.mubr.msk.f32.gmra.mrb[54].mxu1 %vm315_vm3, %v8561_v15 }
0x1260   :  { %6447 = vmatprep.mubr.msk.f32.mxu0 %vm315_vm3, %v5479_v43  ;;  %6529 = vmatprep.mubr.msk.f32.mxu1 %vm315_vm3, %v8566_v56 }
0x1263   :  { %6448 = vmatmul.mubr.msk.f32.gmra.mrb[48].mxu0 %vm315_vm3, %v5480_v50  ;;  %6530 = vmatmul.mubr.msk.f32.gmra.mrb[56].mxu1 %vm315_vm3, %v8571_v60 }
0x1264   :  { %6458 = vmatprep.mubr.msk.f32.mxu0 %vm315_vm3, %v7508_v55  ;;  %6532 = vmatprep.mubr.msk.f32.mxu1 %vm315_vm3, %v7520_v12 }
0x1267   :  { %6533 = vmatmul.mubr.msk.f32.gmra.mrb[58].mxu1 %vm315_vm3, %v7521_v14 }
0x1268   :  { %6535 = vmatprep.mubr.msk.f32.mxu1 %vm315_vm3, %v7522_v16 }
0x126b   :  { %6536 = vmatmul.mubr.msk.f32.gmra.mrb[60].mxu1 %vm315_vm3, %v7523_v18 }
0x126c   :  { %6538 = vmatprep.mubr.msk.f32.mxu1 %vm315_vm3, %v7524_v6 }
0x126f   :  { %6539 = vmatmul.mubr.msk.f32.gmra.mrb[62].mxu1 %vm315_vm3, %v7525_v2 }
0x1270   :  { %6541 = vmatprep.mubr.msk.f32.mxu1 %vm315_vm3, %v7526_v3 }
0x1273   :  { %6542 = vmatmul.mubr.msk.f32.gmra.mrb[64].mxu1 %vm315_vm3, %v7527_v0 }
0x1274   :  { %6544 = vmatprep.mubr.msk.f32.mxu1 %vm315_vm3, %v7528_v36 }
0x1277   :  { %6545 = vmatmul.mubr.msk.f32.gmra.mrb[66].mxu1 %vm315_vm3, %v7529_v24 }
0x1278   :  { %6547 = vmatprep.mubr.msk.f32.mxu1 %vm315_vm3, %v7530_v59 }
0x127b   :  { %6548 = vmatmul.mubr.msk.f32.gmra.mrb[68].mxu1 %vm315_vm3, %v7531_v1 }
0x127c   :  { %6550 = vmatprep.mubr.msk.f32.mxu1 %vm315_vm3, %v7532_v38 }
0x127f   :  { %6551 = vmatmul.mubr.msk.f32.gmra.mrb[70].mxu1 %vm315_vm3, %v7533_v20 }
0x1280   :  { %6553 = vmatprep.mubr.msk.f32.mxu1 %vm315_vm3, %v7534_v30 }
0x1283   :  { %6554 = vmatmul.mubr.msk.f32.gmra.mrb[72].mxu1 %vm315_vm3, %v7535_v35 }
0x1284   :  { %6556 = vmatprep.mubr.msk.f32.mxu1 %vm315_vm3, %v7536_v31 }
0x1287   :  { %6557 = vmatmul.mubr.msk.f32.gmra.mrb[74].mxu1 %vm315_vm3, %v7537_v44 }
0x1288   :  { %6559 = vmatprep.mubr.msk.f32.mxu1 %vm315_vm3, %v7538_v32 }
0x128b   :  { %6560 = vmatmul.mubr.msk.f32.gmra.mrb[76].mxu1 %vm315_vm3, %v7539_v22 }
0x128c   :  { %6564 = vmatprep.mubr.msk.f32.mxu1 %vm7576_vm0, %v9913_v61 }
0x1332   :  { %v6446_v21 = vpop.f32.mrb[46].mxu0 }
0x1333   :  { %v2311_v48 = vpop.f32.mrb[47].mxu0 }
0x1334   :  { %v6962_v33 = vpack.c.bf16 %v6446_v21, %v2311_v48 }
0x1336   :  { %v6449_v27 = vpop.f32.mrb[48].mxu0  ;;  %6963 = vmatprep.subr.bf16.mxu0 %v6962_v33 }
0x1337   :  { %v2321_v28 = vpop.f32.mrb[49].mxu0  ;;  %6965 = vmatpush3.bf16.msra.mxu0 %v6962_v33 }
0x1338   :  { %v6966_v34 = vpack.c.bf16 %v6449_v27, %v2321_v28 }
0x133a   :  { %6967 = vmatprep.subr.bf16.mxu0 %v6966_v34 }
0x133b   :  { %6969 = vmatpush3.bf16.msra.mxu0 %v6966_v34 }
0x133e   :  { %6459 = vmatmul.mubr.msk.f32.vlgmr.msra.gmra.mrb[50].mxu0 %vm315_vm3, %v8519_v11 }
0x133f   :  { %6461 = vmatprep.mubr.msk.f32.mxu0 %vm315_vm3, %v8524_v53 }
0x1342   :  { %6462 = vmatmul.mubr.msk.f32.gmra.mrb[52].mxu0 %vm315_vm3, %v8531_v8 }
0x1343   :  { %6464 = vmatprep.mubr.msk.f32.mxu0 %vm315_vm3, %v8536_v19 }
0x1346   :  { %6465 = vmatmul.mubr.msk.f32.gmra.mrb[54].mxu0 %vm315_vm3, %v8541_v26 }
0x1347   :  { %6467 = vmatprep.mubr.msk.f32.mxu0 %vm315_vm3, %v8546_v25 }
0x134a   :  { %6468 = vmatmul.mubr.msk.f32.gmra.mrb[56].mxu0 %vm315_vm3, %v8551_v29 }
0x134b   :  { %6470 = vmatprep.mubr.msk.f32.mxu0 %vm315_vm3, %v8556_v37 }
0x134e   :  { %6471 = vmatmul.mubr.msk.f32.gmra.mrb[58].mxu0 %vm315_vm3, %v8561_v15 }
0x134f   :  { %6473 = vmatprep.mubr.msk.f32.mxu0 %vm315_vm3, %v8566_v56 }
0x1352   :  { %6474 = vmatmul.mubr.msk.f32.gmra.mrb[60].mxu0 %vm315_vm3, %v8571_v60 }
0x1353   :  { %6476 = vmatprep.mubr.msk.f32.mxu0 %vm315_vm3, %v7520_v12 }
0x1356   :  { %6477 = vmatmul.mubr.msk.f32.gmra.mrb[62].mxu0 %vm315_vm3, %v7521_v14 }
0x1357   :  { %6479 = vmatprep.mubr.msk.f32.mxu0 %vm315_vm3, %v7522_v16 }
0x135a   :  { %6480 = vmatmul.mubr.msk.f32.gmra.mrb[64].mxu0 %vm315_vm3, %v7523_v18 }
0x135b   :  { %6482 = vmatprep.mubr.msk.f32.mxu0 %vm315_vm3, %v7524_v6 }
0x135e   :  { %6483 = vmatmul.mubr.msk.f32.gmra.mrb[66].mxu0 %vm315_vm3, %v7525_v2 }
0x135f   :  { %6485 = vmatprep.mubr.msk.f32.mxu0 %vm315_vm3, %v7526_v3 }
0x1362   :  { %6486 = vmatmul.mubr.msk.f32.gmra.mrb[68].mxu0 %vm315_vm3, %v7527_v0 }
0x1363   :  { %6488 = vmatprep.mubr.msk.f32.mxu0 %vm315_vm3, %v7528_v36 }
0x1366   :  { %6489 = vmatmul.mubr.msk.f32.gmra.mrb[70].mxu0 %vm315_vm3, %v7529_v24 }
0x1367   :  { %6491 = vmatprep.mubr.msk.f32.mxu0 %vm315_vm3, %v7530_v59 }
0x136a   :  { %6492 = vmatmul.mubr.msk.f32.gmra.mrb[72].mxu0 %vm315_vm3, %v7531_v1 }
0x136b   :  { %6494 = vmatprep.mubr.msk.f32.mxu0 %vm315_vm3, %v7532_v38 }
0x136e   :  { %6495 = vmatmul.mubr.msk.f32.gmra.mrb[74].mxu0 %vm315_vm3, %v7533_v20 }
0x136f   :  { %6497 = vmatprep.mubr.msk.f32.mxu0 %vm315_vm3, %v7534_v30 }
0x1372   :  { %6498 = vmatmul.mubr.msk.f32.gmra.mrb[76].mxu0 %vm315_vm3, %v7535_v35 }
0x1373   :  { %6500 = vmatprep.mubr.msk.f32.mxu0 %vm315_vm3, %v7536_v31 }
0x1376   :  { %6501 = vmatmul.mubr.msk.f32.gmra.mrb[78].mxu0 %vm315_vm3, %v7537_v44 }
0x1377   :  { %6503 = vmatprep.mubr.msk.f32.mxu0 %vm315_vm3, %v7538_v32 }
0x137a   :  { %6504 = vmatmul.mubr.msk.f32.gmra.mrb[80].mxu0 %vm315_vm3, %v7539_v22 }
0x1411   :  { %v8659_v51 = vpop.f32.mrb[50].mxu0 }
0x1412   :  { %v8661_v49 = vpop.f32.mrb[51].mxu0  ;;  %v2794_v55 = vsel %vm1231_vm5, %v8659_v51, -inf }
0x1413   :  { %v2793_v17 = vsel %vm1231_vm5, %v8661_v49, -inf }
0x1415   :  { %v8663_v41 = vpop.f32.mrb[52].mxu0 }
0x1416   :  { %v8665_v54 = vpop.f32.mrb[53].mxu0  ;;  %v2796_v10 = vsel %vm1231_vm5, %v8663_v41, -inf }
0x1417   :  { %v2795_v50 = vsel %vm1231_vm5, %v8665_v54, -inf }
0x1419   :  { %v8667_v57 = vpop.f32.mrb[54].mxu0 }
0x141a   :  { %v2799_v46 = vsel %vm1231_vm5, %v8667_v57, -inf  ;;  %v8673_v42 = vpop.f32.mrb[55].mxu0 }
0x141b   :  { %v2800_v47 = vmax.f32 %v2794_v55, %v2799_v46  ;;  %v2797_v40 = vsel %vm1231_vm5, %v8673_v42, -inf  ;;  %v6516_v46 = vpop.f32.mrb[46].mxu1 }
0x141c   :  { %v2798_v9 = vmax.f32 %v2793_v17, %v2797_v40  ;;  %v8748_v17 = vld [vmem:[%s8014_s25 + $0x1] ss:$0 sm:$0xff] }
0x141d   :  { %v8679_v23 = vpop.f32.mrb[56].mxu0  ;;  %v8751_v40 = vadd.f32 %v6516_v46, %v8748_v17 }
0x141e   :  { %v2803_v7 = vsel %vm1231_vm5, %v8679_v23, -inf  ;;  %v8685_v43 = vpop.f32.mrb[57].mxu0 }
0x141f   :  { %v2804_v5 = vmax.f32 %v2796_v10, %v2803_v7  ;;  %v2801_v39 = vsel %vm1231_vm5, %v8685_v43, -inf }
0x1420   :  { %v2802_v62 = vmax.f32 %v2795_v50, %v2801_v39 }
0x1421   :  { %v8691_v13 = vpop.f32.mrb[58].mxu0 }
0x1422   :  { %v2807_v58 = vsel %vm1231_vm5, %v8691_v13, -inf  ;;  %v8695_v52 = vpop.f32.mrb[59].mxu0 }
0x1423   :  { %v2808_v11 = vmax.f32 %v2800_v47, %v2807_v58  ;;  %v2805_v53 = vsel %vm1231_vm5, %v8695_v52, -inf }
0x1424   :  { %v2806_v8 = vmax.f32 %v2798_v9, %v2805_v53  ;;  %v2634_v9 = vpop.f32.mrb[47].mxu1 }
0x1425   :  { %v8699_v19 = vpop.f32.mrb[60].mxu0  ;;  %v8756_v7 = vadd.f32 %v8748_v17, %v2634_v9  ;;  %v6519_v50 = vpop.f32.mrb[48].mxu1 }
0x1426   :  { %v2811_v26 = vsel %vm1231_vm5, %v8699_v19, -inf  ;;  %v8703_v25 = vpop.f32.mrb[61].mxu0  ;;  %v2644_v58 = vpop.f32.mrb[49].mxu1 }
0x1427   :  { %v2812_v29 = vmax.f32 %v2804_v5, %v2811_v26  ;;  %v2809_v37 = vsel %vm1231_vm5, %v8703_v25, -inf  ;;  %v8770_v26 = vadd.f32 %v8748_v17, %v2644_v58 }
0x1428   :  { %v2810_v15 = vmax.f32 %v2802_v62, %v2809_v37  ;;  %v8763_v62 = vadd.f32 %v6519_v50, %v8748_v17 }
0x1429   :  { %v8707_v56 = vpop.f32.mrb[62].mxu0 }
0x142a   :  { %v2815_v60 = vsel %vm1231_vm5, %v8707_v56, -inf  ;;  %v8711_v12 = vpop.f32.mrb[63].mxu0 }
0x142b   :  { %v2816_v14 = vmax.f32 %v2808_v11, %v2815_v60  ;;  %v2813_v16 = vsel %vm1231_vm5, %v8711_v12, -inf }
0x142c   :  { %v2814_v18 = vmax.f32 %v2806_v8, %v2813_v16 }
0x142d   :  { %v8715_v6 = vpop.f32.mrb[64].mxu0 }
0x142e   :  { %v2819_v2 = vsel %vm1231_vm5, %v8715_v6, -inf  ;;  %v8719_v3 = vpop.f32.mrb[65].mxu0 }
0x142f   :  { %v2820_v0 = vmax.f32 %v2812_v29, %v2819_v2  ;;  %v2817_v36 = vsel %vm1231_vm5, %v8719_v3, -inf  ;;  %v6522_v29 = vpop.f32.mrb[50].mxu1 }
0x1430   :  { %v2818_v24 = vmax.f32 %v2810_v15, %v2817_v36  ;;  %v8773_v15 = vadd.f32 %v6522_v29, %v8748_v17  ;;  %v2654_v60 = vpop.f32.mrb[51].mxu1 }
0x1431   :  { %v8723_v59 = vpop.f32.mrb[66].mxu0  ;;  %v6525_v2 = vpop.f32.mrb[52].mxu1 }
0x1432   :  { %v2823_v1 = vsel %vm1231_vm5, %v8723_v59, -inf  ;;  %v8727_v21 = vpop.f32.mrb[67].mxu0 }
0x1433   :  { %v2824_v38 = vmax.f32 %v2816_v14, %v2823_v1  ;;  %v2821_v48 = vsel %vm1231_vm5, %v8727_v21, -inf  ;;  %v2664_v1 = vpop.f32.mrb[53].mxu1 }
0x1434   :  { %v2822_v33 = vmax.f32 %v2814_v18, %v2821_v48  ;;  %v8780_v18 = vadd.f32 %v8748_v17, %v2654_v60 }
0x1435   :  { %v8731_v20 = vpop.f32.mrb[68].mxu0 }
0x1436   :  { %v2827_v27 = vsel %vm1231_vm5, %v8731_v20, -inf  ;;  %v8735_v30 = vpop.f32.mrb[69].mxu0 }
0x1437   :  { %v2828_v28 = vmax.f32 %v2820_v0, %v2827_v27  ;;  %v2825_v34 = vsel %vm1231_vm5, %v8735_v30, -inf  ;;  %v8794_v27 = vadd.f32 %v8748_v17, %v2664_v1 }
0x1438   :  { %v2826_v35 = vmax.f32 %v2818_v24, %v2825_v34  ;;  %v8787_v24 = vadd.f32 %v6525_v2, %v8748_v17 }
0x1439   :  { %v8739_v31 = vpop.f32.mrb[70].mxu0 }
0x143a   :  { %v2831_v44 = vsel %vm1231_vm5, %v8739_v31, -inf  ;;  %v8743_v32 = vpop.f32.mrb[71].mxu0 }
0x143b   :  { %v2832_v22 = vmax.f32 %v2824_v38, %v2831_v44  ;;  %v2829_v55 = vsel %vm1231_vm5, %v8743_v32, -inf }
0x143c   :  { %v2830_v47 = vmax.f32 %v2822_v33, %v2829_v55 }
0x143d   :  { %v8753_v10 = vpop.f32.mrb[72].mxu0 }
0x143e   :  { %v2835_v5 = vsel %vm1231_vm5, %v8753_v10, -inf  ;;  %v8760_v39 = vpop.f32.mrb[73].mxu0 }
0x143f   :  { %v2836_v11 = vmax.f32 %v2828_v28, %v2835_v5  ;;  %v2833_v53 = vsel %vm1231_vm5, %v8760_v39, -inf  ;;  %v6528_v28 = vpop.f32.mrb[54].mxu1 }
0x1440   :  { %v2834_v37 = vmax.f32 %v2826_v35, %v2833_v53  ;;  %v8797_v35 = vadd.f32 %v6528_v28, %v8748_v17  ;;  %v2674_v44 = vpop.f32.mrb[55].mxu1 }
0x1441   :  { %v8775_v14 = vpop.f32.mrb[74].mxu0  ;;  %v8804_v46 = vadd.f32 %v8748_v17, %v2674_v44  ;;  %v6531_v9 = vpop.f32.mrb[56].mxu1 }
0x1442   :  { %v2839_v0 = vsel %vm1231_vm5, %v8775_v14, -inf  ;;  %v8784_v36 = vpop.f32.mrb[75].mxu0  ;;  %v2684_v58 = vpop.f32.mrb[57].mxu1 }
0x1443   :  { %v2840_v38 = vmax.f32 %v2832_v22, %v2839_v0  ;;  %v2837_v48 = vsel %vm1231_vm5, %v8784_v36, -inf  ;;  %v8818_v2 = vadd.f32 %v8748_v17, %v2684_v58  ;;  %v6534_v0 = vpop.f32.mrb[58].mxu1 }
0x1444   :  { %v2838_v34 = vmax.f32 %v2830_v47, %v2837_v48  ;;  %v8811_v47 = vadd.f32 %v6531_v9, %v8748_v17  ;;  %v8821_v48 = vadd.f32 %v6534_v0, %v8748_v17  ;;  %v2694_v28 = vpop.f32.mrb[59].mxu1 }
0x1445   :  { %v8799_v55 = vpop.f32.mrb[76].mxu0  ;;  %v8828_v9 = vadd.f32 %v8748_v17, %v2694_v28 }
0x1446   :  { %v2843_v50 = vsel %vm1231_vm5, %v8799_v55, -inf  ;;  %v8808_v5 = vpop.f32.mrb[77].mxu0  ;;  %9917 = vst [vmem:[#allocation4_spill] sm:$0xff] %v8821_v48 }
0x1447   :  { %v2844_v53 = vmax.f32 %v2836_v11, %v2843_v50  ;;  %v2841_v29 = vsel %vm1231_vm5, %v8808_v5, -inf  ;;  %9919 = vst [vmem:[#allocation6_spill] sm:$0xff] %v8828_v9  ;;  %v6537_v50 = vpop.f32.mrb[60].mxu1 }
0x1448   :  { %v2842_v1 = vmax.f32 %v2834_v37, %v2841_v29  ;;  %v8835_v37 = vadd.f32 %v6537_v50, %v8748_v17  ;;  %v2704_v29 = vpop.f32.mrb[61].mxu1 }
0x1449   :  { %v8823_v44 = vpop.f32.mrb[78].mxu0  ;;  %v8842_v28 = vadd.f32 %v8748_v17, %v2704_v29  ;;  %v6540_v33 = vpop.f32.mrb[62].mxu1 }
0x144a   :  { %9918 = vst [vmem:[#allocation5_spill] sm:$0xff] %v8823_v44  ;;  %v2847_v60 = vsel %vm1231_vm5, %v8823_v44, -inf  ;;  %v8832_v58 = vpop.f32.mrb[79].mxu0  ;;  %9920 = vst [vmem:[#allocation7_spill] sm:$0xff] %v8835_v37  ;;  %v2720_v8 = vadd.f32 %v6540_v33, %v8748_v17  ;;  %v2714_v63 = vpop.f32.mrb[63].mxu1 }
0x144b   :  { %v2848_v0 = vmax.f32 %v2840_v38, %v2847_v60  ;;  %v2845_v22 = vsel %vm1231_vm5, %v8832_v58, -inf  ;;  %9921 = vst [vmem:[#allocation2_spill] sm:$0xff] %v8842_v28  ;;  %v2715_v38 = vadd.f32 %v8748_v17, %v2714_v63  ;;  %v6543_v60 = vpop.f32.mrb[64].mxu1 }
0x144c   :  { %v2846_v16 = vmax.f32 %v2838_v34, %v2845_v22  ;;  %v2730_v29 = vadd.f32 %v6543_v60, %v8748_v17  ;;  %v2724_v34 = vpop.f32.mrb[65].mxu1 }
0x144d   :  { %v8845_v45 = vpop.f32.mrb[80].mxu0  ;;  %v6978_v9 = vpack.c.bf16 %v2720_v8, %v2715_v38  ;;  %v2725_v48 = vadd.f32 %v8748_v17, %v2724_v34  ;;  %v6546_v50 = vpop.f32.mrb[66].mxu1 }
0x144e   :  { %9922 = vst [vmem:[#allocation9_spill] sm:$0xff] %v8845_v45  ;;  %v2853_v61 = vmax.f32 %v2846_v16, %v2848_v0  ;;  %v2851_v11 = vsel %vm1231_vm5, %v8845_v45, -inf  ;;  %v8852_v4 = vpop.f32.mrb[81].mxu0  ;;  %v2740_v63 = vadd.f32 %v6546_v50, %v8748_v17  ;;  %v2734_v16 = vpop.f32.mrb[67].mxu1 }
0x144f   :  { %v2852_v22 = vmax.f32 %v2844_v53, %v2851_v11  ;;  %v2849_v33 = vsel %vm1231_vm5, %v8852_v4, -inf  ;;  %v6982_v0 = vpack.c.bf16 %v2730_v29, %v2725_v48  ;;  %6979 = vmatprep.subr.bf16.mxu0 %v6978_v9  ;;  %v2735_v37 = vadd.f32 %v8748_v17, %v2734_v16  ;;  %v6549_v45 = vpop.f32.mrb[68].mxu1 }
0x1450   :  { %v2850_v28 = vmax.f32 %v2842_v1, %v2849_v33  ;;  %v9923_v53 = vpack.c.bf16 %v8751_v40, %v8756_v7  ;;  %v2750_v11 = vadd.f32 %v6549_v45, %v8748_v17  ;;  %v2744_v8 = vpop.f32.mrb[69].mxu1  ;;  %v9924_v40 = vpack.c.bf16 %v8763_v62, %v8770_v26 }
0x1451   :  { %v6986_v38 = vpack.c.bf16 %v2740_v63, %v2735_v37  ;;  %v2745_v1 = vadd.f32 %v8748_v17, %v2744_v8  ;;  %v6552_v60 = vpop.f32.mrb[70].mxu1  ;;  %v9925_v62 = vpack.c.bf16 %v8773_v15, %v8780_v18 }
0x1452   :  { %v2854_v44 = vmax.f32 %v2850_v28, %v2852_v22  ;;  %6981 = vmatpush3.bf16.msra.mxu0 %v9923_v53  ;;  %v2760_v48 = vadd.f32 %v6552_v60, %v8748_v17  ;;  %v2754_v9 = vpop.f32.mrb[71].mxu1 }
0x1453   :  { %6983 = vmatprep.subr.bf16.mxu0 %v6982_v0  ;;  %v6990_v29 = vpack.c.bf16 %v2750_v11, %v2745_v1  ;;  %v2755_v34 = vadd.f32 %v8748_v17, %v2754_v9  ;;  %v6555_v28 = vpop.f32.mrb[72].mxu1 }
0x1454   :  { %v2855_v50 = vmax.f32 %v2853_v61, %v2854_v44  ;;  %v2770_v45 = vadd.f32 %v6555_v28, %v8748_v17  ;;  %v2764_v7 = vpop.f32.mrb[73].mxu1 }
0x1455   :  { %v6994_v37 = vpack.c.bf16 %v2760_v48, %v2755_v34  ;;  %v2765_v33 = vadd.f32 %v8748_v17, %v2764_v7  ;;  %v6558_v61 = vpop.f32.mrb[74].mxu1  ;;  %v9926_v34 = vpack.c.bf16 %v8787_v24, %v8794_v27 }
0x1456   :  { %v2856_v22 = vrot.slane %v2855_v50, 4  ;;  %6985 = vmatpush3.bf16.msra.mxu0 %v9924_v40  ;;  %v2780_v63 = vadd.f32 %v6558_v61, %v8748_v17  ;;  %v2774_v16 = vpop.f32.mrb[75].mxu1 }
0x1457   :  { %6987 = vmatprep.subr.bf16.mxu0 %v6986_v38  ;;  %v6998_v0 = vpack.c.bf16 %v2770_v45, %v2765_v33  ;;  %v2775_v53 = vadd.f32 %v8748_v17, %v2774_v16  ;;  %v6561_v11 = vpop.f32.mrb[76].mxu1  ;;  %v9929_v45 = vld [vmem:[#allocation5_spill] sm:$0xff] }
0x1458   :  { %v2857_v44 = vmax.f32 %v2855_v50, %v2856_v22  ;;  %v2790_v26 = vadd.f32 %v6561_v11, %v8748_v17  ;;  %v2784_v38 = vpop.f32.mrb[77].mxu1  ;;  %v9927_v22 = vpack.c.bf16 %v8797_v35, %v8804_v46  ;;  %v9930_v33 = vld [vmem:[#allocation9_spill] sm:$0xff] }
0x1459   :  { %v7002_v1 = vpack.c.bf16 %v2780_v63, %v2775_v53  ;;  %v2785_v60 = vadd.f32 %v8748_v17, %v2784_v38  ;;  %v9932_v53 = vld [vmem:[#allocation6_spill] sm:$0xff] }
0x145a   :  { %v2858_v8 = vrot.slane %v2857_v44, 2  ;;  %6989 = vmatpush3.bf16.msra.mxu0 %v9925_v62 }
0x145b   :  { %6991 = vmatprep.subr.bf16.mxu0 %v6990_v29  ;;  %v7006_v48 = vpack.c.bf16 %v2790_v26, %v2785_v60  ;;  %v9935_v60 = vld [vmem:[#allocation2_spill] sm:$0xff] }
0x145c   :  { %v2859_v50 = vmax.f32 %v2857_v44, %v2858_v8 }
0x145e   :  { %v2860_v9 = vrot.slane %v2859_v50, 1  ;;  %6993 = vmatpush3.bf16.msra.mxu0 %v9926_v34  ;;  %v9937_v34 = vmov 0.0|0.0  }
0x145f   :  { %6995 = vmatprep.subr.bf16.mxu0 %v6994_v37 }
0x1460   :  { %v8882_v28 = vmax.f32 %v2859_v50, %v2860_v9 }
0x1462   :  { %v2862_v15 = vsub.f32 %v8661_v49, %v8882_v28  ;;  %v2863_v18 = vsub.f32 %v8659_v51, %v8882_v28  ;;  %v2864_v29 = vsub.f32 %v8665_v54, %v8882_v28  ;;  %v2865_v17 = vsub.f32 %v8663_v41, %v8882_v28  ;;  %6997 = vmatpush3.bf16.msra.mxu0 %v9927_v22 }
0x1463   :  { %v2866_v24 = vsub.f32 %v8673_v42, %v8882_v28  ;;  %v2867_v27 = vsub.f32 %v8667_v57, %v8882_v28  ;;  %v2868_v49 = vsub.f32 %v8685_v43, %v8882_v28  ;;  %v2869_v51 = vsub.f32 %v8679_v23, %v8882_v28  ;;  %6999 = vmatprep.subr.bf16.mxu0 %v6998_v0  ;;  %v9931_v0 = vld [vmem:[#allocation4_spill] sm:$0xff] }
0x1464   :  { %v2870_v41 = vsub.f32 %v8695_v52, %v8882_v28  ;;  %v2871_v54 = vsub.f32 %v8691_v13, %v8882_v28  ;;  %v2872_v35 = vsub.f32 %v8703_v25, %v8882_v28  ;;  %v2873_v42 = vsub.f32 %v8699_v19, %v8882_v28 }
0x1465   :  { %v2874_v57 = vsub.f32 %v8711_v12, %v8882_v28  ;;  %v2875_v43 = vsub.f32 %v8707_v56, %v8882_v28  ;;  %v2876_v23 = vsub.f32 %v8719_v3, %v8882_v28  ;;  %v2877_v52 = vsub.f32 %v8715_v6, %v8882_v28 }
0x1466   :  { %v2878_v13 = vsub.f32 %v8727_v21, %v8882_v28  ;;  %v2879_v25 = vsub.f32 %v8723_v59, %v8882_v28  ;;  %v2880_v19 = vsub.f32 %v8735_v30, %v8882_v28  ;;  %v2881_v12 = vsub.f32 %v8731_v20, %v8882_v28 }
0x1467   :  { %v9928_v56 = vpack.c.bf16 %v8811_v47, %v8818_v2  ;;  %v2882_v3 = vsub.f32 %v8743_v32, %v8882_v28  ;;  %v2883_v6 = vsub.f32 %v8739_v31, %v8882_v28  ;;  %v2884_v21 = vsub.f32 %v8760_v39, %v8882_v28 }
0x1468   :  { %v2885_v59 = vsub.f32 %v8753_v10, %v8882_v28  ;;  %v2886_v30 = vsub.f32 %v8784_v36, %v8882_v28  ;;  %v2887_v46 = vsub.f32 %v8775_v14, %v8882_v28  ;;  %v2888_v47 = vsub.f32 %v8808_v5, %v8882_v28 }
0x1469   :  { %7001 = vmatpush3.bf16.msra.mxu0 %v9928_v56  ;;  %v2889_v2 = vsub.f32 %v8799_v55, %v8882_v28  ;;  %v2890_v40 = vsub.f32 %v8832_v58, %v8882_v28  ;;  %v2891_v7 = vsub.f32 %v9929_v45, %v8882_v28  ;;  %v2892_v37 = vsub.f32 %v8852_v4, %v8882_v28 }
0x146a   :  { %7003 = vmatprep.subr.bf16.mxu0 %v7002_v1  ;;  %v2893_v61 = vsub.f32 %v9930_v33, %v8882_v28  ;;  %v2894_v44 = vmul.f32 1.442695, %v2862_v15  ;;  %v2896_v63 = vmul.f32 1.442695, %v2863_v18  ;;  %v2898_v16 = vmul.f32 1.442695, %v2864_v29 }
0x146b   :  { %v9933_v11 = vpack.c.bf16 %v9931_v0, %v9932_v53  ;;  %v2900_v8 = vmul.f32 1.442695, %v2865_v17  ;;  %v2902_v62 = vmul.f32 1.442695, %v2866_v24  ;;  %v2904_v26 = vmul.f32 1.442695, %v2867_v27 }
0x146c   :  { %7365 = vpow2.f32 %v2894_v44  ;;  %v2906_v38 = vmul.f32 1.442695, %v2868_v49  ;;  %v9934_v1 = vld [vmem:[#allocation7_spill] sm:$0xff]  ;;  %v2908_v9 = vmul.f32 1.442695, %v2869_v51 }
0x146d   :  { %7005 = vmatpush3.bf16.msra.mxu0 %v9933_v11  ;;  %7367 = vpow2.f32 %v2896_v63  ;;  %v9936_v50 = vpack.c.bf16 %v9934_v1, %v9935_v60  ;;  %v2910_v15 = vmul.f32 1.442695, %v2870_v41  ;;  %v2912_v18 = vmul.f32 1.442695, %v2871_v54 }
0x146e   :  { %7007 = vmatprep.subr.bf16.mxu0 %v7006_v48  ;;  %7369 = vpow2.f32 %v2898_v16  ;;  %v2914_v48 = vmul.f32 1.442695, %v2872_v35  ;;  %v2916_v29 = vmul.f32 1.442695, %v2873_v42  ;;  %v2918_v17 = vmul.f32 1.442695, %v2874_v57 }
0x146f   :  { %7371 = vpow2.f32 %v2900_v8  ;;  %v2920_v22 = vmul.f32 1.442695, %v2875_v43  ;;  %v2922_v27 = vmul.f32 1.442695, %v2876_v23  ;;  %v2924_v51 = vmul.f32 1.442695, %v2877_v52 }
0x1470   :  { %7373 = vpow2.f32 %v2902_v62  ;;  %v2926_v35 = vmul.f32 1.442695, %v2878_v13  ;;  %v2928_v43 = vmul.f32 1.442695, %v2879_v25  ;;  %v2930_v44 = vmul.f32 1.442695, %v2880_v19 }
0x1471   :  { %7009 = vmatpush3.bf16.msra.mxu0 %v9936_v50  ;;  %7375 = vpow2.f32 %v2904_v26  ;;  %v2932_v13 = vmul.f32 1.442695, %v2881_v12  ;;  %v2934_v25 = vmul.f32 1.442695, %v2882_v3  ;;  %v2936_v11 = vmul.f32 1.442695, %v2883_v6 }
0x1472   :  { %7010 = vmatprep.subr.bf16.mxu0 %v9937_v34  ;;  %7377 = vpow2.f32 %v2906_v38  ;;  %v2938_v8 = vmul.f32 1.442695, %v2884_v21  ;;  %v2940_v62 = vmul.f32 1.442695, %v2885_v59  ;;  %v2942_v26 = vmul.f32 1.442695, %v2886_v30 }
0x1473   :  { %7379 = vpow2.f32 %v2908_v9  ;;  %v2944_v38 = vmul.f32 1.442695, %v2887_v46  ;;  %v2946_v1 = vmul.f32 1.442695, %v2888_v47  ;;  %v2948_v60 = vmul.f32 1.442695, %v2889_v2 }
0x1474   :  { %7381 = vpow2.f32 %v2910_v15  ;;  %v2950_v50 = vmul.f32 1.442695, %v2890_v40  ;;  %v2952_v9 = vmul.f32 1.442695, %v2891_v7  ;;  %v2954_v15 = vmul.f32 1.442695, %v2892_v37 }
0x1475   :  { %7383 = vpow2.f32 %v2912_v18  ;;  %v2956_v18 = vmul.f32 1.442695, %v2893_v61 }
0x1476   :  { %v8961_v24 = vpop.eup %7365  ;;  %7385 = vpow2.f32 %v2914_v48 }
0x1477   :  { %v8963_v49 = vpop.eup %7367  ;;  %7387 = vpow2.f32 %v2916_v29  ;;  %v2958_v41 = vsel %vm1231_vm5, %v8961_v24, 0.0 }
0x1478   :  { %v8967_v54 = vpop.eup %7369  ;;  %7389 = vpow2.f32 %v2918_v17  ;;  %v2959_v42 = vsel %vm1231_vm5, %v8963_v49, 0.0 }
0x1479   :  { %v8971_v57 = vpop.eup %7371  ;;  %7391 = vpow2.f32 %v2920_v22  ;;  %v2960_v56 = vadd.f32 %v2959_v42, %v2958_v41  ;;  %v2961_v52 = vsel %vm1231_vm5, %v8967_v54, 0.0 }
0x147a   :  { %v8973_v23 = vpop.eup %7373  ;;  %7393 = vpow2.f32 %v2922_v27  ;;  %v2963_v19 = vsel %vm1231_vm5, %v8971_v57, 0.0 }
0x147b   :  { %v8977_v63 = vpop.eup %7375  ;;  %7395 = vpow2.f32 %v2924_v51  ;;  %v2962_v16 = vadd.f32 %v2961_v52, %v2960_v56  ;;  %v2965_v32 = vsel %vm1231_vm5, %v8973_v23, 0.0 }
0x147c   :  { %v8982_v0 = vpop.eup %7377  ;;  %7397 = vpow2.f32 %v2926_v35  ;;  %v2967_v39 = vsel %vm1231_vm5, %v8977_v63, 0.0 }
0x147d   :  { %v8989_v53 = vpop.eup %7379  ;;  %7399 = vpow2.f32 %v2928_v43  ;;  %v2964_v20 = vadd.f32 %v2963_v19, %v2962_v16  ;;  %v2969_v36 = vsel %vm1231_vm5, %v8982_v0, 0.0 }
0x147e   :  { %v8994_v12 = vpop.eup %7381  ;;  %7401 = vpow2.f32 %v2930_v44  ;;  %v2971_v5 = vsel %vm1231_vm5, %v8989_v53, 0.0 }
0x147f   :  { %v9001_v3 = vpop.eup %7383  ;;  %7403 = vpow2.f32 %v2932_v13  ;;  %v2966_v31 = vadd.f32 %v2965_v32, %v2964_v20  ;;  %v2973_v58 = vsel %vm1231_vm5, %v8994_v12, 0.0 }
0x1480   :  { %v9006_v6 = vpop.eup %7385  ;;  %7405 = vpow2.f32 %v2934_v25  ;;  %v2975_v29 = vsel %vm1231_vm5, %v9001_v3, 0.0 }
0x1481   :  { %v9013_v21 = vpop.eup %7387  ;;  %7407 = vpow2.f32 %v2936_v11  ;;  %v2968_v10 = vadd.f32 %v2967_v39, %v2966_v31  ;;  %v2977_v28 = vsel %vm1231_vm5, %v9006_v6, 0.0 }
0x1482   :  { %v9018_v59 = vpop.eup %7389  ;;  %7409 = vpow2.f32 %v2938_v8 }
0x1483   :  { %v9025_v30 = vpop.eup %7391  ;;  %7411 = vpow2.f32 %v2940_v62  ;;  %v2970_v14 = vadd.f32 %v2969_v36, %v2968_v10 }
0x1484   :  { %v9030_v46 = vpop.eup %7393  ;;  %7413 = vpow2.f32 %v2942_v26  ;;  %v2983_v25 = vsel %vm1231_vm5, %v9025_v30, 0.0 }
0x1485   :  { %v9037_v47 = vpop.eup %7395  ;;  %7415 = vpow2.f32 %v2944_v38  ;;  %v2972_v55 = vadd.f32 %v2971_v5, %v2970_v14  ;;  %v2985_v8 = vsel %vm1231_vm5, %v9030_v46, 0.0 }
0x1486   :  { %v7398_v2 = vpop.eup %7397  ;;  %7417 = vpow2.f32 %v2946_v1  ;;  %v2987_v26 = vsel %vm1231_vm5, %v9037_v47, 0.0 }
0x1487   :  { %v7400_v40 = vpop.eup %7399  ;;  %7419 = vpow2.f32 %v2948_v60  ;;  %v2974_v48 = vadd.f32 %v2973_v58, %v2972_v55  ;;  %v7215_v45 = vpack.i.bf16 %v8961_v24, %v7398_v2  ;;  %v2989_v10 = vsel %vm1231_vm5, %v7398_v2, 0.0 }
0x1488   :  { %v7402_v7 = vpop.eup %7401  ;;  %7421 = vpow2.f32 %v2950_v50  ;;  %v7217_v4 = vpack.i.bf16 %v8963_v49, %v7400_v40  ;;  %v2979_v49 = vsel %vm1231_vm5, %v9013_v21, 0.0  ;;  %v2991_v36 = vsel %vm1231_vm5, %v7400_v40, 0.0 }
0x1489   :  { %v7404_v37 = vpop.eup %7403  ;;  %7423 = vpow2.f32 %v2952_v9  ;;  %v2976_v17 = vadd.f32 %v2975_v29, %v2974_v48  ;;  %7216 = vxpose.xlu1.b32.start [1/16] (narrow) %v7215_v45, 8  ;;  %v7219_v22 = vpack.i.bf16 %v8967_v54, %v7402_v7 }
0x148a   :  { %v7406_v27 = vpop.eup %7405  ;;  %7425 = vpow2.f32 %v2954_v15  ;;  %v7221_v33 = vpack.i.bf16 %v8971_v57, %v7404_v37  ;;  %v2981_v57 = vsel %vm1231_vm5, %v9018_v59, 0.0  ;;  %v2995_v50 = vsel %vm1231_vm5, %v7404_v37, 0.0 }
0x148b   :  { %v7408_v61 = vpop.eup %7407  ;;  %7427 = vpow2.f32 %v2956_v18  ;;  %v2978_v24 = vadd.f32 %v2977_v28, %v2976_v17  ;;  %v7223_v51 = vpack.i.bf16 %v8973_v23, %v7406_v27  ;;  %v2997_v5 = vsel %vm1231_vm5, %v7406_v27, 0.0 }
0x148c   :  { %v7410_v41 = vpop.eup %7409  ;;  %v7225_v35 = vpack.i.bf16 %v8977_v63, %v7408_v61 }
0x148d   :  { %v7412_v42 = vpop.eup %7411  ;;  %v2980_v54 = vadd.f32 %v2979_v49, %v2978_v24  ;;  %7218 = vxpose.xlu1.b32.cont [2/16] (narrow) %v7217_v4, 8  ;;  %v7227_v43 = vpack.i.bf16 %v8982_v0, %v7410_v41 }
0x148e   :  { %v7414_v56 = vpop.eup %7413  ;;  %v7229_v44 = vpack.i.bf16 %v8989_v53, %v7412_v42  ;;  %v3003_v15 = vsel %vm1231_vm5, %v7412_v42, 0.0 }
0x148f   :  { %v7416_v52 = vpop.eup %7415  ;;  %v2982_v13 = vadd.f32 %v2981_v57, %v2980_v54  ;;  %v7231_v23 = vpack.i.bf16 %v8994_v12, %v7414_v56  ;;  %v3005_v40 = vsel %vm1231_vm5, %v7414_v56, 0.0  ;;  %v9938_v56 = vmov 0.0  }
0x1490   :  { %v7418_v16 = vpop.eup %7417  ;;  %v7233_v63 = vpack.i.bf16 %v9001_v3, %v7416_v52  ;;  %v3007_v48 = vsel %vm1231_vm5, %v7416_v52, 0.0 }
0x1491   :  { %v7420_v19 = vpop.eup %7419  ;;  %v2984_v11 = vadd.f32 %v2983_v25, %v2982_v13  ;;  %7220 = vxpose.xlu1.b32.cont [3/16] (narrow) %v7219_v22, 8  ;;  %v7235_v0 = vpack.i.bf16 %v9006_v6, %v7418_v16  ;;  %v5557_v13 = vld [vmem:[%s8370_s1 + $0x20] sm:$0xff] }
0x1492   :  { %v7422_v20 = vpop.eup %7421  ;;  %v7237_v53 = vpack.i.bf16 %v9013_v21, %v7420_v19  ;;  %v3011_v4 = vsel %vm1231_vm5, %v7420_v19, 0.0 }
0x1493   :  { %v7424_v32 = vpop.eup %7423  ;;  %v2986_v62 = vadd.f32 %v2985_v8, %v2984_v11  ;;  %v7239_v12 = vpack.i.bf16 %v9018_v59, %v7422_v20  ;;  %v2993_v59 = vsel %vm1231_vm5, %v7402_v7, 0.0  ;;  %v3009_v7 = vsel %vm1231_vm5, %v7418_v16, 0.0  ;;  %v5559_v16 = vld [vmem:[%s8370_s1 + $0x30] sm:$0xff] }
0x1494   :  { %v7426_v31 = vpop.eup %7425  ;;  %v7241_v3 = vpack.i.bf16 %v9025_v30, %v7424_v32  ;;  %v3013_v17 = vsel %vm1231_vm5, %v7422_v20, 0.0  ;;  %v3015_v27 = vsel %vm1231_vm5, %v7424_v32, 0.0  ;;  %v9108_v32 = vld [vmem:[%s7746_s8] sm:$0xff] }
0x1495   :  { %v7428_v39 = vpop.eup %7427  ;;  %v2988_v38 = vadd.f32 %v2987_v26, %v2986_v62  ;;  %7222 = vxpose.xlu1.b32.cont [4/16] (narrow) %v7221_v33, 8  ;;  %v7243_v6 = vpack.i.bf16 %v9030_v46, %v7426_v31  ;;  %v2999_v46 = vsel %vm1231_vm5, %v7408_v61, 0.0  ;;  %v3017_v33 = vsel %vm1231_vm5, %v7426_v31, 0.0 }
0x1496   :  { %v7245_v1 = vpack.i.bf16 %v9037_v47, %v7428_v39  ;;  %v3001_v47 = vsel %vm1231_vm5, %v7410_v41, 0.0  ;;  %v3019_v24 = vsel %vm1231_vm5, %v7428_v39, 0.0 }
0x1497   :  { %v2990_v21 = vadd.f32 %v2989_v10, %v2988_v38 }
0x1499   :  { %v2992_v60 = vadd.f32 %v2991_v36, %v2990_v21  ;;  %7224 = vxpose.xlu1.b32.cont [5/16] (narrow) %v7223_v51, 8  ;;  %v5561_v21 = vld [vmem:[%s8389_s6 + $0x1] sm:$0x1] }
0x149b   :  { %v2994_v14 = vadd.f32 %v2993_v59, %v2992_v60 }
0x149d   :  { %v2996_v30 = vadd.f32 %v2995_v50, %v2994_v14  ;;  %7226 = vxpose.xlu1.b32.cont [6/16] (narrow) %v7225_v35, 8  ;;  %v9939_v14 = vld [vmem:[#allocation8_spill] sm:$0xff] }
0x149f   :  { %v2998_v9 = vadd.f32 %v2997_v5, %v2996_v30 }
0x14a1   :  { %v3000_v55 = vadd.f32 %v2999_v46, %v2998_v9  ;;  %7228 = vxpose.xlu1.b32.cont [7/16] (narrow) %v7227_v43, 8 }
0x14a3   :  { %v3002_v2 = vadd.f32 %v3001_v47, %v3000_v55 }
0x14a5   :  { %v3004_v58 = vadd.f32 %v3003_v15, %v3002_v2  ;;  %7230 = vxpose.xlu1.b32.cont [8/16] (narrow) %v7229_v44, 8  ;;  %v5565_v2 = vld [vmem:[%s8398_s14 + $0x20] sm:$0xff]  ;;  %v5566_v15 = vld [vmem:[%s8398_s14 + $0x28] sm:$0xff] }
0x14a7   :  { %v3006_v18 = vadd.f32 %v3005_v40, %v3004_v58  ;;  %v5567_v58 = vld [vmem:[%s8398_s14 + $0x30] sm:$0xff]  ;;  %v7017_v40 = vpack.c.bf16 %v5566_v15, %v5565_v2  ;;  %v5592_v15 = vld [vmem:[%s7674_s29 + $0x58] sm:$0xff] }
0x14a8   :  { %v5591_v2 = vld [vmem:[%s7674_s29 + $0x50] sm:$0xff] }
0x14a9   :  { %v3008_v45 = vadd.f32 %v3007_v48, %v3006_v18  ;;  %7232 = vxpose.xlu1.b32.cont [9/16] (narrow) %v7231_v23, 8  ;;  %v5558_v23 = vld [vmem:[%s8370_s1 + $0x28] sm:$0xff]  ;;  %v5568_v18 = vld [vmem:[%s8398_s14 + $0x38] sm:$0xff] }
0x14aa   :  { %v7011_v25 = vpack.c.bf16 %v5558_v23, %v5557_v13  ;;  %v7020_v48 = vpack.c.bf16 %v5568_v18, %v5567_v58  ;;  %v7044_v58 = vpack.c.bf16 %v5592_v15, %v5591_v2  ;;  %v9255_v2 = vld [vmem:[%s7764_s13 + $0x58] sm:$0xff]  ;;  %v7553_v15 = vld [vmem:[%s7764_s13 + $0x60] sm:$0xff] }
0x14ab   :  { %v3010_v29 = vadd.f32 %v3009_v7, %v3008_v45  ;;  %v5571_v45 = vld [vmem:[%s8406_s22 + $0x40] sm:$0xff]  ;;  %v5572_v7 = vld [vmem:[%s8406_s22 + $0x48] sm:$0xff] }
0x14ad   :  { %v3012_v37 = vadd.f32 %v3011_v4, %v3010_v29  ;;  %7234 = vxpose.xlu1.b32.cont [10/16] (narrow) %v7233_v63, 8  ;;  %v5560_v63 = vld [vmem:[%s8370_s1 + $0x38] sm:$0xff]  ;;  %v5573_v29 = vld [vmem:[%s8406_s22 + $0x50] sm:$0xff]  ;;  %v7023_v4 = vpack.c.bf16 %v5572_v7, %v5571_v45  ;;  %v5593_v7 = vld [vmem:[%s7700_s11 + $0x2] sm:$0x1] }
0x14ae   :  { %v7014_v19 = vpack.c.bf16 %v5560_v63, %v5559_v16  ;;  %v5579_v63 = vld [vmem:[%s8450_s27 + $0x1] sm:$0x1] }
0x14af   :  { %v3014_v22 = vadd.f32 %v3013_v17, %v3012_v37  ;;  %v5574_v37 = vld [vmem:[%s8406_s22 + $0x58] sm:$0xff] }
0x14b0   :  { %v7026_v17 = vpack.c.bf16 %v5574_v37, %v5573_v29 }
0x14b1   :  { %v3016_v28 = vadd.f32 %v3015_v27, %v3014_v22  ;;  %7236 = vxpose.xlu1.b32.cont [11/16] (narrow) %v7235_v0, 8  ;;  %v5575_v22 = vld [vmem:[%s8406_s22 + $0x60] sm:$0xff]  ;;  %v5576_v27 = vld [vmem:[%s8406_s22 + $0x68] sm:$0xff] }
0x14b3   :  { %v3018_v61 = vadd.f32 %v3017_v33, %v3016_v28  ;;  %v7029_v28 = vpack.c.bf16 %v5576_v27, %v5575_v22 }
0x14b5   :  { %v3020_v51 = vadd.f32 %v3019_v24, %v3018_v61  ;;  %7238 = vxpose.xlu1.b32.cont [12/16] (narrow) %v7237_v53, 8 }
0x14b7   :  { %v3021_v41 = vrot.slane %v3020_v51, 4 }
0x14b9   :  { %v3022_v49 = vadd.f32 %v3021_v41, %v3020_v51  ;;  %7240 = vxpose.xlu1.b32.cont [13/16] (narrow) %v7239_v12, 8  ;;  %v5563_v41 = vld [vmem:[%s8423_s30 + $0x1] sm:$0x1] }
0x14bb   :  { %v3023_v35 = vrot.slane %v3022_v49, 2 }
0x14bd   :  { %7242 = vxpose.xlu1.b32.cont [14/16] (narrow) %v7241_v3, 8  ;;  %v3024_v42 = vadd.f32 %v3023_v35, %v3022_v49  ;;  %v5564_v35 = vld [vmem:[%s8428_s9 + $0x1] sm:$0x1] }
0x14bf   :  { %v3025_v54 = vrot.slane %v3024_v42, 1 }
0x14c1   :  { %7244 = vxpose.xlu1.b32.cont [15/16] (narrow) %v7243_v6, 8  ;;  %v3026_v43 = vadd.f32 %v3025_v54, %v3024_v42 }
0x14c3   :  { %6565 = vmatmul.mubr.msk.f32.vlgmr.msra.gmra.mrb[78].mxu1 %vm1231_vm5, %v3026_v43  ;;  %v5577_v43 = vld [vmem:[%s8406_s22 + $0x70] sm:$0xff] }
0x14c4   :  { %6586 = vmatprep.mubr.msk.f32.mxu1 %vm7576_vm0, %v9938_v56  ;;  %7018 = vmatpush3.bf16.msra.mxu1 %v7017_v40  ;;  %v5587_v40 = vld [vmem:[%s7691_s7 + $0x2] sm:$0x1] }
0x14c5   :  { %7246 = vxpose.xlu1.b32.end [16/16] (narrow) %v7245_v1, 8  ;;  %7019 = vmatprep.subr.bf16.mxu1 %v9937_v34 }
0x14c8   :  { %7021 = vmatpush3.bf16.msra.mxu1 %v7020_v48 }
0x14c9   :  { %7034 = vmatprep.subr.bf16.mxu1 %v9937_v34 }
0x1509   :  { %v7247_v57 = vpop.trf.xlu1 }
0x150a   :  { %v7251_v44 = vunpack.i.h.bf16 %v7247_v57  ;;  %v7248_v52 = vunpack.i.l.bf16 %v7247_v57  ;;  %v5578_v57 = vld [vmem:[%s8406_s22 + $0x78] sm:$0xff] }
0x150c   :  { %3155 = vmatprep.mubr.f32.mxu0 %v7248_v52  ;;  %v5569_v52 = vld [vmem:[%s8441_s18 + $0x1] sm:$0x1] }
0x150d   :  { %3156 = vmatmul.mubr.f32.vlgmr.msra.gmra.mrb[82].mxu0 %v7251_v44  ;;  %v7032_v44 = vpack.c.bf16 %v5578_v57, %v5577_v43 }
0x150e   :  { %6575 = vmatprep.mubr.msk.f32.mxu0 %vm7576_vm0, %v9938_v56  ;;  %7012 = vmatpush3.bf16.msra.mxu0 %v7011_v25 }
0x150f   :  { %7013 = vmatprep.subr.bf16.mxu0 %v9937_v34 }
0x1512   :  { %7015 = vmatpush3.bf16.msra.mxu0 %v7014_v19 }
0x1513   :  { %7022 = vmatprep.subr.bf16.mxu0 %v9937_v34 }
0x1596   :  { %v3230_v11 = vpop.f32.mrb[78].mxu1 }
0x1597   :  { %v6566_v0 = vpop.f32.mrb[79].mxu1  ;;  %7429 = vrcp.f32 %v3230_v11 }
0x15a1   :  { %v7430_v10 = vpop.eup %7429 }
0x15e0   :  { %v5998_v20 = vpop.f32.mrb[82].mxu0 }
0x15e1   :  { %v5999_v8 = vpop.f32.mrb[83].mxu0 }
0x15e2   :  { %v6000_v53 = vadd.f32 %v5999_v8, %v5998_v20 }
0x15e4   :  { %v3235_v62 = vmul.f32 %v9108_v32, %v6000_v53 }
0x15e6   :  { %v3236_v12 = vsel %vm315_vm3, %v3235_v62, 0.0 }
0x15e7   :  { %v3237_v31 = vrot.slane %v3236_v12, 4 }
0x15e9   :  { %v3238_v26 = vadd.f32 %v3237_v31, %v3236_v12 }
0x15eb   :  { %v3239_v3 = vrot.slane %v3238_v26, 2 }
0x15ed   :  { %v3240_v39 = vadd.f32 %v3239_v3, %v3238_v26  ;;  %v5583_v3 = vld [vmem:[%s7656_s17 + $0x40] sm:$0xff] }
0x15ef   :  { %v3241_v38 = vrot.slane %v3240_v39, 1 }
0x15f1   :  { %v3242_v6 = vadd.f32 %v3241_v38, %v3240_v39  ;;  %v5584_v39 = vld [vmem:[%s7656_s17 + $0x48] sm:$0xff]  ;;  %v5585_v38 = vld [vmem:[%s7656_s17 + $0x50] sm:$0xff] }
0x15f3   :  { %v3243_v1 = vmul.f32 %v7430_v10, %v3242_v6  ;;  %v7035_v6 = vpack.c.bf16 %v5584_v39, %v5583_v3  ;;  %v5586_v10 = vld [vmem:[%s7656_s17 + $0x58] sm:$0xff]  ;;  %v5604_v3 = vld [vmem:[%s7734_s28 + $0x48] sm:$0xff]  ;;  %v5605_v39 = vld [vmem:[%s7734_s28 + $0x50] sm:$0xff]  ;;  %s7605_s17 = smov 29  }
0x15f4   :  { %s5370_s11 = sld [smem:[%s9857_s0 + %s7605_s17]]  }
0x15f5   :  { %6576 = vmatmul.mubr.msk.f32.vlgmr.msra.gmra.mrb[84].mxu0 %vm315_vm3, %v3243_v1  ;;  %v7038_v1 = vpack.c.bf16 %v5586_v10, %v5585_v38  ;;  %v5606_v38 = vld [vmem:[%s7734_s28 + $0x58] sm:$0xff]  ;;  %v5645_v10 = vld [vmem:[%s7772_s19 + $0x48] sm:$0xff] }
0x15f6   :  { %6605 = vmatprep.mubr.msk.f32.mxu0 %vm7576_vm0, %v9938_v56  ;;  %7024 = vmatpush3.bf16.msra.mxu0 %v7023_v4 }
0x15f7   :  { %7025 = vmatprep.subr.bf16.mxu0 %v9937_v34 }
0x15fa   :  { %7027 = vmatpush3.bf16.msra.mxu0 %v7026_v17 }
0x15fb   :  { %7028 = vmatprep.subr.bf16.mxu0 %v9937_v34 }
0x15fe   :  { %7030 = vmatpush3.bf16.msra.mxu0 %v7029_v28 }
0x15ff   :  { %7031 = vmatprep.subr.bf16.mxu0 %v9937_v34 }
0x1602   :  { %7033 = vmatpush3.bf16.msra.mxu0 %v7032_v44 }
0x1603   :  { %7046 = vmatprep.subr.bf16.mxu0 %v9937_v34 }
0x16c8   :  { %v3320_v36 = vpop.f32.mrb[84].mxu0 }
0x16c9   :  { %v3321_v60 = vadd.f32 %v5561_v21, %v3320_v36  ;;  %v6577_v59 = vpop.f32.mrb[85].mxu0 }
0x16cb   :  { %v3324_v50 = vadd.f32 %v3321_v60, %v9939_v14  ;;  %v5581_v14 = vld [vmem:[%s8464_s10 + $0x1] sm:$0x1] }
0x16cd   :  { %v3329_v30 = vsel %vm470_vm4, %v3324_v50, 0.0 }
0x16ce   :  { %3330 = vadd.xlane.f32.xlu0 %v3329_v30  ;;  %v5589_v30 = vld [vmem:[%s7674_s29 + $0x40] sm:$0xff] }
0x175b   :  { %v3331_v5 = vpop.xlane.xlu0 %3330 }
0x175c   :  { %v3332_v9 = vmul.f32 0.03125, %v3331_v5  ;;  %v5590_v5 = vld [vmem:[%s7674_s29 + $0x48] sm:$0xff] }
0x175e   :  { %v3333_v46 = vsub.f32 %v3324_v50, %v3332_v9  ;;  %v5582_v9 = vld [vmem:[%s8469_s23 + $0x1] sm:$0x1] }
0x1760   :  { %v3334_v55 = vmul.f32 %v3333_v46, %v3333_v46 }
0x1762   :  { %v3335_v47 = vsel %vm470_vm4, %v3334_v55, 0.0  ;;  %v7041_v55 = vpack.c.bf16 %v5590_v5, %v5589_v30  ;;  %v9220_v30 = vld [vmem:[%s7764_s13 + $0x20] sm:$0xff]  ;;  %v9225_v5 = vld [vmem:[%s7764_s13 + $0x28] sm:$0xff] }
0x1763   :  { %3336 = vadd.xlane.f32.xlu1 %v3335_v47 }
0x17f0   :  { %v3337_v33 = vpop.xlane.xlu1 %3336 }
0x17f1   :  { %v3338_v61 = vmul.f32 0.03125, %v3337_v33 }
0x17f3   :  { %v3339_v24 = vadd.f32 1e-05, %v3338_v61 }
0x17f5   :  { %7431 = vrsqrt.f32 %v3339_v24 }
0x17ff   :  { %v7432_v51 = vpop.eup %7431 }
0x1800   :  { %v3341_v49 = vmul.f32 %v7432_v51, %v3333_v46  ;;  %v5597_v51 = vld [vmem:[%s7708_s15 + $0x40] sm:$0xff] }
0x1802   :  { %v3342_v42 = vmul.f32 %v5563_v41, %v3341_v49  ;;  %v5598_v41 = vld [vmem:[%s7708_s15 + $0x48] sm:$0xff]  ;;  %v5599_v49 = vld [vmem:[%s7708_s15 + $0x50] sm:$0xff] }
0x1804   :  { %v3343_v54 = vadd.f32 %v5564_v35, %v3342_v42  ;;  %v7047_v35 = vpack.c.bf16 %v5598_v41, %v5597_v51  ;;  %v5600_v42 = vld [vmem:[%s7708_s15 + $0x58] sm:$0xff]  ;;  %v7567_v41 = vld [vmem:[%s7764_s13 + $0xd0] sm:$0xff]  ;;  %s7606_s15 = smov 31  }
0x1806   :  { %6587 = vmatmul.mubr.msk.f32.vlgmr.msra.gmra.mrb[80].mxu1 %vm315_vm3, %v3343_v54 }
0x1807   :  { %6616 = vmatprep.mubr.msk.f32.mxu1 %vm7576_vm0, %v9938_v56  ;;  %7036 = vmatpush3.bf16.msra.mxu1 %v7035_v6  ;;  %v5644_v6 = vld [vmem:[%s7772_s19 + $0x40] sm:$0xff] }
0x1808   :  { %7037 = vmatprep.subr.bf16.mxu1 %v9937_v34 }
0x180b   :  { %7039 = vmatpush3.bf16.msra.mxu1 %v7038_v1  ;;  %v5646_v1 = vld [vmem:[%s7772_s19 + $0x50] sm:$0xff] }
0x180c   :  { %7040 = vmatprep.subr.bf16.mxu1 %v9937_v34 }
0x18d9   :  { %v3420_v13 = vpop.f32.mrb[80].mxu1 }
0x18da   :  { %v3421_v23 = vadd.f32 %v5569_v52, %v3420_v13  ;;  %v6588_v16 = vpop.f32.mrb[81].mxu1  ;;  %v5595_v13 = vld [vmem:[%s7718_s20 + $0x2] sm:$0x1] }
0x18db   :  { %v5596_v16 = vld [vmem:[%s7723_s24 + $0x2] sm:$0x1] }
0x18dc   :  { %v3424_v25 = vmax.f32 %v3421_v23, 0.0 }
0x18de   :  { %6606 = vmatmul.mubr.msk.f32.vlgmr.msra.gmra.mrb[86].mxu0 %vm1867_vm6, %v3424_v25 }
0x18df   :  { %6638 = vmatprep.mubr.msk.f32.mxu0 %vm7576_vm0, %v9938_v56  ;;  %7048 = vmatpush3.bf16.msra.mxu0 %v7047_v35 }
0x18e0   :  { %7049 = vmatprep.subr.bf16.mxu0 %v9937_v34 }
0x19b1   :  { %v3505_v19 = vpop.f32.mrb[86].mxu0 }
0x19b2   :  { %v3506_v11 = vadd.f32 %v5579_v63, %v3505_v19  ;;  %v6607_v0 = vpop.f32.mrb[87].mxu0  ;;  %v7541_v19 = vld [vmem:[%s7764_s13] sm:$0xff] }
0x19b3   :  { %v5601_v0 = vld [vmem:[%s7741_s3 + $0x2] sm:$0x1]  ;;  %s7607_s3 = smov 30  }
0x19b4   :  { %v3509_v20 = vadd.f32 %v3506_v11, %v3343_v54  ;;  %v7050_v54 = vpack.c.bf16 %v5600_v42, %v5599_v49  ;;  %v5603_v11 = vld [vmem:[%s7734_s28 + $0x40] sm:$0xff]  ;;  %v7568_v42 = vld [vmem:[%s7764_s13 + $0xd8] sm:$0xff]  ;;  %s5372_s28 = sld [smem:[%s9857_s0 + %s7606_s15]]  }
0x19b6   :  { %v3514_v8 = vsel %vm470_vm4, %v3509_v20, 0.0  ;;  %7051 = vmatpush3.bf16.msra.mxu0 %v7050_v54  ;;  %v7569_v54 = vld [vmem:[%s7764_s13 + $0xe0] sm:$0xff] }
0x19b7   :  { %3515 = vadd.xlane.f32.xlu0 %v3514_v8 }
0x1a44   :  { %v3516_v53 = vpop.xlane.xlu0 %3515 }
0x1a45   :  { %v3517_v62 = vmul.f32 0.03125, %v3516_v53 }
0x1a47   :  { %v3518_v12 = vsub.f32 %v3509_v20, %v3517_v62 }
0x1a49   :  { %v3519_v31 = vmul.f32 %v3518_v12, %v3518_v12 }
0x1a4b   :  { %v3520_v26 = vsel %vm470_vm4, %v3519_v31, 0.0 }
0x1a4c   :  { %3521 = vadd.xlane.f32.xlu0 %v3520_v26 }
0x1ad9   :  { %v3522_v21 = vpop.xlane.xlu0 %3521 }
0x1ada   :  { %v3523_v36 = vmul.f32 0.03125, %v3522_v21  ;;  %v7060_v21 = vpack.c.bf16 %v5645_v10, %v5644_v6 }
0x1adc   :  { %v3524_v60 = vadd.f32 1e-05, %v3523_v36  ;;  %v5647_v36 = vld [vmem:[%s7772_s19 + $0x58] sm:$0xff]  ;;  %7061 = vmatprep.subr.bf16.mxu0 %v7060_v21  ;;  %s5371_s19 = sld [smem:[%s9857_s0 + %s7607_s3]]  }
0x1ade   :  { %7433 = vrsqrt.f32 %v3524_v60  ;;  %v7064_v60 = vpack.c.bf16 %v5647_v36, %v5646_v1 }
0x1ae8   :  { %v7434_v59 = vpop.eup %7433 }
0x1ae9   :  { %v3526_v50 = vmul.f32 %v7434_v59, %v3518_v12  ;;  %v9941_v12 = vld [vmem:[#allocation3_spill] sm:$0xff] }
0x1aea   :  { %v9203_v59 = vld [vmem:[%s7764_s13 + $0x8] sm:$0xff] }
0x1aeb   :  { %v3527_v46 = vmul.f32 %v5581_v14, %v3526_v50  ;;  %v9208_v14 = vld [vmem:[%s7764_s13 + $0x10] sm:$0xff]  ;;  %v9215_v50 = vld [vmem:[%s7764_s13 + $0x18] sm:$0xff] }
0x1aed   :  { %v3528_v47 = vadd.f32 %v5582_v9, %v3527_v46  ;;  %v9235_v9 = vld [vmem:[%s7764_s13 + $0x38] sm:$0xff]  ;;  %v9240_v46 = vld [vmem:[%s7764_s13 + $0x40] sm:$0xff] }
0x1aef   :  { %6617 = vmatmul.mubr.msk.f32.vlgmr.msra.gmra.mrb[82].mxu1 %vm315_vm3, %v3528_v47 }
0x1af0   :  { %7042 = vmatpush3.bf16.msra.mxu1 %v7041_v55  ;;  %6627 = vmatprep.mubr.msk.f32.mxu1 %vm7576_vm0, %v9938_v56  ;;  %v9245_v55 = vld [vmem:[%s7764_s13 + $0x48] sm:$0xff] }
0x1af1   :  { %7043 = vmatprep.subr.bf16.mxu1 %v9937_v34 }
0x1af4   :  { %7045 = vmatpush3.bf16.msra.mxu1 %v7044_v58  ;;  %v7554_v58 = vld [vmem:[%s7764_s13 + $0x68] sm:$0xff] }
0x1bc2   :  { %v3605_v18 = vpop.f32.mrb[82].mxu1 }
0x1bc3   :  { %v3606_v48 = vadd.f32 %v5587_v40, %v3605_v18  ;;  %v6618_v45 = vpop.f32.mrb[83].mxu1  ;;  %v7555_v40 = vld [vmem:[%s7764_s13 + $0x70] sm:$0xff]  ;;  %v7556_v18 = vld [vmem:[%s7764_s13 + $0x78] sm:$0xff] }
0x1bc4   :  { %v7558_v45 = vld [vmem:[%s7764_s13 + $0x88] sm:$0xff] }
0x1bc5   :  { %6628 = vmatmul.mubr.msk.f32.vlgmr.msra.gmra.mrb[84].mxu1 %vm315_vm3, %v3606_v48  ;;  %v7557_v48 = vld [vmem:[%s7764_s13 + $0x80] sm:$0xff] }
0x1bc6   :  { %6643 = vmatprep.mubr.msk.f32.mxu1 %vm315_vm3, %v5603_v11 }
0x1c98   :  { %v3685_v29 = vpop.f32.mrb[84].mxu1 }
0x1c99   :  { %v3686_v4 = vadd.f32 %v5593_v7, %v3685_v29  ;;  %v6629_v37 = vpop.f32.mrb[85].mxu1  ;;  %v7559_v7 = vld [vmem:[%s7764_s13 + $0x90] sm:$0xff]  ;;  %v7560_v29 = vld [vmem:[%s7764_s13 + $0x98] sm:$0xff] }
0x1c9a   :  { %v7562_v37 = vld [vmem:[%s7764_s13 + $0xa8] sm:$0xff] }
0x1c9b   :  { %v3689_v17 = vadd.f32 %v3686_v4, %v3528_v47  ;;  %v9250_v47 = vld [vmem:[%s7764_s13 + $0x50] sm:$0xff]  ;;  %v7561_v4 = vld [vmem:[%s7764_s13 + $0xa0] sm:$0xff] }
0x1c9d   :  { %v3694_v22 = vsel %vm470_vm4, %v3689_v17, 0.0 }
0x1c9e   :  { %3695 = vadd.xlane.f32.xlu0 %v3694_v22  ;;  %v7564_v22 = vld [vmem:[%s7764_s13 + $0xb8] sm:$0xff] }
0x1d2b   :  { %v3696_v27 = vpop.xlane.xlu0 %3695 }
0x1d2c   :  { %v3697_v28 = vmul.f32 0.03125, %v3696_v27 }
0x1d2e   :  { %v3698_v33 = vsub.f32 %v3689_v17, %v3697_v28  ;;  %v7563_v17 = vld [vmem:[%s7764_s13 + $0xb0] sm:$0xff]  ;;  %v7565_v28 = vld [vmem:[%s7764_s13 + $0xc0] sm:$0xff] }
0x1d30   :  { %v3699_v61 = vmul.f32 %v3698_v33, %v3698_v33 }
0x1d32   :  { %v3700_v24 = vsel %vm470_vm4, %v3699_v61, 0.0 }
0x1d33   :  { %3701 = vadd.xlane.f32.xlu0 %v3700_v24  ;;  %v7566_v24 = vld [vmem:[%s7764_s13 + $0xc8] sm:$0xff] }
0x1dc0   :  { %v3702_v43 = vpop.xlane.xlu0 %3701 }
0x1dc1   :  { %v3703_v57 = vmul.f32 0.03125, %v3702_v43  ;;  %v7570_v43 = vld [vmem:[%s7764_s13 + $0xe8] sm:$0xff] }
0x1dc3   :  { %v3704_v44 = vadd.f32 1e-05, %v3703_v57  ;;  %v7571_v57 = vld [vmem:[%s7764_s13 + $0xf0] sm:$0xff] }
0x1dc5   :  { %7435 = vrsqrt.f32 %v3704_v44  ;;  %v7572_v44 = vld [vmem:[%s7764_s13 + $0xf8] sm:$0xff] }
0x1dcf   :  { %v7436_v52 = vpop.eup %7435 }
0x1dd0   :  { %v3706_v23 = vmul.f32 %v7436_v52, %v3698_v33 }
0x1dd2   :  { %v3707_v25 = vmul.f32 %v5595_v13, %v3706_v23 }
0x1dd4   :  { %v9177_v63 = vadd.f32 %v5596_v16, %v3707_v25 }
0x1dd6   :  { %9940 = vst [vmem:[#allocation5_spill] sm:$0xff] %v9177_v63  ;;  %6639 = vmatmul.mubr.msk.f32.vlgmr.msra.gmra.mrb[88].mxu0 %vm315_vm3, %v9177_v63 }
0x1dd7   :  { %6713 = vmatprep.mubr.msk.f32.mxu0 %vm315_vm3, %v7541_v19  ;;  %7063 = vmatpush3.bf16.msra.mxu0 %v7060_v21 }
0x1dd8   :  { %7065 = vmatprep.subr.bf16.mxu0 %v7064_v60 }
0x1ddb   :  { %7067 = vmatpush3.bf16.msra.mxu0 %v7064_v60 }
0x1ddc   :  { %6761 = vmatprep.subr.mxu0 %v9938_v56 }
0x1dde   :  { %6714 = vmatmul.mubr.msk.f32.vlgmr.msra.gmra.mrb[90].mxu0 %vm315_vm3, %v9203_v59 }
0x1ddf   :  { %6716 = vmatprep.mubr.msk.f32.mxu0 %vm315_vm3, %v9208_v14  ;;  %6762 = vmatpush3.msra.mxu0 %v9108_v32 }
0x1de0   :  { %7106 = vmatprep.subr.bf16.mxu0 %v9937_v34 }
0x1de2   :  { %6717 = vmatmul.mubr.msk.f32.gmra.mrb[92].mxu0 %vm315_vm3, %v9215_v50 }
0x1de3   :  { %6719 = vmatprep.mubr.msk.f32.mxu0 %vm315_vm3, %v9220_v30 }
0x1de6   :  { %6720 = vmatmul.mubr.msk.f32.gmra.mrb[94].mxu0 %vm315_vm3, %v9225_v5 }
0x1ea9   :  { %v3785_v20 = vpop.f32.mrb[88].mxu0 }
0x1eaa   :  { %v3786_v8 = vadd.f32 %v5601_v0, %v3785_v20  ;;  %v6640_v53 = vpop.f32.mrb[89].mxu0 }
0x1eac   :  { %v3789_v62 = vmul.f32 0.5, %v3786_v8 }
0x1eae   :  { %v3793_v31 = vrot.slane %v3789_v62, %v9941_v12 }
0x1eb0   :  { %v3794_v26 = vmul.f32 %v9108_v32, %v3793_v31  ;;  %v9230_v32 = vld [vmem:[%s7764_s13 + $0x30] sm:$0xff] }
0x1eb1   :  { %6722 = vmatprep.mubr.msk.f32.mxu0 %vm315_vm3, %v9230_v32 }
0x1eb2   :  { %6641 = vmatprep.subr.msk.mxu1 %vm315_vm3, %v3794_v26  ;;  %6723 = vmatmul.mubr.msk.f32.gmra.mrb[96].mxu0 %vm315_vm3, %v9235_v9 }
0x1eb3   :  { %6642 = vmatpush3.xpose.msk.msra.mxu1 %vm315_vm3, %v3794_v26  ;;  %6725 = vmatprep.mubr.msk.f32.mxu0 %vm315_vm3, %v9240_v46 }
0x1eb6   :  { %6644 = vmatmul.mubr.msk.f32.vlgmr.msra.gmra.mrb[86].mxu1 %vm315_vm3, %v5604_v3  ;;  %6726 = vmatmul.mubr.msk.f32.gmra.mrb[98].mxu0 %vm315_vm3, %v9245_v55 }
0x1eb7   :  { %6646 = vmatprep.mubr.msk.f32.mxu1 %vm315_vm3, %v5605_v39  ;;  %6728 = vmatprep.mubr.msk.f32.mxu0 %vm315_vm3, %v9250_v47 }
0x1eba   :  { %6647 = vmatmul.mubr.msk.f32.gmra.mrb[88].mxu1 %vm315_vm3, %v5606_v38  ;;  %6729 = vmatmul.mubr.msk.f32.gmra.mrb[100].mxu0 %vm315_vm3, %v9255_v2 }
0x1ebb   :  { %6657 = vmatprep.mubr.msk.f32.mxu1 %vm315_vm3, %v7541_v19  ;;  %6731 = vmatprep.mubr.msk.f32.mxu0 %vm315_vm3, %v7553_v15 }
0x1ebe   :  { %6732 = vmatmul.mubr.msk.f32.gmra.mrb[102].mxu0 %vm315_vm3, %v7554_v58 }
0x1ebf   :  { %6734 = vmatprep.mubr.msk.f32.mxu0 %vm315_vm3, %v7555_v40 }
0x1ec2   :  { %6735 = vmatmul.mubr.msk.f32.gmra.mrb[104].mxu0 %vm315_vm3, %v7556_v18 }
0x1ec3   :  { %6737 = vmatprep.mubr.msk.f32.mxu0 %vm315_vm3, %v7557_v48 }
0x1ec6   :  { %6738 = vmatmul.mubr.msk.f32.gmra.mrb[106].mxu0 %vm315_vm3, %v7558_v45 }
0x1ec7   :  { %6740 = vmatprep.mubr.msk.f32.mxu0 %vm315_vm3, %v7559_v7 }
0x1eca   :  { %6741 = vmatmul.mubr.msk.f32.gmra.mrb[108].mxu0 %vm315_vm3, %v7560_v29 }
0x1ecb   :  { %6743 = vmatprep.mubr.msk.f32.mxu0 %vm315_vm3, %v7561_v4 }
0x1ece   :  { %6744 = vmatmul.mubr.msk.f32.gmra.mrb[110].mxu0 %vm315_vm3, %v7562_v37 }
0x1ecf   :  { %6746 = vmatprep.mubr.msk.f32.mxu0 %vm315_vm3, %v7563_v17 }
0x1ed2   :  { %6747 = vmatmul.mubr.msk.f32.gmra.mrb[112].mxu0 %vm315_vm3, %v7564_v22 }
0x1ed3   :  { %6749 = vmatprep.mubr.msk.f32.mxu0 %vm315_vm3, %v7565_v28 }
0x1ed6   :  { %6750 = vmatmul.mubr.msk.f32.gmra.mrb[114].mxu0 %vm315_vm3, %v7566_v24 }
0x1ed7   :  { %6752 = vmatprep.mubr.msk.f32.mxu0 %vm315_vm3, %v7567_v41 }
0x1eda   :  { %6753 = vmatmul.mubr.msk.f32.gmra.mrb[116].mxu0 %vm315_vm3, %v7568_v42 }
0x1edb   :  { %6755 = vmatprep.mubr.msk.f32.mxu0 %vm315_vm3, %v7569_v54 }
0x1ede   :  { %6756 = vmatmul.mubr.msk.f32.gmra.mrb[118].mxu0 %vm315_vm3, %v7570_v43 }
0x1edf   :  { %6758 = vmatprep.mubr.msk.f32.mxu0 %vm315_vm3, %v7571_v57 }
0x1ee2   :  { %6759 = vmatmul.mubr.msk.f32.gmra.mrb[120].mxu0 %vm315_vm3, %v7572_v44 }
0x1ee3   :  { %6763 = vmatprep.mubr.msk.f32.mxu0 %vm7576_vm0, %v9938_v56 }
0x1f89   :  { %v6645_v27 = vpop.f32.mrb[86].mxu1 }
0x1f8a   :  { %v3881_v33 = vpop.f32.mrb[87].mxu1 }
0x1f8b   :  { %v7052_v61 = vpack.c.bf16 %v6645_v27, %v3881_v33 }
0x1f8d   :  { %v6648_v51 = vpop.f32.mrb[88].mxu1  ;;  %7053 = vmatprep.subr.bf16.mxu1 %v7052_v61 }
0x1f8e   :  { %v3891_v49 = vpop.f32.mrb[89].mxu1  ;;  %7055 = vmatpush3.bf16.msra.mxu1 %v7052_v61 }
0x1f8f   :  { %v7056_v35 = vpack.c.bf16 %v6648_v51, %v3891_v49 }
0x1f91   :  { %7057 = vmatprep.subr.bf16.mxu1 %v7056_v35 }
0x1f92   :  { %7059 = vmatpush3.bf16.msra.mxu1 %v7056_v35 }
0x1f95   :  { %6658 = vmatmul.mubr.msk.f32.vlgmr.msra.gmra.mrb[90].mxu1 %vm315_vm3, %v9203_v59 }
0x1f96   :  { %6660 = vmatprep.mubr.msk.f32.mxu1 %vm315_vm3, %v9208_v14 }
0x1f99   :  { %6661 = vmatmul.mubr.msk.f32.gmra.mrb[92].mxu1 %vm315_vm3, %v9215_v50 }
0x1f9a   :  { %6663 = vmatprep.mubr.msk.f32.mxu1 %vm315_vm3, %v9220_v30 }
0x1f9d   :  { %6664 = vmatmul.mubr.msk.f32.gmra.mrb[94].mxu1 %vm315_vm3, %v9225_v5 }
0x1f9e   :  { %6666 = vmatprep.mubr.msk.f32.mxu1 %vm315_vm3, %v9230_v32 }
0x1fa1   :  { %6667 = vmatmul.mubr.msk.f32.gmra.mrb[96].mxu1 %vm315_vm3, %v9235_v9 }
0x1fa2   :  { %6669 = vmatprep.mubr.msk.f32.mxu1 %vm315_vm3, %v9240_v46 }
0x1fa5   :  { %6670 = vmatmul.mubr.msk.f32.gmra.mrb[98].mxu1 %vm315_vm3, %v9245_v55 }
0x1fa6   :  { %6672 = vmatprep.mubr.msk.f32.mxu1 %vm315_vm3, %v9250_v47 }
0x1fa9   :  { %6673 = vmatmul.mubr.msk.f32.gmra.mrb[100].mxu1 %vm315_vm3, %v9255_v2 }
0x1faa   :  { %6675 = vmatprep.mubr.msk.f32.mxu1 %vm315_vm3, %v7553_v15 }
0x1fad   :  { %6676 = vmatmul.mubr.msk.f32.gmra.mrb[102].mxu1 %vm315_vm3, %v7554_v58 }
0x1fae   :  { %6678 = vmatprep.mubr.msk.f32.mxu1 %vm315_vm3, %v7555_v40 }
0x1fb1   :  { %6679 = vmatmul.mubr.msk.f32.gmra.mrb[104].mxu1 %vm315_vm3, %v7556_v18 }
0x1fb2   :  { %6681 = vmatprep.mubr.msk.f32.mxu1 %vm315_vm3, %v7557_v48 }
0x1fb5   :  { %6682 = vmatmul.mubr.msk.f32.gmra.mrb[106].mxu1 %vm315_vm3, %v7558_v45 }
0x1fb6   :  { %6684 = vmatprep.mubr.msk.f32.mxu1 %vm315_vm3, %v7559_v7 }
0x1fb9   :  { %6685 = vmatmul.mubr.msk.f32.gmra.mrb[108].mxu1 %vm315_vm3, %v7560_v29 }
0x1fba   :  { %6687 = vmatprep.mubr.msk.f32.mxu1 %vm315_vm3, %v7561_v4 }
0x1fbd   :  { %6688 = vmatmul.mubr.msk.f32.gmra.mrb[110].mxu1 %vm315_vm3, %v7562_v37 }
0x1fbe   :  { %6690 = vmatprep.mubr.msk.f32.mxu1 %vm315_vm3, %v7563_v17 }
0x1fc1   :  { %6691 = vmatmul.mubr.msk.f32.gmra.mrb[112].mxu1 %vm315_vm3, %v7564_v22 }
0x1fc2   :  { %6693 = vmatprep.mubr.msk.f32.mxu1 %vm315_vm3, %v7565_v28 }
0x1fc5   :  { %6694 = vmatmul.mubr.msk.f32.gmra.mrb[114].mxu1 %vm315_vm3, %v7566_v24 }
0x1fc6   :  { %6696 = vmatprep.mubr.msk.f32.mxu1 %vm315_vm3, %v7567_v41 }
0x1fc9   :  { %6697 = vmatmul.mubr.msk.f32.gmra.mrb[116].mxu1 %vm315_vm3, %v7568_v42 }
0x1fca   :  { %6699 = vmatprep.mubr.msk.f32.mxu1 %vm315_vm3, %v7569_v54 }
0x1fcd   :  { %6700 = vmatmul.mubr.msk.f32.gmra.mrb[118].mxu1 %vm315_vm3, %v7570_v43 }
0x1fce   :  { %6702 = vmatprep.mubr.msk.f32.mxu1 %vm315_vm3, %v7571_v57 }
0x1fd1   :  { %6703 = vmatmul.mubr.msk.f32.gmra.mrb[120].mxu1 %vm315_vm3, %v7572_v44 }
0x2068   :  { %v9343_v52 = vpop.f32.mrb[90].mxu1 }
0x2069   :  { %v9345_v13 = vpop.f32.mrb[91].mxu1  ;;  %v4364_v19 = vsel %vm1231_vm5, %v9343_v52, -inf }
0x206a   :  { %v4363_v20 = vsel %vm1231_vm5, %v9345_v13, -inf }
0x206c   :  { %v9347_v23 = vpop.f32.mrb[92].mxu1 }
0x206d   :  { %v9349_v16 = vpop.f32.mrb[93].mxu1  ;;  %v4366_v31 = vsel %vm1231_vm5, %v9347_v23, -inf }
0x206e   :  { %v4365_v39 = vsel %vm1231_vm5, %v9349_v16, -inf }
0x2070   :  { %v9351_v25 = vpop.f32.mrb[94].mxu1 }
0x2071   :  { %v4369_v11 = vsel %vm1231_vm5, %v9351_v25, -inf  ;;  %v9357_v0 = vpop.f32.mrb[95].mxu1 }
0x2072   :  { %v4370_v8 = vmax.f32 %v4364_v19, %v4369_v11  ;;  %v4367_v53 = vsel %vm1231_vm5, %v9357_v0, -inf  ;;  %v6715_v19 = vpop.f32.mrb[90].mxu0  ;;  %v9432_v11 = vld [vmem:[%s8014_s25 + $0x2] ss:$0 sm:$0xff]  ;;  %s7608_s25 = smov 33  }
0x2073   :  { %v4368_v62 = vmax.f32 %v4363_v20, %v4367_v53  ;;  %v4204_v53 = vpop.f32.mrb[91].mxu0 }
0x2074   :  { %v9363_v12 = vpop.f32.mrb[96].mxu1 }
0x2075   :  { %v4373_v26 = vsel %vm1231_vm5, %v9363_v12, -inf  ;;  %v9369_v3 = vpop.f32.mrb[97].mxu1 }
0x2076   :  { %v4374_v38 = vmax.f32 %v4366_v31, %v4373_v26  ;;  %v4371_v6 = vsel %vm1231_vm5, %v9369_v3, -inf  ;;  %v9440_v31 = vadd.f32 %v9432_v11, %v4204_v53  ;;  %v6718_v26 = vpop.f32.mrb[92].mxu0 }
0x2077   :  { %v4372_v10 = vmax.f32 %v4365_v39, %v4371_v6  ;;  %v9447_v6 = vadd.f32 %v6718_v26, %v9432_v11 }
0x2078   :  { %v9375_v1 = vpop.f32.mrb[98].mxu1 }
0x2079   :  { %v4377_v21 = vsel %vm1231_vm5, %v9375_v1, -inf  ;;  %v9379_v36 = vpop.f32.mrb[99].mxu1 }
0x207a   :  { %v4378_v60 = vmax.f32 %v4370_v8, %v4377_v21  ;;  %v4375_v59 = vsel %vm1231_vm5, %v9379_v36, -inf  ;;  %v9435_v8 = vadd.f32 %v6715_v19, %v9432_v11 }
0x207b   :  { %v4376_v14 = vmax.f32 %v4368_v62, %v4375_v59 }
0x207c   :  { %v9383_v50 = vpop.f32.mrb[100].mxu1 }
0x207d   :  { %v4381_v30 = vsel %vm1231_vm5, %v9383_v50, -inf  ;;  %v9387_v5 = vpop.f32.mrb[101].mxu1 }
0x207e   :  { %v4382_v32 = vmax.f32 %v4374_v38, %v4381_v30  ;;  %v4379_v9 = vsel %vm1231_vm5, %v9387_v5, -inf }
0x207f   :  { %v4380_v46 = vmax.f32 %v4372_v10, %v4379_v9  ;;  %v4214_v10 = vpop.f32.mrb[93].mxu0 }
0x2080   :  { %v9391_v55 = vpop.f32.mrb[102].mxu1  ;;  %v6721_v30 = vpop.f32.mrb[94].mxu0 }
0x2081   :  { %v4385_v47 = vsel %vm1231_vm5, %v9391_v55, -inf  ;;  %v9395_v2 = vpop.f32.mrb[103].mxu1  ;;  %v9457_v9 = vadd.f32 %v6721_v30, %v9432_v11 }
0x2082   :  { %v4386_v15 = vmax.f32 %v4378_v60, %v4385_v47  ;;  %v4383_v58 = vsel %vm1231_vm5, %v9395_v2, -inf }
0x2083   :  { %v4384_v40 = vmax.f32 %v4376_v14, %v4383_v58  ;;  %v9454_v14 = vadd.f32 %v9432_v11, %v4214_v10 }
0x2084   :  { %v9399_v18 = vpop.f32.mrb[104].mxu1 }
0x2085   :  { %v4389_v48 = vsel %vm1231_vm5, %v9399_v18, -inf  ;;  %v9403_v45 = vpop.f32.mrb[105].mxu1 }
0x2086   :  { %v4390_v7 = vmax.f32 %v4382_v32, %v4389_v48  ;;  %v4387_v29 = vsel %vm1231_vm5, %v9403_v45, -inf }
0x2087   :  { %v4388_v4 = vmax.f32 %v4380_v46, %v4387_v29  ;;  %v4224_v46 = vpop.f32.mrb[95].mxu0 }
0x2088   :  { %v9407_v37 = vpop.f32.mrb[106].mxu1  ;;  %v9464_v58 = vadd.f32 %v9432_v11, %v4224_v46 }
0x2089   :  { %v4393_v17 = vsel %vm1231_vm5, %v9407_v37, -inf  ;;  %v9411_v22 = vpop.f32.mrb[107].mxu1 }
0x208a   :  { %v4394_v27 = vmax.f32 %v4386_v15, %v4393_v17  ;;  %v4391_v28 = vsel %vm1231_vm5, %v9411_v22, -inf }
0x208b   :  { %v4392_v33 = vmax.f32 %v4384_v40, %v4391_v28  ;;  %v6724_v40 = vpop.f32.mrb[96].mxu0 }
0x208c   :  { %v9415_v61 = vpop.f32.mrb[108].mxu1  ;;  %v9471_v29 = vadd.f32 %v6724_v40, %v9432_v11 }
0x208d   :  { %v4397_v24 = vsel %vm1231_vm5, %v9415_v61, -inf  ;;  %v9419_v51 = vpop.f32.mrb[109].mxu1 }
0x208e   :  { %v4398_v41 = vmax.f32 %v4390_v7, %v4397_v24  ;;  %v4395_v49 = vsel %vm1231_vm5, %v9419_v51, -inf }
0x208f   :  { %v4396_v35 = vmax.f32 %v4388_v4, %v4395_v49  ;;  %v4234_v4 = vpop.f32.mrb[97].mxu0 }
0x2090   :  { %v9423_v42 = vpop.f32.mrb[110].mxu1  ;;  %v6727_v24 = vpop.f32.mrb[98].mxu0 }
0x2091   :  { %v4401_v54 = vsel %vm1231_vm5, %v9423_v42, -inf  ;;  %v9427_v43 = vpop.f32.mrb[111].mxu1  ;;  %v9481_v49 = vadd.f32 %v6727_v24, %v9432_v11 }
0x2092   :  { %v4402_v57 = vmax.f32 %v4394_v27, %v4401_v54  ;;  %v4399_v44 = vsel %vm1231_vm5, %v9427_v43, -inf }
0x2093   :  { %v4400_v20 = vmax.f32 %v4392_v33, %v4399_v44  ;;  %v9478_v33 = vadd.f32 %v9432_v11, %v4234_v4 }
0x2094   :  { %v9437_v62 = vpop.f32.mrb[112].mxu1 }
0x2095   :  { %v4405_v39 = vsel %vm1231_vm5, %v9437_v62, -inf  ;;  %v9444_v38 = vpop.f32.mrb[113].mxu1 }
0x2096   :  { %v4406_v21 = vmax.f32 %v4398_v41, %v4405_v39  ;;  %v4403_v60 = vsel %vm1231_vm5, %v9444_v38, -inf }
0x2097   :  { %v4404_v32 = vmax.f32 %v4396_v35, %v4403_v60  ;;  %v4244_v35 = vpop.f32.mrb[99].mxu0 }
0x2098   :  { %v9459_v47 = vpop.f32.mrb[114].mxu1  ;;  %v9488_v44 = vadd.f32 %v9432_v11, %v4244_v35  ;;  %v6730_v19 = vpop.f32.mrb[100].mxu0 }
0x2099   :  { %v4409_v48 = vsel %vm1231_vm5, %v9459_v47, -inf  ;;  %v9468_v7 = vpop.f32.mrb[115].mxu1  ;;  %v4254_v39 = vpop.f32.mrb[101].mxu0 }
0x209a   :  { %v4410_v17 = vmax.f32 %v4402_v57, %v4409_v48  ;;  %v4407_v27 = vsel %vm1231_vm5, %v9468_v7, -inf  ;;  %v9502_v46 = vadd.f32 %v9432_v11, %v4254_v39  ;;  %v6733_v40 = vpop.f32.mrb[102].mxu0 }
0x209b   :  { %v4408_v41 = vmax.f32 %v4400_v20, %v4407_v27  ;;  %v9495_v20 = vadd.f32 %v6730_v19, %v9432_v11  ;;  %v9505_v4 = vadd.f32 %v6733_v40, %v9432_v11  ;;  %v4264_v27 = vpop.f32.mrb[103].mxu0 }
0x209c   :  { %v9483_v54 = vpop.f32.mrb[116].mxu1  ;;  %v9512_v35 = vadd.f32 %v9432_v11, %v4264_v27  ;;  %v6736_v19 = vpop.f32.mrb[104].mxu0 }
0x209d   :  { %v4413_v53 = vsel %vm1231_vm5, %v9483_v54, -inf  ;;  %v9492_v26 = vpop.f32.mrb[117].mxu1  ;;  %9942 = vst [vmem:[#allocation9_spill] sm:$0xff] %v9505_v4 }
0x209e   :  { %v4414_v10 = vmax.f32 %v4406_v21, %v4413_v53  ;;  %v4411_v60 = vsel %vm1231_vm5, %v9492_v26, -inf  ;;  %9944 = vst [vmem:[#allocation6_spill] sm:$0xff] %v9512_v35 }
0x209f   :  { %v4412_v48 = vmax.f32 %v4404_v32, %v4411_v60  ;;  %v9519_v32 = vadd.f32 %v6736_v19, %v9432_v11  ;;  %v4274_v60 = vpop.f32.mrb[105].mxu0 }
0x20a0   :  { %v9507_v24 = vpop.f32.mrb[118].mxu1  ;;  %v9526_v27 = vadd.f32 %v9432_v11, %v4274_v60  ;;  %v6739_v57 = vpop.f32.mrb[106].mxu0 }
0x20a1   :  { %9943 = vst [vmem:[#allocation4_spill] sm:$0xff] %v9507_v24  ;;  %v4417_v53 = vsel %vm1231_vm5, %v9507_v24, -inf  ;;  %v9516_v39 = vpop.f32.mrb[119].mxu1  ;;  %9945 = vst [vmem:[#allocation7_spill] sm:$0xff] %v9519_v32  ;;  %v4290_v15 = vadd.f32 %v6739_v57, %v9432_v11  ;;  %v4284_v59 = vpop.f32.mrb[107].mxu0 }
0x20a2   :  { %v4418_v40 = vmax.f32 %v4410_v17, %v4417_v53  ;;  %v4415_v30 = vsel %vm1231_vm5, %v9516_v39, -inf  ;;  %9946 = vst [vmem:[#allocation2_spill] sm:$0xff] %v9526_v27  ;;  %v4285_v17 = vadd.f32 %v9432_v11, %v4284_v59  ;;  %v6742_v53 = vpop.f32.mrb[108].mxu0 }
0x20a3   :  { %v4416_v28 = vmax.f32 %v4408_v41, %v4415_v30  ;;  %v4300_v60 = vadd.f32 %v6742_v53, %v9432_v11  ;;  %v4294_v41 = vpop.f32.mrb[109].mxu0 }
0x20a4   :  { %v9529_v63 = vpop.f32.mrb[120].mxu1  ;;  %v7068_v35 = vpack.c.bf16 %v4290_v15, %v4285_v17  ;;  %v4295_v4 = vadd.f32 %v9432_v11, %v4294_v41  ;;  %v6745_v19 = vpop.f32.mrb[110].mxu0 }
0x20a5   :  { %9947 = vst [vmem:[#allocation8_spill] sm:$0xff] %v9529_v63  ;;  %v4423_v56 = vmax.f32 %v4416_v28, %v4418_v40  ;;  %v4421_v21 = vsel %vm1231_vm5, %v9529_v63, -inf  ;;  %v9536_v34 = vpop.f32.mrb[121].mxu1  ;;  %v4310_v59 = vadd.f32 %v6745_v19, %v9432_v11  ;;  %v4304_v28 = vpop.f32.mrb[111].mxu0 }
0x20a6   :  { %v4422_v30 = vmax.f32 %v4414_v10, %v4421_v21  ;;  %v4419_v57 = vsel %vm1231_vm5, %v9536_v34, -inf  ;;  %v7072_v40 = vpack.c.bf16 %v4300_v60, %v4295_v4  ;;  %7069 = vmatprep.subr.bf16.mxu1 %v7068_v35  ;;  %v4305_v32 = vadd.f32 %v9432_v11, %v4304_v28  ;;  %v6748_v63 = vpop.f32.mrb[112].mxu0 }
0x20a7   :  { %v4420_v27 = vmax.f32 %v4412_v48, %v4419_v57  ;;  %v9948_v10 = vpack.c.bf16 %v9435_v8, %v9440_v31  ;;  %v4320_v21 = vadd.f32 %v6748_v63, %v9432_v11  ;;  %v4314_v15 = vpop.f32.mrb[113].mxu0  ;;  %v9949_v8 = vpack.c.bf16 %v9447_v6, %v9454_v14 }
0x20a8   :  { %v7076_v17 = vpack.c.bf16 %v4310_v59, %v4305_v32  ;;  %v4315_v48 = vadd.f32 %v9432_v11, %v4314_v15  ;;  %v6751_v53 = vpop.f32.mrb[114].mxu0  ;;  %v9950_v6 = vpack.c.bf16 %v9457_v9, %v9464_v58 }
0x20a9   :  { %v4424_v24 = vmax.f32 %v4420_v27, %v4422_v30  ;;  %7071 = vmatpush3.bf16.msra.mxu1 %v9948_v10  ;;  %v4330_v4 = vadd.f32 %v6751_v53, %v9432_v11  ;;  %v4324_v35 = vpop.f32.mrb[115].mxu0 }
0x20aa   :  { %7073 = vmatprep.subr.bf16.mxu1 %v7072_v40  ;;  %v7080_v60 = vpack.c.bf16 %v4320_v21, %v4315_v48  ;;  %v4325_v41 = vadd.f32 %v9432_v11, %v4324_v35  ;;  %v6754_v27 = vpop.f32.mrb[116].mxu0 }
0x20ab   :  { %v4425_v19 = vmax.f32 %v4423_v56, %v4424_v24  ;;  %v4340_v63 = vadd.f32 %v6754_v27, %v9432_v11  ;;  %v4334_v31 = vpop.f32.mrb[117].mxu0 }
0x20ac   :  { %v7084_v32 = vpack.c.bf16 %v4330_v4, %v4325_v41  ;;  %v4335_v57 = vadd.f32 %v9432_v11, %v4334_v31  ;;  %v6757_v56 = vpop.f32.mrb[118].mxu0  ;;  %v9951_v41 = vpack.c.bf16 %v9471_v29, %v9478_v33 }
0x20ad   :  { %v4426_v30 = vrot.slane %v4425_v19, 4  ;;  %7075 = vmatpush3.bf16.msra.mxu1 %v9949_v8  ;;  %v4350_v59 = vadd.f32 %v6757_v56, %v9432_v11  ;;  %v4344_v28 = vpop.f32.mrb[119].mxu0 }
0x20ae   :  { %7077 = vmatprep.subr.bf16.mxu1 %v7076_v17  ;;  %v7088_v40 = vpack.c.bf16 %v4340_v63, %v4335_v57  ;;  %v4345_v10 = vadd.f32 %v9432_v11, %v4344_v28  ;;  %v6760_v21 = vpop.f32.mrb[120].mxu0  ;;  %v9954_v63 = vld [vmem:[#allocation4_spill] sm:$0xff] }
0x20af   :  { %v4427_v24 = vmax.f32 %v4425_v19, %v4426_v30  ;;  %v4360_v14 = vadd.f32 %v6760_v21, %v9432_v11  ;;  %v4354_v17 = vpop.f32.mrb[121].mxu0  ;;  %v9952_v30 = vpack.c.bf16 %v9481_v49, %v9488_v44  ;;  %v9955_v57 = vld [vmem:[#allocation8_spill] sm:$0xff] }
0x20b0   :  { %v7092_v48 = vpack.c.bf16 %v4350_v59, %v4345_v10  ;;  %v4355_v53 = vadd.f32 %v9432_v11, %v4354_v17  ;;  %v9957_v10 = vld [vmem:[#allocation6_spill] sm:$0xff] }
0x20b1   :  { %v4428_v15 = vrot.slane %v4427_v24, 2  ;;  %7079 = vmatpush3.bf16.msra.mxu1 %v9950_v6 }
0x20b2   :  { %7081 = vmatprep.subr.bf16.mxu1 %v7080_v60  ;;  %v7096_v4 = vpack.c.bf16 %v4360_v14, %v4355_v53  ;;  %v9960_v53 = vld [vmem:[#allocation2_spill] sm:$0xff] }
0x20b3   :  { %v4429_v19 = vmax.f32 %v4427_v24, %v4428_v15 }
0x20b5   :  { %v4430_v35 = vrot.slane %v4429_v19, 1  ;;  %7083 = vmatpush3.bf16.msra.mxu1 %v9951_v41  ;;  %v9962_v41 = vmov 0.0|0.0  }
0x20b6   :  { %7085 = vmatprep.subr.bf16.mxu1 %v7084_v32 }
0x20b7   :  { %v9566_v27 = vmax.f32 %v4429_v19, %v4430_v35 }
0x20b9   :  { %v4432_v9 = vsub.f32 %v9345_v13, %v9566_v27  ;;  %v4433_v58 = vsub.f32 %v9343_v52, %v9566_v27  ;;  %v4434_v60 = vsub.f32 %v9349_v16, %v9566_v27  ;;  %v4435_v11 = vsub.f32 %v9347_v23, %v9566_v27  ;;  %7087 = vmatpush3.bf16.msra.mxu1 %v9952_v30 }
0x20ba   :  { %v4436_v29 = vsub.f32 %v9357_v0, %v9566_v27  ;;  %v4437_v33 = vsub.f32 %v9351_v25, %v9566_v27  ;;  %v4438_v13 = vsub.f32 %v9369_v3, %v9566_v27  ;;  %v4439_v52 = vsub.f32 %v9363_v12, %v9566_v27  ;;  %7089 = vmatprep.subr.bf16.mxu1 %v7088_v40  ;;  %v9956_v40 = vld [vmem:[#allocation9_spill] sm:$0xff] }
0x20bb   :  { %v4440_v23 = vsub.f32 %v9379_v36, %v9566_v27  ;;  %v4441_v16 = vsub.f32 %v9375_v1, %v9566_v27  ;;  %v4442_v49 = vsub.f32 %v9387_v5, %v9566_v27  ;;  %v4443_v0 = vsub.f32 %v9383_v50, %v9566_v27 }
0x20bc   :  { %v4444_v25 = vsub.f32 %v9395_v2, %v9566_v27  ;;  %v4445_v3 = vsub.f32 %v9391_v55, %v9566_v27  ;;  %v4446_v12 = vsub.f32 %v9403_v45, %v9566_v27  ;;  %v4447_v36 = vsub.f32 %v9399_v18, %v9566_v27 }
0x20bd   :  { %v4448_v1 = vsub.f32 %v9411_v22, %v9566_v27  ;;  %v4449_v5 = vsub.f32 %v9407_v37, %v9566_v27  ;;  %v4450_v50 = vsub.f32 %v9419_v51, %v9566_v27  ;;  %v4451_v2 = vsub.f32 %v9415_v61, %v9566_v27 }
0x20be   :  { %v9953_v55 = vpack.c.bf16 %v9495_v20, %v9502_v46  ;;  %v4452_v45 = vsub.f32 %v9427_v43, %v9566_v27  ;;  %v4453_v18 = vsub.f32 %v9423_v42, %v9566_v27  ;;  %v4454_v22 = vsub.f32 %v9444_v38, %v9566_v27 }
0x20bf   :  { %v4455_v37 = vsub.f32 %v9437_v62, %v9566_v27  ;;  %v4456_v51 = vsub.f32 %v9468_v7, %v9566_v27  ;;  %v4457_v44 = vsub.f32 %v9459_v47, %v9566_v27  ;;  %v4458_v20 = vsub.f32 %v9492_v26, %v9566_v27 }
0x20c0   :  { %7091 = vmatpush3.bf16.msra.mxu1 %v9953_v55  ;;  %v4459_v46 = vsub.f32 %v9483_v54, %v9566_v27  ;;  %v4460_v8 = vsub.f32 %v9516_v39, %v9566_v27  ;;  %v4461_v31 = vsub.f32 %v9954_v63, %v9566_v27  ;;  %v4462_v32 = vsub.f32 %v9536_v34, %v9566_v27 }
0x20c1   :  { %7093 = vmatprep.subr.bf16.mxu1 %v7092_v48  ;;  %v4463_v56 = vsub.f32 %v9955_v57, %v9566_v27  ;;  %v4464_v24 = vmul.f32 1.442695, %v4432_v9  ;;  %v4466_v59 = vmul.f32 1.442695, %v4433_v58  ;;  %v4468_v28 = vmul.f32 1.442695, %v4434_v60 }
0x20c2   :  { %v9958_v21 = vpack.c.bf16 %v9956_v40, %v9957_v10  ;;  %v4470_v15 = vmul.f32 1.442695, %v4435_v11  ;;  %v4472_v6 = vmul.f32 1.442695, %v4436_v29  ;;  %v4474_v14 = vmul.f32 1.442695, %v4437_v33 }
0x20c3   :  { %7437 = vpow2.f32 %v4464_v24  ;;  %v4476_v17 = vmul.f32 1.442695, %v4438_v13  ;;  %v9959_v48 = vld [vmem:[#allocation7_spill] sm:$0xff]  ;;  %v4478_v35 = vmul.f32 1.442695, %v4439_v52 }
0x20c4   :  { %7095 = vmatpush3.bf16.msra.mxu1 %v9958_v21  ;;  %7439 = vpow2.f32 %v4466_v59  ;;  %v9961_v19 = vpack.c.bf16 %v9959_v48, %v9960_v53  ;;  %v4480_v9 = vmul.f32 1.442695, %v4440_v23  ;;  %v4482_v58 = vmul.f32 1.442695, %v4441_v16 }
0x20c5   :  { %7097 = vmatprep.subr.bf16.mxu1 %v7096_v4  ;;  %7441 = vpow2.f32 %v4468_v28  ;;  %v4484_v4 = vmul.f32 1.442695, %v4442_v49  ;;  %v4486_v60 = vmul.f32 1.442695, %v4443_v0  ;;  %v4488_v11 = vmul.f32 1.442695, %v4444_v25 }
0x20c6   :  { %7443 = vpow2.f32 %v4470_v15  ;;  %v4490_v30 = vmul.f32 1.442695, %v4445_v3  ;;  %v4492_v33 = vmul.f32 1.442695, %v4446_v12  ;;  %v4494_v52 = vmul.f32 1.442695, %v4447_v36 }
0x20c7   :  { %7445 = vpow2.f32 %v4472_v6  ;;  %v4496_v49 = vmul.f32 1.442695, %v4448_v1  ;;  %v4498_v3 = vmul.f32 1.442695, %v4449_v5  ;;  %v4500_v24 = vmul.f32 1.442695, %v4450_v50 }
0x20c8   :  { %7099 = vmatpush3.bf16.msra.mxu1 %v9961_v19  ;;  %7447 = vpow2.f32 %v4474_v14  ;;  %v4502_v1 = vmul.f32 1.442695, %v4451_v2  ;;  %v4504_v5 = vmul.f32 1.442695, %v4452_v45  ;;  %v4506_v21 = vmul.f32 1.442695, %v4453_v18 }
0x20c9   :  { %7100 = vmatprep.subr.bf16.mxu1 %v9962_v41  ;;  %7449 = vpow2.f32 %v4476_v17  ;;  %v4508_v15 = vmul.f32 1.442695, %v4454_v22  ;;  %v4510_v6 = vmul.f32 1.442695, %v4455_v37  ;;  %v4512_v14 = vmul.f32 1.442695, %v4456_v51 }
0x20ca   :  { %7451 = vpow2.f32 %v4478_v35  ;;  %v4514_v17 = vmul.f32 1.442695, %v4457_v44  ;;  %v4516_v48 = vmul.f32 1.442695, %v4458_v20  ;;  %v4518_v53 = vmul.f32 1.442695, %v4459_v46 }
0x20cb   :  { %7453 = vpow2.f32 %v4480_v9  ;;  %v4520_v19 = vmul.f32 1.442695, %v4460_v8  ;;  %v4522_v35 = vmul.f32 1.442695, %v4461_v31  ;;  %v4524_v9 = vmul.f32 1.442695, %v4462_v32 }
0x20cc   :  { %7455 = vpow2.f32 %v4482_v58  ;;  %v4526_v58 = vmul.f32 1.442695, %v4463_v56 }
0x20cd   :  { %v9645_v29 = vpop.eup %7437  ;;  %7457 = vpow2.f32 %v4484_v4 }
0x20ce   :  { %v9647_v13 = vpop.eup %7439  ;;  %7459 = vpow2.f32 %v4486_v60  ;;  %v4528_v23 = vsel %vm1231_vm5, %v9645_v29, 0.0 }
0x20cf   :  { %v9651_v16 = vpop.eup %7441  ;;  %7461 = vpow2.f32 %v4488_v11  ;;  %v4529_v0 = vsel %vm1231_vm5, %v9647_v13, 0.0 }
0x20d0   :  { %v9655_v25 = vpop.eup %7443  ;;  %7463 = vpow2.f32 %v4490_v30  ;;  %v4530_v55 = vadd.f32 %v4529_v0, %v4528_v23  ;;  %v4531_v36 = vsel %vm1231_vm5, %v9651_v16, 0.0 }
0x20d1   :  { %v9657_v12 = vpop.eup %7445  ;;  %7465 = vpow2.f32 %v4492_v33  ;;  %v4533_v50 = vsel %vm1231_vm5, %v9655_v25, 0.0 }
0x20d2   :  { %v9661_v59 = vpop.eup %7447  ;;  %7467 = vpow2.f32 %v4494_v52  ;;  %v4532_v28 = vadd.f32 %v4531_v36, %v4530_v55  ;;  %v4535_v43 = vsel %vm1231_vm5, %v9657_v12, 0.0 }
0x20d3   :  { %v9666_v40 = vpop.eup %7449  ;;  %7469 = vpow2.f32 %v4496_v49  ;;  %v4537_v38 = vsel %vm1231_vm5, %v9661_v59, 0.0 }
0x20d4   :  { %v9673_v10 = vpop.eup %7451  ;;  %7471 = vpow2.f32 %v4498_v3  ;;  %v4534_v61 = vadd.f32 %v4533_v50, %v4532_v28  ;;  %v4539_v7 = vsel %vm1231_vm5, %v9666_v40, 0.0 }
0x20d5   :  { %v9678_v2 = vpop.eup %7453  ;;  %7473 = vpow2.f32 %v4500_v24  ;;  %v4541_v26 = vsel %vm1231_vm5, %v9673_v10, 0.0 }
0x20d6   :  { %v9685_v45 = vpop.eup %7455  ;;  %7475 = vpow2.f32 %v4502_v1  ;;  %v4536_v42 = vadd.f32 %v4535_v43, %v4534_v61  ;;  %v4543_v39 = vsel %vm1231_vm5, %v9678_v2, 0.0 }
0x20d7   :  { %v9690_v18 = vpop.eup %7457  ;;  %7477 = vpow2.f32 %v4504_v5  ;;  %v4545_v60 = vsel %vm1231_vm5, %v9685_v45, 0.0 }
0x20d8   :  { %v9697_v22 = vpop.eup %7459  ;;  %7479 = vpow2.f32 %v4506_v21  ;;  %v4538_v62 = vadd.f32 %v4537_v38, %v4536_v42  ;;  %v4547_v27 = vsel %vm1231_vm5, %v9690_v18, 0.0 }
0x20d9   :  { %v9702_v37 = vpop.eup %7461  ;;  %7481 = vpow2.f32 %v4508_v15 }
0x20da   :  { %v9709_v51 = vpop.eup %7463  ;;  %7483 = vpow2.f32 %v4510_v6  ;;  %v4540_v47 = vadd.f32 %v4539_v7, %v4538_v62 }
0x20db   :  { %v9714_v44 = vpop.eup %7465  ;;  %7485 = vpow2.f32 %v4512_v14  ;;  %v4553_v5 = vsel %vm1231_vm5, %v9709_v51, 0.0 }
0x20dc   :  { %v9721_v20 = vpop.eup %7467  ;;  %7487 = vpow2.f32 %v4514_v17  ;;  %v4542_v54 = vadd.f32 %v4541_v26, %v4540_v47  ;;  %v4555_v15 = vsel %vm1231_vm5, %v9714_v44, 0.0 }
0x20dd   :  { %v7470_v46 = vpop.eup %7469  ;;  %7489 = vpow2.f32 %v4516_v48  ;;  %v4557_v14 = vsel %vm1231_vm5, %v9721_v20, 0.0 }
0x20de   :  { %v7472_v8 = vpop.eup %7471  ;;  %7491 = vpow2.f32 %v4518_v53  ;;  %v4544_v4 = vadd.f32 %v4543_v39, %v4542_v54  ;;  %v7252_v63 = vpack.i.bf16 %v9645_v29, %v7470_v46  ;;  %v4559_v62 = vsel %vm1231_vm5, %v7470_v46, 0.0 }
0x20df   :  { %v7474_v31 = vpop.eup %7473  ;;  %7493 = vpow2.f32 %v4520_v19  ;;  %v7254_v34 = vpack.i.bf16 %v9647_v13, %v7472_v8  ;;  %v4549_v13 = vsel %vm1231_vm5, %v9697_v22, 0.0  ;;  %v4561_v7 = vsel %vm1231_vm5, %v7472_v8, 0.0 }
0x20e0   :  { %v7476_v32 = vpop.eup %7475  ;;  %7495 = vpow2.f32 %v4522_v35  ;;  %v4546_v11 = vadd.f32 %v4545_v60, %v4544_v4  ;;  %7253 = vxpose.xlu0.b32.start [1/16] (narrow) %v7252_v63, 8  ;;  %v7256_v30 = vpack.i.bf16 %v9651_v16, %v7474_v31 }
0x20e1   :  { %v7478_v33 = vpop.eup %7477  ;;  %7497 = vpow2.f32 %v4524_v9  ;;  %v7258_v57 = vpack.i.bf16 %v9655_v25, %v7476_v32  ;;  %v4551_v25 = vsel %vm1231_vm5, %v9702_v37, 0.0  ;;  %v4565_v19 = vsel %vm1231_vm5, %v7476_v32, 0.0 }
0x20e2   :  { %v7480_v56 = vpop.eup %7479  ;;  %7499 = vpow2.f32 %v4526_v58  ;;  %v4548_v29 = vadd.f32 %v4547_v27, %v4546_v11  ;;  %v7260_v52 = vpack.i.bf16 %v9657_v12, %v7478_v33  ;;  %v4567_v26 = vsel %vm1231_vm5, %v7478_v33, 0.0 }
0x20e3   :  { %v7482_v23 = vpop.eup %7481  ;;  %v7262_v49 = vpack.i.bf16 %v9661_v59, %v7480_v56 }
0x20e4   :  { %v7484_v0 = vpop.eup %7483  ;;  %v4550_v16 = vadd.f32 %v4549_v13, %v4548_v29  ;;  %7255 = vxpose.xlu0.b32.cont [2/16] (narrow) %v7254_v34, 8  ;;  %v7264_v3 = vpack.i.bf16 %v9666_v40, %v7482_v23 }
0x20e5   :  { %v7486_v55 = vpop.eup %7485  ;;  %v7266_v24 = vpack.i.bf16 %v9673_v10, %v7484_v0  ;;  %v4573_v9 = vsel %vm1231_vm5, %v7484_v0, 0.0 }
0x20e6   :  { %v7488_v36 = vpop.eup %7487  ;;  %v4552_v1 = vadd.f32 %v4551_v25, %v4550_v16  ;;  %v7268_v12 = vpack.i.bf16 %v9678_v2, %v7486_v55  ;;  %v4575_v8 = vsel %vm1231_vm5, %v7486_v55, 0.0  ;;  %v9963_v55 = vmov 0.0  }
0x20e7   :  { %v7490_v28 = vpop.eup %7489  ;;  %v7270_v59 = vpack.i.bf16 %v9685_v45, %v7488_v36  ;;  %v4577_v4 = vsel %vm1231_vm5, %v7488_v36, 0.0 }
0x20e8   :  { %v7492_v50 = vpop.eup %7491  ;;  %v4554_v21 = vadd.f32 %v4553_v5, %v4552_v1  ;;  %7257 = vxpose.xlu0.b32.cont [3/16] (narrow) %v7256_v30, 8  ;;  %v7272_v40 = vpack.i.bf16 %v9690_v18, %v7490_v28  ;;  %v5683_v1 = vld [vmem:[%s8370_s1 + $0x40] sm:$0xff] }
0x20e9   :  { %v7494_v61 = vpop.eup %7493  ;;  %v7274_v10 = vpack.i.bf16 %v9697_v22, %v7492_v50  ;;  %v4581_v34 = vsel %vm1231_vm5, %v7492_v50, 0.0 }
0x20ea   :  { %v7496_v43 = vpop.eup %7495  ;;  %v4556_v6 = vadd.f32 %v4555_v15, %v4554_v21  ;;  %v7276_v2 = vpack.i.bf16 %v9702_v37, %v7494_v61  ;;  %v4563_v37 = vsel %vm1231_vm5, %v7474_v31, 0.0  ;;  %v4579_v31 = vsel %vm1231_vm5, %v7490_v28, 0.0  ;;  %v5685_v28 = vld [vmem:[%s8370_s1 + $0x50] sm:$0xff] }
0x20eb   :  { %v7498_v42 = vpop.eup %7497  ;;  %v7278_v45 = vpack.i.bf16 %v9709_v51, %v7496_v43  ;;  %v4583_v11 = vsel %vm1231_vm5, %v7494_v61, 0.0  ;;  %v4585_v33 = vsel %vm1231_vm5, %v7496_v43, 0.0  ;;  %v7573_v43 = vld [vmem:[%s7746_s8] sm:$0xff] }
0x20ec   :  { %v7500_v38 = vpop.eup %7499  ;;  %v4558_v17 = vadd.f32 %v4557_v14, %v4556_v6  ;;  %7259 = vxpose.xlu0.b32.cont [4/16] (narrow) %v7258_v57, 8  ;;  %v7280_v18 = vpack.i.bf16 %v9714_v44, %v7498_v42  ;;  %v4569_v44 = vsel %vm1231_vm5, %v7480_v56, 0.0  ;;  %v4587_v57 = vsel %vm1231_vm5, %v7498_v42, 0.0 }
0x20ed   :  { %v7282_v48 = vpack.i.bf16 %v9721_v20, %v7500_v38  ;;  %v4571_v20 = vsel %vm1231_vm5, %v7482_v23, 0.0  ;;  %v4589_v29 = vsel %vm1231_vm5, %v7500_v38, 0.0 }
0x20ee   :  { %v4560_v22 = vadd.f32 %v4559_v62, %v4558_v17 }
0x20f0   :  { %v4562_v53 = vadd.f32 %v4561_v7, %v4560_v22  ;;  %7261 = vxpose.xlu0.b32.cont [5/16] (narrow) %v7260_v52, 8  ;;  %v5687_v22 = vld [vmem:[%s8389_s6 + $0x2] sm:$0x1] }
0x20f2   :  { %v4564_v47 = vadd.f32 %v4563_v37, %v4562_v53 }
0x20f4   :  { %v4566_v51 = vadd.f32 %v4565_v19, %v4564_v47  ;;  %7263 = vxpose.xlu0.b32.cont [6/16] (narrow) %v7262_v49, 8  ;;  %v9964_v47 = vld [vmem:[#allocation5_spill] sm:$0xff] }
0x20f6   :  { %v4568_v35 = vadd.f32 %v4567_v26, %v4566_v51 }
0x20f8   :  { %v4570_v54 = vadd.f32 %v4569_v44, %v4568_v35  ;;  %7265 = vxpose.xlu0.b32.cont [7/16] (narrow) %v7264_v3, 8 }
0x20fa   :  { %v4572_v46 = vadd.f32 %v4571_v20, %v4570_v54 }
0x20fc   :  { %v4574_v39 = vadd.f32 %v4573_v9, %v4572_v46  ;;  %7267 = vxpose.xlu0.b32.cont [8/16] (narrow) %v7266_v24, 8  ;;  %v5691_v46 = vld [vmem:[%s8398_s14 + $0x40] sm:$0xff]  ;;  %v5692_v9 = vld [vmem:[%s8398_s14 + $0x48] sm:$0xff] }
0x20fe   :  { %v4576_v58 = vadd.f32 %v4575_v8, %v4574_v39  ;;  %v5693_v39 = vld [vmem:[%s8398_s14 + $0x50] sm:$0xff]  ;;  %v7107_v8 = vpack.c.bf16 %v5692_v9, %v5691_v46  ;;  %v5181_v46 = vld [vmem:[%s5372_s28 + $0x18] sm:$0xff] }
0x2100   :  { %v4578_v63 = vadd.f32 %v4577_v4, %v4576_v58  ;;  %7269 = vxpose.xlu0.b32.cont [9/16] (narrow) %v7268_v12, 8  ;;  %v5684_v12 = vld [vmem:[%s8370_s1 + $0x48] sm:$0xff]  ;;  %v5694_v58 = vld [vmem:[%s8398_s14 + $0x58] sm:$0xff]  ;;  %s5374_s14 = sld [smem:[%s9857_s0 + %s7608_s25]]  }
0x2101   :  { %v7101_v5 = vpack.c.bf16 %v5684_v12, %v5683_v1  ;;  %v7110_v4 = vpack.c.bf16 %v5694_v58, %v5693_v39  ;;  %v5103_v39 = vld [vmem:[%s5371_s19] sm:$0x1] }
0x2102   :  { %v4580_v60 = vadd.f32 %v4579_v31, %v4578_v63  ;;  %v5697_v63 = vld [vmem:[%s8406_s22 + $0x80] sm:$0xff]  ;;  %v5698_v31 = vld [vmem:[%s8406_s22 + $0x88] sm:$0xff] }
0x2104   :  { %v4582_v32 = vadd.f32 %v4581_v34, %v4580_v60  ;;  %7271 = vxpose.xlu0.b32.cont [10/16] (narrow) %v7270_v59, 8  ;;  %v5686_v59 = vld [vmem:[%s8370_s1 + $0x58] sm:$0xff]  ;;  %v5699_v60 = vld [vmem:[%s8406_s22 + $0x90] sm:$0xff]  ;;  %v7113_v34 = vpack.c.bf16 %v5698_v31, %v5697_v63 }
0x2105   :  { %v7104_v50 = vpack.c.bf16 %v5686_v59, %v5685_v28  ;;  %v5705_v59 = vld [vmem:[%s8450_s27 + $0x2] sm:$0x1] }
0x2106   :  { %v4584_v30 = vadd.f32 %v4583_v11, %v4582_v32  ;;  %v5700_v32 = vld [vmem:[%s8406_s22 + $0x98] sm:$0xff] }
0x2107   :  { %v7116_v11 = vpack.c.bf16 %v5700_v32, %v5699_v60 }
0x2108   :  { %v4586_v27 = vadd.f32 %v4585_v33, %v4584_v30  ;;  %7273 = vxpose.xlu0.b32.cont [11/16] (narrow) %v7272_v40, 8  ;;  %v5701_v30 = vld [vmem:[%s8406_s22 + $0xa0] sm:$0xff]  ;;  %v5702_v33 = vld [vmem:[%s8406_s22 + $0xa8] sm:$0xff] }
0x210a   :  { %v4588_v56 = vadd.f32 %v4587_v57, %v4586_v27  ;;  %v7119_v27 = vpack.c.bf16 %v5702_v33, %v5701_v30 }
0x210c   :  { %v4590_v52 = vadd.f32 %v4589_v29, %v4588_v56  ;;  %7275 = vxpose.xlu0.b32.cont [12/16] (narrow) %v7274_v10, 8 }
0x210e   :  { %v4591_v23 = vrot.slane %v4590_v52, 4 }
0x2110   :  { %v4592_v13 = vadd.f32 %v4591_v23, %v4590_v52  ;;  %7277 = vxpose.xlu0.b32.cont [13/16] (narrow) %v7276_v2, 8  ;;  %v5689_v23 = vld [vmem:[%s8423_s30 + $0x2] sm:$0x1] }
0x2112   :  { %v4593_v49 = vrot.slane %v4592_v13, 2 }
0x2114   :  { %7279 = vxpose.xlu0.b32.cont [14/16] (narrow) %v7278_v45, 8  ;;  %v4594_v0 = vadd.f32 %v4593_v49, %v4592_v13  ;;  %v5690_v49 = vld [vmem:[%s8428_s9 + $0x2] sm:$0x1] }
0x2116   :  { %v4595_v16 = vrot.slane %v4594_v0, 1 }
0x2118   :  { %7281 = vxpose.xlu0.b32.cont [15/16] (narrow) %v7280_v18, 8  ;;  %v4596_v3 = vadd.f32 %v4595_v16, %v4594_v0 }
0x211a   :  { %6764 = vmatmul.mubr.msk.f32.vlgmr.msra.gmra.mrb[122].mxu0 %vm1231_vm5, %v4596_v3  ;;  %v5703_v3 = vld [vmem:[%s8406_s22 + $0xb0] sm:$0xff] }
0x211b   :  { %6785 = vmatprep.mubr.msk.f32.mxu0 %vm7576_vm0, %v9963_v55  ;;  %7108 = vmatpush3.bf16.msra.mxu0 %v7107_v8 }
0x211c   :  { %7283 = vxpose.xlu0.b32.end [16/16] (narrow) %v7282_v48, 8  ;;  %7109 = vmatprep.subr.bf16.mxu0 %v9962_v41 }
0x211f   :  { %7111 = vmatpush3.bf16.msra.mxu0 %v7110_v4 }
0x2120   :  { %7124 = vmatprep.subr.bf16.mxu0 %v9962_v41 }
0x2160   :  { %v7284_v25 = vpop.trf.xlu0 }
0x2161   :  { %v7288_v24 = vunpack.i.h.bf16 %v7284_v25  ;;  %v7285_v36 = vunpack.i.l.bf16 %v7284_v25  ;;  %v5704_v25 = vld [vmem:[%s8406_s22 + $0xb8] sm:$0xff]  ;;  %s7610_s22 = smov 32  }
0x2163   :  { %4725 = vmatprep.mubr.f32.mxu1 %v7285_v36  ;;  %v5695_v36 = vld [vmem:[%s8441_s18 + $0x2] sm:$0x1]  ;;  %s5373_s18 = sld [smem:[%s9857_s0 + %s7610_s22]]  }
0x2164   :  { %4726 = vmatmul.mubr.f32.vlgmr.msra.gmra.mrb[122].mxu1 %v7288_v24  ;;  %v7122_v24 = vpack.c.bf16 %v5704_v25, %v5703_v3 }
0x2165   :  { %6774 = vmatprep.mubr.msk.f32.mxu1 %vm7576_vm0, %v9963_v55  ;;  %7102 = vmatpush3.bf16.msra.mxu1 %v7101_v5 }
0x2166   :  { %7103 = vmatprep.subr.bf16.mxu1 %v9962_v41 }
0x2169   :  { %7105 = vmatpush3.bf16.msra.mxu1 %v7104_v50  ;;  %v5182_v60 = vld [vmem:[%s5373_s18] sm:$0x1] }
0x216a   :  { %7112 = vmatprep.subr.bf16.mxu1 %v9962_v41 }
0x21ed   :  { %v4800_v21 = vpop.f32.mrb[122].mxu0 }
0x21ee   :  { %v6765_v40 = vpop.f32.mrb[123].mxu0  ;;  %7501 = vrcp.f32 %v4800_v21 }
0x21f8   :  { %v7502_v62 = vpop.eup %7501 }
0x2237   :  { %v6146_v61 = vpop.f32.mrb[122].mxu1 }
0x2238   :  { %v6147_v15 = vpop.f32.mrb[123].mxu1 }
0x2239   :  { %v6148_v10 = vadd.f32 %v6147_v15, %v6146_v61 }
0x223b   :  { %v4805_v6 = vmul.f32 %v7573_v43, %v6148_v10 }
0x223d   :  { %v4806_v2 = vsel %vm315_vm3, %v4805_v6, 0.0 }
0x223e   :  { %v4807_v42 = vrot.slane %v4806_v2, 4 }
0x2240   :  { %v4808_v14 = vadd.f32 %v4807_v42, %v4806_v2 }
0x2242   :  { %v4809_v45 = vrot.slane %v4808_v14, 2 }
0x2244   :  { %v4810_v38 = vadd.f32 %v4809_v45, %v4808_v14  ;;  %v5099_v14 = vld [vmem:[%s5370_s11] sm:$0xff]  ;;  %v5100_v45 = vld [vmem:[%s5370_s11 + $0x8] sm:$0xff] }
0x2246   :  { %v4811_v17 = vrot.slane %v4810_v38, 1 }
0x2248   :  { %v4812_v18 = vadd.f32 %v4811_v17, %v4810_v38  ;;  %v5101_v38 = vld [vmem:[%s5370_s11 + $0x10] sm:$0xff]  ;;  %v7125_v17 = vpack.c.bf16 %v5100_v45, %v5099_v14 }
0x224a   :  { %v4813_v48 = vmul.f32 %v7502_v62, %v4812_v18  ;;  %v5102_v18 = vld [vmem:[%s5370_s11 + $0x18] sm:$0xff] }
0x224b   :  { %v7128_v62 = vpack.c.bf16 %v5102_v18, %v5101_v38 }
0x224c   :  { %6775 = vmatmul.mubr.msk.f32.vlgmr.msra.gmra.mrb[124].mxu1 %vm315_vm3, %v4813_v48 }
0x224d   :  { %6804 = vmatprep.mubr.msk.f32.mxu1 %vm7576_vm0, %v9963_v55  ;;  %7114 = vmatpush3.bf16.msra.mxu1 %v7113_v34 }
0x224e   :  { %7115 = vmatprep.subr.bf16.mxu1 %v9962_v41 }
0x2251   :  { %7117 = vmatpush3.bf16.msra.mxu1 %v7116_v11 }
0x2252   :  { %7118 = vmatprep.subr.bf16.mxu1 %v9962_v41 }
0x2255   :  { %7120 = vmatpush3.bf16.msra.mxu1 %v7119_v27 }
0x2256   :  { %7121 = vmatprep.subr.bf16.mxu1 %v9962_v41 }
0x2259   :  { %7123 = vmatpush3.bf16.msra.mxu1 %v7122_v24 }
0x225a   :  { %7136 = vmatprep.subr.bf16.mxu1 %v9962_v41 }
0x231f   :  { %v4890_v7 = vpop.f32.mrb[124].mxu1 }
0x2320   :  { %v4891_v53 = vadd.f32 %v5687_v22, %v4890_v7  ;;  %v6776_v37 = vpop.f32.mrb[125].mxu1 }
0x2321   :  { %v5707_v37 = vld [vmem:[%s8464_s10 + $0x2] sm:$0x1] }
0x2322   :  { %v4894_v19 = vadd.f32 %v4891_v53, %v9964_v47 }
0x2324   :  { %v4899_v51 = vsel %vm470_vm4, %v4894_v19, 0.0 }
0x2325   :  { %4900 = vadd.xlane.f32.xlu1 %v4899_v51  ;;  %v5179_v51 = vld [vmem:[%s5372_s28 + $0x8] sm:$0xff] }
0x23b2   :  { %v4901_v26 = vpop.xlane.xlu1 %4900 }
0x23b3   :  { %v4902_v35 = vmul.f32 0.03125, %v4901_v26  ;;  %v5708_v26 = vld [vmem:[%s8469_s23 + $0x2] sm:$0x1] }
0x23b5   :  { %v4903_v44 = vsub.f32 %v4894_v19, %v4902_v35  ;;  %v5178_v19 = vld [vmem:[%s5372_s28] sm:$0xff] }
0x23b7   :  { %v4904_v54 = vmul.f32 %v4903_v44, %v4903_v44 }
0x23b9   :  { %v4905_v20 = vsel %vm470_vm4, %v4904_v54, 0.0 }
0x23ba   :  { %4906 = vadd.xlane.f32.xlu1 %v4905_v20  ;;  %v5180_v20 = vld [vmem:[%s5372_s28 + $0x10] sm:$0xff] }
0x23bb   :  { %v7134_v9 = vpack.c.bf16 %v5181_v46, %v5180_v20 }
0x2447   :  { %v4907_v57 = vpop.xlane.xlu1 %4906 }
0x2448   :  { %v4908_v56 = vmul.f32 0.03125, %v4907_v57 }
0x244a   :  { %v4909_v29 = vadd.f32 1e-05, %v4908_v56 }
0x244c   :  { %7503 = vrsqrt.f32 %v4909_v29 }
0x2456   :  { %v7504_v52 = vpop.eup %7503 }
0x2457   :  { %v4911_v13 = vmul.f32 %v7504_v52, %v4903_v44  ;;  %v7131_v44 = vpack.c.bf16 %v5179_v51, %v5178_v19 }
0x2459   :  { %v4912_v0 = vmul.f32 %v5689_v23, %v4911_v13 }
0x245b   :  { %v4913_v16 = vadd.f32 %v5690_v49, %v4912_v0 }
0x245d   :  { %6786 = vmatmul.mubr.msk.f32.vlgmr.msra.gmra.mrb[124].mxu0 %vm315_vm3, %v4913_v16 }
0x245e   :  { %6815 = vmatprep.mubr.msk.f32.mxu0 %vm7576_vm0, %v9963_v55  ;;  %7126 = vmatpush3.bf16.msra.mxu0 %v7125_v17 }
0x245f   :  { %7127 = vmatprep.subr.bf16.mxu0 %v9962_v41 }
0x2462   :  { %7129 = vmatpush3.bf16.msra.mxu0 %v7128_v62 }
0x2463   :  { %7130 = vmatprep.subr.bf16.mxu0 %v9962_v41 }
0x2530   :  { %v4990_v1 = vpop.f32.mrb[124].mxu0 }
0x2531   :  { %v4991_v12 = vadd.f32 %v5695_v36, %v4990_v1  ;;  %v6787_v28 = vpop.f32.mrb[125].mxu0 }
0x2533   :  { %v4994_v5 = vmax.f32 %v4991_v12, 0.0 }
0x2535   :  { %6805 = vmatmul.mubr.msk.f32.vlgmr.msra.gmra.mrb[126].mxu1 %vm1867_vm6, %v4994_v5 }
0x2536   :  { %6833 = vmatprep.mubr.msk.f32.mxu1 %vm7576_vm0, %v9963_v55 }
0x2608   :  { %v5075_v50 = vpop.f32.mrb[126].mxu1 }
0x2609   :  { %v5076_v21 = vadd.f32 %v5705_v59, %v5075_v50  ;;  %v6806_v40 = vpop.f32.mrb[127].mxu1 }
0x260b   :  { %v5079_v61 = vadd.f32 %v5076_v21, %v4913_v16 }
0x260d   :  { %v5084_v15 = vsel %vm470_vm4, %v5079_v61, 0.0 }
0x260e   :  { %5085 = vadd.xlane.f32.xlu1 %v5084_v15 }
0x269b   :  { %v5086_v10 = vpop.xlane.xlu1 %5085 }
0x269c   :  { %v5087_v43 = vmul.f32 0.03125, %v5086_v10 }
0x269e   :  { %v5088_v6 = vsub.f32 %v5079_v61, %v5087_v43 }
0x26a0   :  { %v5089_v2 = vmul.f32 %v5088_v6, %v5088_v6 }
0x26a2   :  { %v5090_v42 = vsel %vm470_vm4, %v5089_v2, 0.0 }
0x26a3   :  { %5091 = vadd.xlane.f32.xlu1 %v5090_v42 }
0x2730   :  { %v5092_v48 = vpop.xlane.xlu1 %5091 }
0x2731   :  { %v5093_v22 = vmul.f32 0.03125, %v5092_v48 }
0x2733   :  { %v5094_v7 = vadd.f32 1e-05, %v5093_v22 }
0x2735   :  { %7505 = vrsqrt.f32 %v5094_v7 }
0x273f   :  { %v7506_v53 = vpop.eup %7505 }
0x2740   :  { %v5096_v47 = vmul.f32 %v7506_v53, %v5088_v6 }
0x2742   :  { %v5097_v35 = vmul.f32 %v5707_v37, %v5096_v47 }
0x2744   :  { %v5098_v54 = vadd.f32 %v5708_v26, %v5097_v35 }
0x2746   :  { %6816 = vmatmul.mubr.msk.f32.vlgmr.msra.gmra.mrb[126].mxu0 %vm315_vm3, %v5098_v54 }
0x2747   :  { %7132 = vmatpush3.bf16.msra.mxu0 %v7131_v44  ;;  %6826 = vmatprep.mubr.msk.f32.mxu0 %vm7576_vm0, %v9963_v55  ;;  %v5257_v55 = vld [vmem:[%s5374_s14 + $0x8] sm:$0xf] }
0x2748   :  { %7133 = vmatprep.subr.bf16.mxu0 %v9962_v41  ;;  %v5256_v41 = vld [vmem:[%s5374_s14] sm:$0xff] }
0x2749   :  { %v7137_v31 = vpack.c.bf16 %v5257_v55, %v5256_v41 }
0x274b   :  { %7135 = vmatpush3.bf16.msra.mxu0 %v7134_v9  ;;  %7139 = vmatpush3.bf16.msk.msra.mxu1 %vm7138_vm9, %v7137_v31 }
0x2819   :  { %v5173_v8 = vpop.f32.mrb[126].mxu0 }
0x281a   :  { %v5174_v58 = vadd.f32 %v5173_v8, %v5103_v39  ;;  %v6817_v4 = vpop.f32.mrb[127].mxu0 }
0x281c   :  { %v5177_v63 = vmax.f32 %v5174_v58, 0.0 }
0x281e   :  { %6827 = vmatmul.mubr.msk.f32.vlgmr.msra.gmra.mrb[128].mxu0 %vm315_vm3, %v5177_v63 }
0x28f1   :  { %v5252_v34 = vpop.f32.mrb[128].mxu0 }
0x28f2   :  { %v5253_v32 = vadd.f32 %v5252_v34, %v5182_v60  ;;  %v6828_v11 = vpop.f32.mrb[129].mxu0 }
0x28f4   :  { %6834 = vmatmul.mubr.msk.f32.vlgmr.msra.gmra.mrb[128].mxu1 %vm5258_vm10, %v5253_v32 }
0x29c7   :  { %v5332_v30 = vpop.f32.mrb[128].mxu1 }
0x29c8   :  { %5337 = vst.msk [vmem:[%s5375_s4] sm:$0x1] %vm5336_vm11, %v5332_v30  ;;  %v6835_v33 = vpop.f32.mrb[129].mxu1 }

</bundles_post_ra>
